<compile_context>
chip_gen: v7x
topology: tpu7x:2x2x1
jax: 0.10.0
libtpu: 0.0.40
codegen_flags: <defaults>
</compile_context>

<pallas_src>
import functools

import numpy as np
import jax
import jax.numpy as jnp
from jax.experimental import pallas as pl
from jax.experimental.pallas import tpu as pltpu

SCALER = 300.0                 # model_input_sizes['B3']
C_STEM, C_B1, C_EXP, C_B2, C_HEAD, SE_R = 16, 16, 64, 24, 64, 4
CP = 128                       # lane-padded channel width used inside the fused kernel


# ------------------------------ fused Pallas kernel ------------------------------ #

def _swish(x):
    return x * jax.nn.sigmoid(x)


def fused_forward_kernel(
    patches_ref,
    stem_w_ref, stem_sc_ref, stem_sh_ref,
    s1_ref, dw1_w_ref, dw1_sc_ref, dw1_sh_ref,
    se1_w1_ref, se1_b1_ref, se1_w2_ref, se1_b2_ref,
    pj1_w_ref, pj1_sc_ref, pj1_sh_ref,
    exp_w_ref, exp_sc_ref, exp_sh_ref,
    s2_ref, dw2_w_ref, dw2_sc_ref, dw2_sh_ref,
    se2_w1_ref, se2_b1_ref, se2_w2_ref, se2_b2_ref,
    pj2_w_ref, pj2_sc_ref, pj2_sh_ref,
    head_w_ref, head_sc_ref, head_sh_ref,
    fc_w_ref, fc_b_ref,
    o_ref, *, scaler):
    """One sample per grid step; all activations stay resident in VMEM/vregs."""

    def mm(a, b):          # bf16 MXU operands, f32 accumulation
        return jnp.dot(a.astype(jnp.bfloat16), b, preferred_element_type=jnp.float32)

    def dwconv(x, s_ref, w_ref, sc_ref, sh_ref):
        # depthwise 3x3 as 9 tap-gather matmuls: sum_k (S_k @ x) * w_k, then BN + swish
        xb = x.astype(jnp.bfloat16)
        acc = jnp.dot(s_ref[0], xb, preferred_element_type=jnp.float32) * w_ref[0]
        for k in range(1, 9):                                   # static unroll
            acc = acc + jnp.dot(s_ref[k], xb, preferred_element_type=jnp.float32) * w_ref[k]
        return _swish(acc * sc_ref[...] + sh_ref[...])

    def se(x, w1_ref, b1_ref, w2_ref, b2_ref):
        pooled = jnp.mean(x, axis=0, keepdims=True)             # (1, CP) per-sample pool
        hidden = _swish(mm(pooled, w1_ref[...]) + b1_ref[...])
        return x * jax.nn.sigmoid(mm(hidden, w2_ref[...]) + b2_ref[...])

    # stem: 3x3 / s2 conv (as im2col matmul) + BN + swish        -> (M1, CP)
    h = jnp.dot(patches_ref[...], stem_w_ref[...], preferred_element_type=jnp.float32)
    h = _swish(h * stem_sc_ref[...] + stem_sh_ref[...])

    # block 1: depthwise 3x3 s1 + BN + swish, SE, 1x1 project + BN, residual
    d = dwconv(h, s1_ref, dw1_w_ref, dw1_sc_ref, dw1_sh_ref)
    d = se(d, se1_w1_ref, se1_b1_ref, se1_w2_ref, se1_b2_ref)
    h = h + (mm(d, pj1_w_ref[...]) * pj1_sc_ref[...] + pj1_sh_ref[...])

    # block 2: 1x1 expand + BN + swish, depthwise 3x3 s2, SE, 1x1 project + BN
    e = _swish(mm(h, exp_w_ref[...]) * exp_sc_ref[...] + exp_sh_ref[...])
    d2 = dwconv(e, s2_ref, dw2_w_ref, dw2_sc_ref, dw2_sh_ref)
    d2 = se(d2, se2_w1_ref, se2_b1_ref, se2_w2_ref, se2_b2_ref)
    p2 = mm(d2, pj2_w_ref[...]) * pj2_sc_ref[...] + pj2_sh_ref[...]

    # head: 1x1 conv + BN + swish, global avg pool, fc, tanh, 0.5*scaler*(x+1)
    hd = _swish(mm(p2, head_w_ref[...]) * head_sc_ref[...] + head_sh_ref[...])
    pooled = jnp.mean(hd, axis=0, keepdims=True)                # (1, CP)
    # TODO(synk): dropout before the FC is omitted (inference-mode forward).
    y = mm(pooled, fc_w_ref[...]) + fc_b_ref[...]               # only lane 0 is the real FC out
    out = 0.5 * scaler * (jnp.tanh(y) + 1.0)                    # (1, CP)
    o_ref[...] = jnp.broadcast_to(out, o_ref.shape).astype(o_ref.dtype)


# --------------------------------- host-side glue --------------------------------- #

def im2col(x, kh, kw, stride, pad):
    """x: (N, H, W, C) -> (N, Ho, Wo, kh*kw, C) patch taps (network input only)."""
    x = jnp.pad(x, ((0, 0), (pad, pad), (pad, pad), (0, 0)))
    _, Hp, Wp, _ = x.shape
    Ho = (Hp - kh) // stride + 1
    Wo = (Wp - kw) // stride + 1
    cols = []
    for i in range(kh):
        for j in range(kw):
            cols.append(x[:, i:i + stride * Ho:stride, j:j + stride * Wo:stride, :])
    return jnp.stack(cols, axis=3), Ho, Wo


def make_tap_gather(h_in, w_in, h_out, w_out, stride, pad):
    """(9, h_out*w_out, h_in*w_in) 0/1 matrices; S[k] @ flat(x) gathers tap k (zero-padded)."""
    s = np.zeros((9, h_out * w_out, h_in * w_in), np.float32)
    for di in range(3):
        for dj in range(3):
            k = di * 3 + dj
            for oh in range(h_out):
                for ow in range(w_out):
                    ih = stride * oh + di - pad
                    iw = stride * ow + dj - pad
                    if 0 <= ih < h_in and 0 <= iw < w_in:
                        s[k, oh * w_out + ow, ih * w_in + iw] = 1.0
    return jnp.asarray(s, jnp.bfloat16)       # 0/1 is exact in bf16


def adjust_first_conv_weights(w3, num_input_channels):
    """Mirror adjust_first_conv_layer: w3 is (kh, kw, 3, Cout)."""
    assert num_input_channels in (3, 6, 9, 12)
    if num_input_channels == 3:
        return w3
    r = num_input_channels // 3
    return jnp.tile(w3, (1, 1, r, 1)) / r


def _pad2(a, rows, cols):
    return jnp.pad(a, ((0, rows - a.shape[0]), (0, cols - a.shape[1])))


def make_bn(key, c, eps=1e-3):
    k1, k2, k3, k4 = jax.random.split(key, 4)
    gamma = 1.0 + 0.1 * jax.random.normal(k1, (c,), jnp.float32)
    beta = 0.1 * jax.random.normal(k2, (c,), jnp.float32)
    mean = 0.1 * jax.random.normal(k3, (c,), jnp.float32)
    var = 1.0 + 0.1 * jnp.abs(jax.random.normal(k4, (c,), jnp.float32))
    scale = gamma / jnp.sqrt(var + eps)
    shift = beta - mean * scale
    # zero-pad scale AND shift -> padded lanes stay exactly 0 through the whole network
    return _pad2(scale.reshape(1, c), 1, CP), _pad2(shift.reshape(1, c), 1, CP)


def init_params(key, num_input_channels):
    ks = iter(jax.random.split(key, 32))
    n = lambda shape: 0.1 * jax.random.normal(next(ks), shape, jnp.float32)
    wpad = lambda a: _pad2(a, CP, CP).astype(jnp.bfloat16)     # MXU weights, lane/row padded
    vpad = lambda a: _pad2(a, a.shape[0], CP)                  # f32 row vectors, lane padded

    p = {}
    # stem (3x3 stride 2) -- original 3-input-channel weight, adjusted like the module.
    w3 = n((3, 3, 3, C_STEM))
    stem_w = adjust_first_conv_weights(w3, num_input_channels).reshape(
        9 * num_input_channels, C_STEM)
    p["stem_w"] = wpad(stem_w)
    p["stem_scale"], p["stem_shift"] = make_bn(next(ks), C_STEM)
    # block 1: MBConv (expand=1), stride 1, SE, residual
    p["b1_dw_w"] = vpad(n((9, C_B1))).reshape(9, 1, CP)
    p["b1_dw_scale"], p["b1_dw_shift"] = make_bn(next(ks), C_B1)
    p["b1_se_w1"], p["b1_se_b1"] = wpad(n((C_B1, SE_R))), vpad(n((1, SE_R)))
    p["b1_se_w2"], p["b1_se_b2"] = wpad(n((SE_R, C_B1))), vpad(n((1, C_B1)))
    p["b1_proj_w"] = wpad(n((C_B1, C_B1)))
    p["b1_proj_scale"], p["b1_proj_shift"] = make_bn(next(ks), C_B1)
    # block 2: MBConv (expand=4), stride 2, SE
    p["b2_exp_w"] = wpad(n((C_B1, C_EXP)))
    p["b2_exp_scale"], p["b2_exp_shift"] = make_bn(next(ks), C_EXP)
    p["b2_dw_w"] = vpad(n((9, C_EXP))).reshape(9, 1, CP)
    p["b2_dw_scale"], p["b2_dw_shift"] = make_bn(next(ks), C_EXP)
    p["b2_se_w1"], p["b2_se_b1"] = wpad(n((C_EXP, SE_R))), vpad(n((1, SE_R)))
    p["b2_se_w2"], p["b2_se_b2"] = wpad(n((SE_R, C_EXP))), vpad(n((1, C_EXP)))
    p["b2_proj_w"] = wpad(n((C_EXP, C_B2)))
    p["b2_proj_scale"], p["b2_proj_shift"] = make_bn(next(ks), C_B2)
    # head conv + fc
    p["head_w"] = wpad(n((C_B2, C_HEAD)))
    p["head_scale"], p["head_shift"] = make_bn(next(ks), C_HEAD)
    p["fc_w"], p["fc_b"] = wpad(n((C_HEAD, 1))), vpad(n((1, 1)))
    return p


def efficientnet_regression_forward(x_nchw, params):
    x = jnp.transpose(x_nchw, (0, 2, 3, 1)).astype(jnp.float32)     # NCHW -> NHWC
    N, H, W, Cin = x.shape

    # stem im2col on the network input only (tiny; all intermediates stay in VMEM).
    p, Ho, Wo = im2col(x, 3, 3, 2, 1)
    M1 = Ho * Wo
    patches = p.reshape(N * M1, 9 * Cin)
    patches = jnp.pad(patches, ((0, 0), (0, CP - 9 * Cin))).astype(jnp.bfloat16)

    H2 = (Ho + 2 - 3) // 2 + 1
    W2 = (Wo + 2 - 3) // 2 + 1

    s1 = make_tap_gather(Ho, Wo, Ho, Wo, 1, 1)     # block-1 depthwise, stride 1: (9, M1, M1)
    s2 = make_tap_gather(Ho, Wo, H2, W2, 2, 1)     # block-2 depthwise, stride 2: (9, M2, M1)

    ordered = [
        params["stem_w"], params["stem_scale"], params["stem_shift"],
        s1, params["b1_dw_w"], params["b1_dw_scale"], params["b1_dw_shift"],
        params["b1_se_w1"], params["b1_se_b1"], params["b1_se_w2"], params["b1_se_b2"],
        params["b1_proj_w"], params["b1_proj_scale"], params["b1_proj_shift"],
        params["b2_exp_w"], params["b2_exp_scale"], params["b2_exp_shift"],
        s2, params["b2_dw_w"], params["b2_dw_scale"], params["b2_dw_shift"],
        params["b2_se_w1"], params["b2_se_b1"], params["b2_se_w2"], params["b2_se_b2"],
        params["b2_proj_w"], params["b2_proj_scale"], params["b2_proj_shift"],
        params["head_w"], params["head_scale"], params["head_shift"],
        params["fc_w"], params["fc_b"],
    ]

    def full_spec(a):                       # whole-array block, shared across grid steps
        nd = a.ndim
        return pl.BlockSpec(a.shape, lambda n, _nd=nd: (0,) * _nd)

    kernel = functools.partial(fused_forward_kernel, scaler=SCALER)
    out = pl.pallas_call(
        kernel,
        out_shape=jax.ShapeDtypeStruct((N * 8, CP), jnp.float32),
        grid=(N,),
        in_specs=[pl.BlockSpec((M1, CP), lambda n: (n, 0))] + [full_spec(a) for a in ordered],
        out_specs=pl.BlockSpec((8, CP), lambda n: (n, 0)),
        compiler_params=pltpu.CompilerParams(dimension_semantics=("parallel",)),
    )(patches, *ordered)

    # each sample writes a lane-dense (8, 128) tile; the scalar prediction is at [0, 0]
    return out.reshape(N, 8, CP)[:, 0, 0:1]                        # (N, 1)


if __name__ == "__main__":
    key = jax.random.PRNGKey(0)
    k_x, k_p = jax.random.split(key)
    NUM_INPUT_CHANNELS = 6              # exercises adjust_first_conv_layer path
    x = jax.random.normal(k_x, (2, NUM_INPUT_CHANNELS, 16, 16), dtype=jnp.float32)  # NCHW
    params = init_params(k_p, NUM_INPUT_CHANNELS)

    out = efficientnet_regression_forward(x, params)
    out = jax.block_until_ready(out)
    assert out.shape == (2, 1) and out.dtype == jnp.float32
    assert bool(jnp.all(jnp.isfinite(out)))
    assert bool(jnp.all((out >= 0.0) & (out <= SCALER)))           # tanh-rescale range
    print("KERNEL_OK")
</pallas_src>

<mosaic_0001>
module attributes {stable_mosaic.version = 11 : i64} {
  func.func @fused_forward_kernel(%arg0: i32, %arg1: memref<64x128xbf16, #tpu.memory_space<vmem>>, %arg2: memref<128x128xbf16, #tpu.memory_space<vmem>>, %arg3: memref<1x128xf32, #tpu.memory_space<vmem>>, %arg4: memref<1x128xf32, #tpu.memory_space<vmem>>, %arg5: memref<9x64x64xbf16, #tpu.memory_space<vmem>>, %arg6: memref<9x1x128xf32, #tpu.memory_space<vmem>>, %arg7: memref<1x128xf32, #tpu.memory_space<vmem>>, %arg8: memref<1x128xf32, #tpu.memory_space<vmem>>, %arg9: memref<128x128xbf16, #tpu.memory_space<vmem>>, %arg10: memref<1x128xf32, #tpu.memory_space<vmem>>, %arg11: memref<128x128xbf16, #tpu.memory_space<vmem>>, %arg12: memref<1x128xf32, #tpu.memory_space<vmem>>, %arg13: memref<128x128xbf16, #tpu.memory_space<vmem>>, %arg14: memref<1x128xf32, #tpu.memory_space<vmem>>, %arg15: memref<1x128xf32, #tpu.memory_space<vmem>>, %arg16: memref<128x128xbf16, #tpu.memory_space<vmem>>, %arg17: memref<1x128xf32, #tpu.memory_space<vmem>>, %arg18: memref<1x128xf32, #tpu.memory_space<vmem>>, %arg19: memref<9x16x64xbf16, #tpu.memory_space<vmem>>, %arg20: memref<9x1x128xf32, #tpu.memory_space<vmem>>, %arg21: memref<1x128xf32, #tpu.memory_space<vmem>>, %arg22: memref<1x128xf32, #tpu.memory_space<vmem>>, %arg23: memref<128x128xbf16, #tpu.memory_space<vmem>>, %arg24: memref<1x128xf32, #tpu.memory_space<vmem>>, %arg25: memref<128x128xbf16, #tpu.memory_space<vmem>>, %arg26: memref<1x128xf32, #tpu.memory_space<vmem>>, %arg27: memref<128x128xbf16, #tpu.memory_space<vmem>>, %arg28: memref<1x128xf32, #tpu.memory_space<vmem>>, %arg29: memref<1x128xf32, #tpu.memory_space<vmem>>, %arg30: memref<128x128xbf16, #tpu.memory_space<vmem>>, %arg31: memref<1x128xf32, #tpu.memory_space<vmem>>, %arg32: memref<1x128xf32, #tpu.memory_space<vmem>>, %arg33: memref<128x128xbf16, #tpu.memory_space<vmem>>, %arg34: memref<1x128xf32, #tpu.memory_space<vmem>>, %arg35: memref<8x128xf32, #tpu.memory_space<vmem>>) attributes {dimension_semantics = [#tpu.dimension_semantics<parallel>], iteration_bounds = array<i64: 2>, scalar_prefetch = 0 : i64, scratch_operands = 0 : i64, tpu.core_type = #tpu.core_type<tc>, window_params = [{transform_indices = @transform_0, window_bounds = array<i64: 64, 128>}, {pipeline_mode = #tpu.pipeline_mode<synchronous>, transform_indices = @transform_1, window_bounds = array<i64: 128, 128>}, {pipeline_mode = #tpu.pipeline_mode<synchronous>, transform_indices = @transform_2, window_bounds = array<i64: 1, 128>}, {pipeline_mode = #tpu.pipeline_mode<synchronous>, transform_indices = @transform_3, window_bounds = array<i64: 1, 128>}, {pipeline_mode = #tpu.pipeline_mode<synchronous>, transform_indices = @transform_4, window_bounds = array<i64: 9, 64, 64>}, {pipeline_mode = #tpu.pipeline_mode<synchronous>, transform_indices = @transform_5, window_bounds = array<i64: 9, 1, 128>}, {pipeline_mode = #tpu.pipeline_mode<synchronous>, transform_indices = @transform_6, window_bounds = array<i64: 1, 128>}, {pipeline_mode = #tpu.pipeline_mode<synchronous>, transform_indices = @transform_7, window_bounds = array<i64: 1, 128>}, {pipeline_mode = #tpu.pipeline_mode<synchronous>, transform_indices = @transform_8, window_bounds = array<i64: 128, 128>}, {pipeline_mode = #tpu.pipeline_mode<synchronous>, transform_indices = @transform_9, window_bounds = array<i64: 1, 128>}, {pipeline_mode = #tpu.pipeline_mode<synchronous>, transform_indices = @transform_10, window_bounds = array<i64: 128, 128>}, {pipeline_mode = #tpu.pipeline_mode<synchronous>, transform_indices = @transform_11, window_bounds = array<i64: 1, 128>}, {pipeline_mode = #tpu.pipeline_mode<synchronous>, transform_indices = @transform_12, window_bounds = array<i64: 128, 128>}, {pipeline_mode = #tpu.pipeline_mode<synchronous>, transform_indices = @transform_13, window_bounds = array<i64: 1, 128>}, {pipeline_mode = #tpu.pipeline_mode<synchronous>, transform_indices = @transform_14, window_bounds = array<i64: 1, 128>}, {pipeline_mode = #tpu.pipeline_mode<synchronous>, transform_indices = @transform_15, window_bounds = array<i64: 128, 128>}, {pipeline_mode = #tpu.pipeline_mode<synchronous>, transform_indices = @transform_16, window_bounds = array<i64: 1, 128>}, {pipeline_mode = #tpu.pipeline_mode<synchronous>, transform_indices = @transform_17, window_bounds = array<i64: 1, 128>}, {pipeline_mode = #tpu.pipeline_mode<synchronous>, transform_indices = @transform_18, window_bounds = array<i64: 9, 16, 64>}, {pipeline_mode = #tpu.pipeline_mode<synchronous>, transform_indices = @transform_19, window_bounds = array<i64: 9, 1, 128>}, {pipeline_mode = #tpu.pipeline_mode<synchronous>, transform_indices = @transform_20, window_bounds = array<i64: 1, 128>}, {pipeline_mode = #tpu.pipeline_mode<synchronous>, transform_indices = @transform_21, window_bounds = array<i64: 1, 128>}, {pipeline_mode = #tpu.pipeline_mode<synchronous>, transform_indices = @transform_22, window_bounds = array<i64: 128, 128>}, {pipeline_mode = #tpu.pipeline_mode<synchronous>, transform_indices = @transform_23, window_bounds = array<i64: 1, 128>}, {pipeline_mode = #tpu.pipeline_mode<synchronous>, transform_indices = @transform_24, window_bounds = array<i64: 128, 128>}, {pipeline_mode = #tpu.pipeline_mode<synchronous>, transform_indices = @transform_25, window_bounds = array<i64: 1, 128>}, {pipeline_mode = #tpu.pipeline_mode<synchronous>, transform_indices = @transform_26, window_bounds = array<i64: 128, 128>}, {pipeline_mode = #tpu.pipeline_mode<synchronous>, transform_indices = @transform_27, window_bounds = array<i64: 1, 128>}, {pipeline_mode = #tpu.pipeline_mode<synchronous>, transform_indices = @transform_28, window_bounds = array<i64: 1, 128>}, {pipeline_mode = #tpu.pipeline_mode<synchronous>, transform_indices = @transform_29, window_bounds = array<i64: 128, 128>}, {pipeline_mode = #tpu.pipeline_mode<synchronous>, transform_indices = @transform_30, window_bounds = array<i64: 1, 128>}, {pipeline_mode = #tpu.pipeline_mode<synchronous>, transform_indices = @transform_31, window_bounds = array<i64: 1, 128>}, {pipeline_mode = #tpu.pipeline_mode<synchronous>, transform_indices = @transform_32, window_bounds = array<i64: 128, 128>}, {pipeline_mode = #tpu.pipeline_mode<synchronous>, transform_indices = @transform_33, window_bounds = array<i64: 1, 128>}, {transform_indices = @transform_34, window_bounds = array<i64: 8, 128>}]} {
    %c0 = arith.constant 0 : index
    %c0_0 = arith.constant 0 : index
    %0 = vector.load %arg1[%c0, %c0_0] : memref<64x128xbf16, #tpu.memory_space<vmem>>, vector<64x128xbf16>
    %c0_1 = arith.constant 0 : index
    %c0_2 = arith.constant 0 : index
    %1 = vector.load %arg2[%c0_1, %c0_2] : memref<128x128xbf16, #tpu.memory_space<vmem>>, vector<128x128xbf16>
    %cst = arith.constant dense<0.000000e+00> : vector<64x128xf32>
    %2 = tpu.matmul %0, %1, %cst {dimension_numbers = #tpu.dot_dimension_numbers<[1], [0], [0], [1], [0, 0, 1, 1], [], []>} : vector<64x128xbf16>, vector<128x128xbf16>, vector<64x128xf32> -> vector<64x128xf32>
    %c0_3 = arith.constant 0 : index
    %c0_4 = arith.constant 0 : index
    %3 = vector.load %arg3[%c0_3, %c0_4] : memref<1x128xf32, #tpu.memory_space<vmem>>, vector<1x128xf32>
    %4 = vector.broadcast %3 : vector<1x128xf32> to vector<64x128xf32>
    %5 = arith.mulf %2, %4 : vector<64x128xf32>
    %c0_5 = arith.constant 0 : index
    %c0_6 = arith.constant 0 : index
    %6 = vector.load %arg4[%c0_5, %c0_6] : memref<1x128xf32, #tpu.memory_space<vmem>>, vector<1x128xf32>
    %7 = vector.broadcast %6 : vector<1x128xf32> to vector<64x128xf32>
    %8 = arith.addf %5, %7 : vector<64x128xf32>
    %9 = arith.negf %8 : vector<64x128xf32>
    %10 = math.exp %9 : vector<64x128xf32>
    %cst_7 = arith.constant 1.000000e+00 : f32
    %11 = vector.broadcast %cst_7 : f32 to vector<64x128xf32>
    %12 = arith.addf %11, %10 : vector<64x128xf32>
    %13 = arith.divf %11, %12 : vector<64x128xf32>
    %14 = arith.mulf %8, %13 : vector<64x128xf32>
    %15 = arith.truncf %14 : vector<64x128xf32> to vector<64x128xbf16>
    %c0_8 = arith.constant 0 : index
    %c0_9 = arith.constant 0 : index
    %c0_10 = arith.constant 0 : index
    %16 = vector.load %arg5[%c0_8, %c0_9, %c0_10] : memref<9x64x64xbf16, #tpu.memory_space<vmem>>, vector<1x64x64xbf16>
    %17 = vector.shape_cast %16 : vector<1x64x64xbf16> to vector<64x64xbf16>
    %cst_11 = arith.constant dense<0.000000e+00> : vector<64x128xf32>
    %18 = tpu.matmul %17, %15, %cst_11 {dimension_numbers = #tpu.dot_dimension_numbers<[1], [0], [0], [1], [0, 0, 1, 1], [], []>} : vector<64x64xbf16>, vector<64x128xbf16>, vector<64x128xf32> -> vector<64x128xf32>
    %c0_12 = arith.constant 0 : index
    %c0_13 = arith.constant 0 : index
    %c0_14 = arith.constant 0 : index
    %19 = vector.load %arg6[%c0_12, %c0_13, %c0_14] : memref<9x1x128xf32, #tpu.memory_space<vmem>>, vector<1x1x128xf32>
    %20 = vector.shape_cast %19 : vector<1x1x128xf32> to vector<1x128xf32>
    %21 = vector.broadcast %20 : vector<1x128xf32> to vector<64x128xf32>
    %22 = arith.mulf %18, %21 : vector<64x128xf32>
    %c1 = arith.constant 1 : index
    %c0_15 = arith.constant 0 : index
    %c0_16 = arith.constant 0 : index
    %23 = vector.load %arg5[%c1, %c0_15, %c0_16] : memref<9x64x64xbf16, #tpu.memory_space<vmem>>, vector<1x64x64xbf16>
    %24 = vector.shape_cast %23 : vector<1x64x64xbf16> to vector<64x64xbf16>
    %cst_17 = arith.constant dense<0.000000e+00> : vector<64x128xf32>
    %25 = tpu.matmul %24, %15, %cst_17 {dimension_numbers = #tpu.dot_dimension_numbers<[1], [0], [0], [1], [0, 0, 1, 1], [], []>} : vector<64x64xbf16>, vector<64x128xbf16>, vector<64x128xf32> -> vector<64x128xf32>
    %c1_18 = arith.constant 1 : index
    %c0_19 = arith.constant 0 : index
    %c0_20 = arith.constant 0 : index
    %26 = vector.load %arg6[%c1_18, %c0_19, %c0_20] : memref<9x1x128xf32, #tpu.memory_space<vmem>>, vector<1x1x128xf32>
    %27 = vector.shape_cast %26 : vector<1x1x128xf32> to vector<1x128xf32>
    %28 = vector.broadcast %27 : vector<1x128xf32> to vector<64x128xf32>
    %29 = arith.mulf %25, %28 : vector<64x128xf32>
    %30 = arith.addf %22, %29 : vector<64x128xf32>
    %c2 = arith.constant 2 : index
    %c0_21 = arith.constant 0 : index
    %c0_22 = arith.constant 0 : index
    %31 = vector.load %arg5[%c2, %c0_21, %c0_22] : memref<9x64x64xbf16, #tpu.memory_space<vmem>>, vector<1x64x64xbf16>
    %32 = vector.shape_cast %31 : vector<1x64x64xbf16> to vector<64x64xbf16>
    %cst_23 = arith.constant dense<0.000000e+00> : vector<64x128xf32>
    %33 = tpu.matmul %32, %15, %cst_23 {dimension_numbers = #tpu.dot_dimension_numbers<[1], [0], [0], [1], [0, 0, 1, 1], [], []>} : vector<64x64xbf16>, vector<64x128xbf16>, vector<64x128xf32> -> vector<64x128xf32>
    %c2_24 = arith.constant 2 : index
    %c0_25 = arith.constant 0 : index
    %c0_26 = arith.constant 0 : index
    %34 = vector.load %arg6[%c2_24, %c0_25, %c0_26] : memref<9x1x128xf32, #tpu.memory_space<vmem>>, vector<1x1x128xf32>
    %35 = vector.shape_cast %34 : vector<1x1x128xf32> to vector<1x128xf32>
    %36 = vector.broadcast %35 : vector<1x128xf32> to vector<64x128xf32>
    %37 = arith.mulf %33, %36 : vector<64x128xf32>
    %38 = arith.addf %30, %37 : vector<64x128xf32>
    %c3 = arith.constant 3 : index
    %c0_27 = arith.constant 0 : index
    %c0_28 = arith.constant 0 : index
    %39 = vector.load %arg5[%c3, %c0_27, %c0_28] : memref<9x64x64xbf16, #tpu.memory_space<vmem>>, vector<1x64x64xbf16>
    %40 = vector.shape_cast %39 : vector<1x64x64xbf16> to vector<64x64xbf16>
    %cst_29 = arith.constant dense<0.000000e+00> : vector<64x128xf32>
    %41 = tpu.matmul %40, %15, %cst_29 {dimension_numbers = #tpu.dot_dimension_numbers<[1], [0], [0], [1], [0, 0, 1, 1], [], []>} : vector<64x64xbf16>, vector<64x128xbf16>, vector<64x128xf32> -> vector<64x128xf32>
    %c3_30 = arith.constant 3 : index
    %c0_31 = arith.constant 0 : index
    %c0_32 = arith.constant 0 : index
    %42 = vector.load %arg6[%c3_30, %c0_31, %c0_32] : memref<9x1x128xf32, #tpu.memory_space<vmem>>, vector<1x1x128xf32>
    %43 = vector.shape_cast %42 : vector<1x1x128xf32> to vector<1x128xf32>
    %44 = vector.broadcast %43 : vector<1x128xf32> to vector<64x128xf32>
    %45 = arith.mulf %41, %44 : vector<64x128xf32>
    %46 = arith.addf %38, %45 : vector<64x128xf32>
    %c4 = arith.constant 4 : index
    %c0_33 = arith.constant 0 : index
    %c0_34 = arith.constant 0 : index
    %47 = vector.load %arg5[%c4, %c0_33, %c0_34] : memref<9x64x64xbf16, #tpu.memory_space<vmem>>, vector<1x64x64xbf16>
    %48 = vector.shape_cast %47 : vector<1x64x64xbf16> to vector<64x64xbf16>
    %cst_35 = arith.constant dense<0.000000e+00> : vector<64x128xf32>
    %49 = tpu.matmul %48, %15, %cst_35 {dimension_numbers = #tpu.dot_dimension_numbers<[1], [0], [0], [1], [0, 0, 1, 1], [], []>} : vector<64x64xbf16>, vector<64x128xbf16>, vector<64x128xf32> -> vector<64x128xf32>
    %c4_36 = arith.constant 4 : index
    %c0_37 = arith.constant 0 : index
    %c0_38 = arith.constant 0 : index
    %50 = vector.load %arg6[%c4_36, %c0_37, %c0_38] : memref<9x1x128xf32, #tpu.memory_space<vmem>>, vector<1x1x128xf32>
    %51 = vector.shape_cast %50 : vector<1x1x128xf32> to vector<1x128xf32>
    %52 = vector.broadcast %51 : vector<1x128xf32> to vector<64x128xf32>
    %53 = arith.mulf %49, %52 : vector<64x128xf32>
    %54 = arith.addf %46, %53 : vector<64x128xf32>
    %c5 = arith.constant 5 : index
    %c0_39 = arith.constant 0 : index
    %c0_40 = arith.constant 0 : index
    %55 = vector.load %arg5[%c5, %c0_39, %c0_40] : memref<9x64x64xbf16, #tpu.memory_space<vmem>>, vector<1x64x64xbf16>
    %56 = vector.shape_cast %55 : vector<1x64x64xbf16> to vector<64x64xbf16>
    %cst_41 = arith.constant dense<0.000000e+00> : vector<64x128xf32>
    %57 = tpu.matmul %56, %15, %cst_41 {dimension_numbers = #tpu.dot_dimension_numbers<[1], [0], [0], [1], [0, 0, 1, 1], [], []>} : vector<64x64xbf16>, vector<64x128xbf16>, vector<64x128xf32> -> vector<64x128xf32>
    %c5_42 = arith.constant 5 : index
    %c0_43 = arith.constant 0 : index
    %c0_44 = arith.constant 0 : index
    %58 = vector.load %arg6[%c5_42, %c0_43, %c0_44] : memref<9x1x128xf32, #tpu.memory_space<vmem>>, vector<1x1x128xf32>
    %59 = vector.shape_cast %58 : vector<1x1x128xf32> to vector<1x128xf32>
    %60 = vector.broadcast %59 : vector<1x128xf32> to vector<64x128xf32>
    %61 = arith.mulf %57, %60 : vector<64x128xf32>
    %62 = arith.addf %54, %61 : vector<64x128xf32>
    %c6 = arith.constant 6 : index
    %c0_45 = arith.constant 0 : index
    %c0_46 = arith.constant 0 : index
    %63 = vector.load %arg5[%c6, %c0_45, %c0_46] : memref<9x64x64xbf16, #tpu.memory_space<vmem>>, vector<1x64x64xbf16>
    %64 = vector.shape_cast %63 : vector<1x64x64xbf16> to vector<64x64xbf16>
    %cst_47 = arith.constant dense<0.000000e+00> : vector<64x128xf32>
    %65 = tpu.matmul %64, %15, %cst_47 {dimension_numbers = #tpu.dot_dimension_numbers<[1], [0], [0], [1], [0, 0, 1, 1], [], []>} : vector<64x64xbf16>, vector<64x128xbf16>, vector<64x128xf32> -> vector<64x128xf32>
    %c6_48 = arith.constant 6 : index
    %c0_49 = arith.constant 0 : index
    %c0_50 = arith.constant 0 : index
    %66 = vector.load %arg6[%c6_48, %c0_49, %c0_50] : memref<9x1x128xf32, #tpu.memory_space<vmem>>, vector<1x1x128xf32>
    %67 = vector.shape_cast %66 : vector<1x1x128xf32> to vector<1x128xf32>
    %68 = vector.broadcast %67 : vector<1x128xf32> to vector<64x128xf32>
    %69 = arith.mulf %65, %68 : vector<64x128xf32>
    %70 = arith.addf %62, %69 : vector<64x128xf32>
    %c7 = arith.constant 7 : index
    %c0_51 = arith.constant 0 : index
    %c0_52 = arith.constant 0 : index
    %71 = vector.load %arg5[%c7, %c0_51, %c0_52] : memref<9x64x64xbf16, #tpu.memory_space<vmem>>, vector<1x64x64xbf16>
    %72 = vector.shape_cast %71 : vector<1x64x64xbf16> to vector<64x64xbf16>
    %cst_53 = arith.constant dense<0.000000e+00> : vector<64x128xf32>
    %73 = tpu.matmul %72, %15, %cst_53 {dimension_numbers = #tpu.dot_dimension_numbers<[1], [0], [0], [1], [0, 0, 1, 1], [], []>} : vector<64x64xbf16>, vector<64x128xbf16>, vector<64x128xf32> -> vector<64x128xf32>
    %c7_54 = arith.constant 7 : index
    %c0_55 = arith.constant 0 : index
    %c0_56 = arith.constant 0 : index
    %74 = vector.load %arg6[%c7_54, %c0_55, %c0_56] : memref<9x1x128xf32, #tpu.memory_space<vmem>>, vector<1x1x128xf32>
    %75 = vector.shape_cast %74 : vector<1x1x128xf32> to vector<1x128xf32>
    %76 = vector.broadcast %75 : vector<1x128xf32> to vector<64x128xf32>
    %77 = arith.mulf %73, %76 : vector<64x128xf32>
    %78 = arith.addf %70, %77 : vector<64x128xf32>
    %c8 = arith.constant 8 : index
    %c0_57 = arith.constant 0 : index
    %c0_58 = arith.constant 0 : index
    %79 = vector.load %arg5[%c8, %c0_57, %c0_58] : memref<9x64x64xbf16, #tpu.memory_space<vmem>>, vector<1x64x64xbf16>
    %80 = vector.shape_cast %79 : vector<1x64x64xbf16> to vector<64x64xbf16>
    %cst_59 = arith.constant dense<0.000000e+00> : vector<64x128xf32>
    %81 = tpu.matmul %80, %15, %cst_59 {dimension_numbers = #tpu.dot_dimension_numbers<[1], [0], [0], [1], [0, 0, 1, 1], [], []>} : vector<64x64xbf16>, vector<64x128xbf16>, vector<64x128xf32> -> vector<64x128xf32>
    %c8_60 = arith.constant 8 : index
    %c0_61 = arith.constant 0 : index
    %c0_62 = arith.constant 0 : index
    %82 = vector.load %arg6[%c8_60, %c0_61, %c0_62] : memref<9x1x128xf32, #tpu.memory_space<vmem>>, vector<1x1x128xf32>
    %83 = vector.shape_cast %82 : vector<1x1x128xf32> to vector<1x128xf32>
    %84 = vector.broadcast %83 : vector<1x128xf32> to vector<64x128xf32>
    %85 = arith.mulf %81, %84 : vector<64x128xf32>
    %86 = arith.addf %78, %85 : vector<64x128xf32>
    %c0_63 = arith.constant 0 : index
    %c0_64 = arith.constant 0 : index
    %87 = vector.load %arg7[%c0_63, %c0_64] : memref<1x128xf32, #tpu.memory_space<vmem>>, vector<1x128xf32>
    %88 = vector.broadcast %87 : vector<1x128xf32> to vector<64x128xf32>
    %89 = arith.mulf %86, %88 : vector<64x128xf32>
    %c0_65 = arith.constant 0 : index
    %c0_66 = arith.constant 0 : index
    %90 = vector.load %arg8[%c0_65, %c0_66] : memref<1x128xf32, #tpu.memory_space<vmem>>, vector<1x128xf32>
    %91 = vector.broadcast %90 : vector<1x128xf32> to vector<64x128xf32>
    %92 = arith.addf %89, %91 : vector<64x128xf32>
    %93 = arith.negf %92 : vector<64x128xf32>
    %94 = math.exp %93 : vector<64x128xf32>
    %cst_67 = arith.constant 1.000000e+00 : f32
    %95 = vector.broadcast %cst_67 : f32 to vector<64x128xf32>
    %96 = arith.addf %95, %94 : vector<64x128xf32>
    %97 = arith.divf %95, %96 : vector<64x128xf32>
    %98 = arith.mulf %92, %97 : vector<64x128xf32>
    %cst_68 = arith.constant dense<0.000000e+00> : vector<128xf32>
    %99 = vector.multi_reduction <add>, %98, %cst_68 [0] : vector<64x128xf32> to vector<128xf32>
    %100 = vector.shape_cast %99 : vector<128xf32> to vector<1x128xf32>
    %cst_69 = arith.constant 6.400000e+01 : f32
    %101 = vector.broadcast %cst_69 : f32 to vector<1x128xf32>
    %102 = arith.divf %100, %101 : vector<1x128xf32>
    %c0_70 = arith.constant 0 : index
    %c0_71 = arith.constant 0 : index
    %103 = vector.load %arg9[%c0_70, %c0_71] : memref<128x128xbf16, #tpu.memory_space<vmem>>, vector<128x128xbf16>
    %104 = arith.truncf %102 : vector<1x128xf32> to vector<1x128xbf16>
    %cst_72 = arith.constant dense<0.000000e+00> : vector<1x128xf32>
    %105 = tpu.matmul %104, %103, %cst_72 {dimension_numbers = #tpu.dot_dimension_numbers<[1], [0], [0], [1], [0, 0, 1, 1], [], []>} : vector<1x128xbf16>, vector<128x128xbf16>, vector<1x128xf32> -> vector<1x128xf32>
    %c0_73 = arith.constant 0 : index
    %c0_74 = arith.constant 0 : index
    %106 = vector.load %arg10[%c0_73, %c0_74] : memref<1x128xf32, #tpu.memory_space<vmem>>, vector<1x128xf32>
    %107 = arith.addf %105, %106 : vector<1x128xf32>
    %108 = arith.negf %107 : vector<1x128xf32>
    %109 = math.exp %108 : vector<1x128xf32>
    %cst_75 = arith.constant 1.000000e+00 : f32
    %110 = vector.broadcast %cst_75 : f32 to vector<1x128xf32>
    %111 = arith.addf %110, %109 : vector<1x128xf32>
    %112 = arith.divf %110, %111 : vector<1x128xf32>
    %113 = arith.mulf %107, %112 : vector<1x128xf32>
    %c0_76 = arith.constant 0 : index
    %c0_77 = arith.constant 0 : index
    %114 = vector.load %arg11[%c0_76, %c0_77] : memref<128x128xbf16, #tpu.memory_space<vmem>>, vector<128x128xbf16>
    %115 = arith.truncf %113 : vector<1x128xf32> to vector<1x128xbf16>
    %cst_78 = arith.constant dense<0.000000e+00> : vector<1x128xf32>
    %116 = tpu.matmul %115, %114, %cst_78 {dimension_numbers = #tpu.dot_dimension_numbers<[1], [0], [0], [1], [0, 0, 1, 1], [], []>} : vector<1x128xbf16>, vector<128x128xbf16>, vector<1x128xf32> -> vector<1x128xf32>
    %c0_79 = arith.constant 0 : index
    %c0_80 = arith.constant 0 : index
    %117 = vector.load %arg12[%c0_79, %c0_80] : memref<1x128xf32, #tpu.memory_space<vmem>>, vector<1x128xf32>
    %118 = arith.addf %116, %117 : vector<1x128xf32>
    %119 = arith.negf %118 : vector<1x128xf32>
    %120 = math.exp %119 : vector<1x128xf32>
    %cst_81 = arith.constant 1.000000e+00 : f32
    %121 = vector.broadcast %cst_81 : f32 to vector<1x128xf32>
    %122 = arith.addf %121, %120 : vector<1x128xf32>
    %123 = arith.divf %121, %122 : vector<1x128xf32>
    %124 = vector.broadcast %123 : vector<1x128xf32> to vector<64x128xf32>
    %125 = arith.mulf %98, %124 : vector<64x128xf32>
    %c0_82 = arith.constant 0 : index
    %c0_83 = arith.constant 0 : index
    %126 = vector.load %arg13[%c0_82, %c0_83] : memref<128x128xbf16, #tpu.memory_space<vmem>>, vector<128x128xbf16>
    %127 = arith.truncf %125 : vector<64x128xf32> to vector<64x128xbf16>
    %cst_84 = arith.constant dense<0.000000e+00> : vector<64x128xf32>
    %128 = tpu.matmul %127, %126, %cst_84 {dimension_numbers = #tpu.dot_dimension_numbers<[1], [0], [0], [1], [0, 0, 1, 1], [], []>} : vector<64x128xbf16>, vector<128x128xbf16>, vector<64x128xf32> -> vector<64x128xf32>
    %c0_85 = arith.constant 0 : index
    %c0_86 = arith.constant 0 : index
    %129 = vector.load %arg14[%c0_85, %c0_86] : memref<1x128xf32, #tpu.memory_space<vmem>>, vector<1x128xf32>
    %130 = vector.broadcast %129 : vector<1x128xf32> to vector<64x128xf32>
    %131 = arith.mulf %128, %130 : vector<64x128xf32>
    %c0_87 = arith.constant 0 : index
    %c0_88 = arith.constant 0 : index
    %132 = vector.load %arg15[%c0_87, %c0_88] : memref<1x128xf32, #tpu.memory_space<vmem>>, vector<1x128xf32>
    %133 = vector.broadcast %132 : vector<1x128xf32> to vector<64x128xf32>
    %134 = arith.addf %131, %133 : vector<64x128xf32>
    %135 = arith.addf %14, %134 : vector<64x128xf32>
    %c0_89 = arith.constant 0 : index
    %c0_90 = arith.constant 0 : index
    %136 = vector.load %arg16[%c0_89, %c0_90] : memref<128x128xbf16, #tpu.memory_space<vmem>>, vector<128x128xbf16>
    %137 = arith.truncf %135 : vector<64x128xf32> to vector<64x128xbf16>
    %cst_91 = arith.constant dense<0.000000e+00> : vector<64x128xf32>
    %138 = tpu.matmul %137, %136, %cst_91 {dimension_numbers = #tpu.dot_dimension_numbers<[1], [0], [0], [1], [0, 0, 1, 1], [], []>} : vector<64x128xbf16>, vector<128x128xbf16>, vector<64x128xf32> -> vector<64x128xf32>
    %c0_92 = arith.constant 0 : index
    %c0_93 = arith.constant 0 : index
    %139 = vector.load %arg17[%c0_92, %c0_93] : memref<1x128xf32, #tpu.memory_space<vmem>>, vector<1x128xf32>
    %140 = vector.broadcast %139 : vector<1x128xf32> to vector<64x128xf32>
    %141 = arith.mulf %138, %140 : vector<64x128xf32>
    %c0_94 = arith.constant 0 : index
    %c0_95 = arith.constant 0 : index
    %142 = vector.load %arg18[%c0_94, %c0_95] : memref<1x128xf32, #tpu.memory_space<vmem>>, vector<1x128xf32>
    %143 = vector.broadcast %142 : vector<1x128xf32> to vector<64x128xf32>
    %144 = arith.addf %141, %143 : vector<64x128xf32>
    %145 = arith.negf %144 : vector<64x128xf32>
    %146 = math.exp %145 : vector<64x128xf32>
    %cst_96 = arith.constant 1.000000e+00 : f32
    %147 = vector.broadcast %cst_96 : f32 to vector<64x128xf32>
    %148 = arith.addf %147, %146 : vector<64x128xf32>
    %149 = arith.divf %147, %148 : vector<64x128xf32>
    %150 = arith.mulf %144, %149 : vector<64x128xf32>
    %151 = arith.truncf %150 : vector<64x128xf32> to vector<64x128xbf16>
    %c0_97 = arith.constant 0 : index
    %c0_98 = arith.constant 0 : index
    %c0_99 = arith.constant 0 : index
    %152 = vector.load %arg19[%c0_97, %c0_98, %c0_99] : memref<9x16x64xbf16, #tpu.memory_space<vmem>>, vector<1x16x64xbf16>
    %153 = vector.shape_cast %152 : vector<1x16x64xbf16> to vector<16x64xbf16>
    %cst_100 = arith.constant dense<0.000000e+00> : vector<16x128xf32>
    %154 = tpu.matmul %153, %151, %cst_100 {dimension_numbers = #tpu.dot_dimension_numbers<[1], [0], [0], [1], [0, 0, 1, 1], [], []>} : vector<16x64xbf16>, vector<64x128xbf16>, vector<16x128xf32> -> vector<16x128xf32>
    %c0_101 = arith.constant 0 : index
    %c0_102 = arith.constant 0 : index
    %c0_103 = arith.constant 0 : index
    %155 = vector.load %arg20[%c0_101, %c0_102, %c0_103] : memref<9x1x128xf32, #tpu.memory_space<vmem>>, vector<1x1x128xf32>
    %156 = vector.shape_cast %155 : vector<1x1x128xf32> to vector<1x128xf32>
    %157 = vector.broadcast %156 : vector<1x128xf32> to vector<16x128xf32>
    %158 = arith.mulf %154, %157 : vector<16x128xf32>
    %c1_104 = arith.constant 1 : index
    %c0_105 = arith.constant 0 : index
    %c0_106 = arith.constant 0 : index
    %159 = vector.load %arg19[%c1_104, %c0_105, %c0_106] : memref<9x16x64xbf16, #tpu.memory_space<vmem>>, vector<1x16x64xbf16>
    %160 = vector.shape_cast %159 : vector<1x16x64xbf16> to vector<16x64xbf16>
    %cst_107 = arith.constant dense<0.000000e+00> : vector<16x128xf32>
    %161 = tpu.matmul %160, %151, %cst_107 {dimension_numbers = #tpu.dot_dimension_numbers<[1], [0], [0], [1], [0, 0, 1, 1], [], []>} : vector<16x64xbf16>, vector<64x128xbf16>, vector<16x128xf32> -> vector<16x128xf32>
    %c1_108 = arith.constant 1 : index
    %c0_109 = arith.constant 0 : index
    %c0_110 = arith.constant 0 : index
    %162 = vector.load %arg20[%c1_108, %c0_109, %c0_110] : memref<9x1x128xf32, #tpu.memory_space<vmem>>, vector<1x1x128xf32>
    %163 = vector.shape_cast %162 : vector<1x1x128xf32> to vector<1x128xf32>
    %164 = vector.broadcast %163 : vector<1x128xf32> to vector<16x128xf32>
    %165 = arith.mulf %161, %164 : vector<16x128xf32>
    %166 = arith.addf %158, %165 : vector<16x128xf32>
    %c2_111 = arith.constant 2 : index
    %c0_112 = arith.constant 0 : index
    %c0_113 = arith.constant 0 : index
    %167 = vector.load %arg19[%c2_111, %c0_112, %c0_113] : memref<9x16x64xbf16, #tpu.memory_space<vmem>>, vector<1x16x64xbf16>
    %168 = vector.shape_cast %167 : vector<1x16x64xbf16> to vector<16x64xbf16>
    %cst_114 = arith.constant dense<0.000000e+00> : vector<16x128xf32>
    %169 = tpu.matmul %168, %151, %cst_114 {dimension_numbers = #tpu.dot_dimension_numbers<[1], [0], [0], [1], [0, 0, 1, 1], [], []>} : vector<16x64xbf16>, vector<64x128xbf16>, vector<16x128xf32> -> vector<16x128xf32>
    %c2_115 = arith.constant 2 : index
    %c0_116 = arith.constant 0 : index
    %c0_117 = arith.constant 0 : index
    %170 = vector.load %arg20[%c2_115, %c0_116, %c0_117] : memref<9x1x128xf32, #tpu.memory_space<vmem>>, vector<1x1x128xf32>
    %171 = vector.shape_cast %170 : vector<1x1x128xf32> to vector<1x128xf32>
    %172 = vector.broadcast %171 : vector<1x128xf32> to vector<16x128xf32>
    %173 = arith.mulf %169, %172 : vector<16x128xf32>
    %174 = arith.addf %166, %173 : vector<16x128xf32>
    %c3_118 = arith.constant 3 : index
    %c0_119 = arith.constant 0 : index
    %c0_120 = arith.constant 0 : index
    %175 = vector.load %arg19[%c3_118, %c0_119, %c0_120] : memref<9x16x64xbf16, #tpu.memory_space<vmem>>, vector<1x16x64xbf16>
    %176 = vector.shape_cast %175 : vector<1x16x64xbf16> to vector<16x64xbf16>
    %cst_121 = arith.constant dense<0.000000e+00> : vector<16x128xf32>
    %177 = tpu.matmul %176, %151, %cst_121 {dimension_numbers = #tpu.dot_dimension_numbers<[1], [0], [0], [1], [0, 0, 1, 1], [], []>} : vector<16x64xbf16>, vector<64x128xbf16>, vector<16x128xf32> -> vector<16x128xf32>
    %c3_122 = arith.constant 3 : index
    %c0_123 = arith.constant 0 : index
    %c0_124 = arith.constant 0 : index
    %178 = vector.load %arg20[%c3_122, %c0_123, %c0_124] : memref<9x1x128xf32, #tpu.memory_space<vmem>>, vector<1x1x128xf32>
    %179 = vector.shape_cast %178 : vector<1x1x128xf32> to vector<1x128xf32>
    %180 = vector.broadcast %179 : vector<1x128xf32> to vector<16x128xf32>
    %181 = arith.mulf %177, %180 : vector<16x128xf32>
    %182 = arith.addf %174, %181 : vector<16x128xf32>
    %c4_125 = arith.constant 4 : index
    %c0_126 = arith.constant 0 : index
    %c0_127 = arith.constant 0 : index
    %183 = vector.load %arg19[%c4_125, %c0_126, %c0_127] : memref<9x16x64xbf16, #tpu.memory_space<vmem>>, vector<1x16x64xbf16>
    %184 = vector.shape_cast %183 : vector<1x16x64xbf16> to vector<16x64xbf16>
    %cst_128 = arith.constant dense<0.000000e+00> : vector<16x128xf32>
    %185 = tpu.matmul %184, %151, %cst_128 {dimension_numbers = #tpu.dot_dimension_numbers<[1], [0], [0], [1], [0, 0, 1, 1], [], []>} : vector<16x64xbf16>, vector<64x128xbf16>, vector<16x128xf32> -> vector<16x128xf32>
    %c4_129 = arith.constant 4 : index
    %c0_130 = arith.constant 0 : index
    %c0_131 = arith.constant 0 : index
    %186 = vector.load %arg20[%c4_129, %c0_130, %c0_131] : memref<9x1x128xf32, #tpu.memory_space<vmem>>, vector<1x1x128xf32>
    %187 = vector.shape_cast %186 : vector<1x1x128xf32> to vector<1x128xf32>
    %188 = vector.broadcast %187 : vector<1x128xf32> to vector<16x128xf32>
    %189 = arith.mulf %185, %188 : vector<16x128xf32>
    %190 = arith.addf %182, %189 : vector<16x128xf32>
    %c5_132 = arith.constant 5 : index
    %c0_133 = arith.constant 0 : index
    %c0_134 = arith.constant 0 : index
    %191 = vector.load %arg19[%c5_132, %c0_133, %c0_134] : memref<9x16x64xbf16, #tpu.memory_space<vmem>>, vector<1x16x64xbf16>
    %192 = vector.shape_cast %191 : vector<1x16x64xbf16> to vector<16x64xbf16>
    %cst_135 = arith.constant dense<0.000000e+00> : vector<16x128xf32>
    %193 = tpu.matmul %192, %151, %cst_135 {dimension_numbers = #tpu.dot_dimension_numbers<[1], [0], [0], [1], [0, 0, 1, 1], [], []>} : vector<16x64xbf16>, vector<64x128xbf16>, vector<16x128xf32> -> vector<16x128xf32>
    %c5_136 = arith.constant 5 : index
    %c0_137 = arith.constant 0 : index
    %c0_138 = arith.constant 0 : index
    %194 = vector.load %arg20[%c5_136, %c0_137, %c0_138] : memref<9x1x128xf32, #tpu.memory_space<vmem>>, vector<1x1x128xf32>
    %195 = vector.shape_cast %194 : vector<1x1x128xf32> to vector<1x128xf32>
    %196 = vector.broadcast %195 : vector<1x128xf32> to vector<16x128xf32>
    %197 = arith.mulf %193, %196 : vector<16x128xf32>
    %198 = arith.addf %190, %197 : vector<16x128xf32>
    %c6_139 = arith.constant 6 : index
    %c0_140 = arith.constant 0 : index
    %c0_141 = arith.constant 0 : index
    %199 = vector.load %arg19[%c6_139, %c0_140, %c0_141] : memref<9x16x64xbf16, #tpu.memory_space<vmem>>, vector<1x16x64xbf16>
    %200 = vector.shape_cast %199 : vector<1x16x64xbf16> to vector<16x64xbf16>
    %cst_142 = arith.constant dense<0.000000e+00> : vector<16x128xf32>
    %201 = tpu.matmul %200, %151, %cst_142 {dimension_numbers = #tpu.dot_dimension_numbers<[1], [0], [0], [1], [0, 0, 1, 1], [], []>} : vector<16x64xbf16>, vector<64x128xbf16>, vector<16x128xf32> -> vector<16x128xf32>
    %c6_143 = arith.constant 6 : index
    %c0_144 = arith.constant 0 : index
    %c0_145 = arith.constant 0 : index
    %202 = vector.load %arg20[%c6_143, %c0_144, %c0_145] : memref<9x1x128xf32, #tpu.memory_space<vmem>>, vector<1x1x128xf32>
    %203 = vector.shape_cast %202 : vector<1x1x128xf32> to vector<1x128xf32>
    %204 = vector.broadcast %203 : vector<1x128xf32> to vector<16x128xf32>
    %205 = arith.mulf %201, %204 : vector<16x128xf32>
    %206 = arith.addf %198, %205 : vector<16x128xf32>
    %c7_146 = arith.constant 7 : index
    %c0_147 = arith.constant 0 : index
    %c0_148 = arith.constant 0 : index
    %207 = vector.load %arg19[%c7_146, %c0_147, %c0_148] : memref<9x16x64xbf16, #tpu.memory_space<vmem>>, vector<1x16x64xbf16>
    %208 = vector.shape_cast %207 : vector<1x16x64xbf16> to vector<16x64xbf16>
    %cst_149 = arith.constant dense<0.000000e+00> : vector<16x128xf32>
    %209 = tpu.matmul %208, %151, %cst_149 {dimension_numbers = #tpu.dot_dimension_numbers<[1], [0], [0], [1], [0, 0, 1, 1], [], []>} : vector<16x64xbf16>, vector<64x128xbf16>, vector<16x128xf32> -> vector<16x128xf32>
    %c7_150 = arith.constant 7 : index
    %c0_151 = arith.constant 0 : index
    %c0_152 = arith.constant 0 : index
    %210 = vector.load %arg20[%c7_150, %c0_151, %c0_152] : memref<9x1x128xf32, #tpu.memory_space<vmem>>, vector<1x1x128xf32>
    %211 = vector.shape_cast %210 : vector<1x1x128xf32> to vector<1x128xf32>
    %212 = vector.broadcast %211 : vector<1x128xf32> to vector<16x128xf32>
    %213 = arith.mulf %209, %212 : vector<16x128xf32>
    %214 = arith.addf %206, %213 : vector<16x128xf32>
    %c8_153 = arith.constant 8 : index
    %c0_154 = arith.constant 0 : index
    %c0_155 = arith.constant 0 : index
    %215 = vector.load %arg19[%c8_153, %c0_154, %c0_155] : memref<9x16x64xbf16, #tpu.memory_space<vmem>>, vector<1x16x64xbf16>
    %216 = vector.shape_cast %215 : vector<1x16x64xbf16> to vector<16x64xbf16>
    %cst_156 = arith.constant dense<0.000000e+00> : vector<16x128xf32>
    %217 = tpu.matmul %216, %151, %cst_156 {dimension_numbers = #tpu.dot_dimension_numbers<[1], [0], [0], [1], [0, 0, 1, 1], [], []>} : vector<16x64xbf16>, vector<64x128xbf16>, vector<16x128xf32> -> vector<16x128xf32>
    %c8_157 = arith.constant 8 : index
    %c0_158 = arith.constant 0 : index
    %c0_159 = arith.constant 0 : index
    %218 = vector.load %arg20[%c8_157, %c0_158, %c0_159] : memref<9x1x128xf32, #tpu.memory_space<vmem>>, vector<1x1x128xf32>
    %219 = vector.shape_cast %218 : vector<1x1x128xf32> to vector<1x128xf32>
    %220 = vector.broadcast %219 : vector<1x128xf32> to vector<16x128xf32>
    %221 = arith.mulf %217, %220 : vector<16x128xf32>
    %222 = arith.addf %214, %221 : vector<16x128xf32>
    %c0_160 = arith.constant 0 : index
    %c0_161 = arith.constant 0 : index
    %223 = vector.load %arg21[%c0_160, %c0_161] : memref<1x128xf32, #tpu.memory_space<vmem>>, vector<1x128xf32>
    %224 = vector.broadcast %223 : vector<1x128xf32> to vector<16x128xf32>
    %225 = arith.mulf %222, %224 : vector<16x128xf32>
    %c0_162 = arith.constant 0 : index
    %c0_163 = arith.constant 0 : index
    %226 = vector.load %arg22[%c0_162, %c0_163] : memref<1x128xf32, #tpu.memory_space<vmem>>, vector<1x128xf32>
    %227 = vector.broadcast %226 : vector<1x128xf32> to vector<16x128xf32>
    %228 = arith.addf %225, %227 : vector<16x128xf32>
    %229 = arith.negf %228 : vector<16x128xf32>
    %230 = math.exp %229 : vector<16x128xf32>
    %cst_164 = arith.constant 1.000000e+00 : f32
    %231 = vector.broadcast %cst_164 : f32 to vector<16x128xf32>
    %232 = arith.addf %231, %230 : vector<16x128xf32>
    %233 = arith.divf %231, %232 : vector<16x128xf32>
    %234 = arith.mulf %228, %233 : vector<16x128xf32>
    %cst_165 = arith.constant dense<0.000000e+00> : vector<128xf32>
    %235 = vector.multi_reduction <add>, %234, %cst_165 [0] : vector<16x128xf32> to vector<128xf32>
    %236 = vector.shape_cast %235 : vector<128xf32> to vector<1x128xf32>
    %cst_166 = arith.constant 1.600000e+01 : f32
    %237 = vector.broadcast %cst_166 : f32 to vector<1x128xf32>
    %238 = arith.divf %236, %237 : vector<1x128xf32>
    %c0_167 = arith.constant 0 : index
    %c0_168 = arith.constant 0 : index
    %239 = vector.load %arg23[%c0_167, %c0_168] : memref<128x128xbf16, #tpu.memory_space<vmem>>, vector<128x128xbf16>
    %240 = arith.truncf %238 : vector<1x128xf32> to vector<1x128xbf16>
    %cst_169 = arith.constant dense<0.000000e+00> : vector<1x128xf32>
    %241 = tpu.matmul %240, %239, %cst_169 {dimension_numbers = #tpu.dot_dimension_numbers<[1], [0], [0], [1], [0, 0, 1, 1], [], []>} : vector<1x128xbf16>, vector<128x128xbf16>, vector<1x128xf32> -> vector<1x128xf32>
    %c0_170 = arith.constant 0 : index
    %c0_171 = arith.constant 0 : index
    %242 = vector.load %arg24[%c0_170, %c0_171] : memref<1x128xf32, #tpu.memory_space<vmem>>, vector<1x128xf32>
    %243 = arith.addf %241, %242 : vector<1x128xf32>
    %244 = arith.negf %243 : vector<1x128xf32>
    %245 = math.exp %244 : vector<1x128xf32>
    %cst_172 = arith.constant 1.000000e+00 : f32
    %246 = vector.broadcast %cst_172 : f32 to vector<1x128xf32>
    %247 = arith.addf %246, %245 : vector<1x128xf32>
    %248 = arith.divf %246, %247 : vector<1x128xf32>
    %249 = arith.mulf %243, %248 : vector<1x128xf32>
    %c0_173 = arith.constant 0 : index
    %c0_174 = arith.constant 0 : index
    %250 = vector.load %arg25[%c0_173, %c0_174] : memref<128x128xbf16, #tpu.memory_space<vmem>>, vector<128x128xbf16>
    %251 = arith.truncf %249 : vector<1x128xf32> to vector<1x128xbf16>
    %cst_175 = arith.constant dense<0.000000e+00> : vector<1x128xf32>
    %252 = tpu.matmul %251, %250, %cst_175 {dimension_numbers = #tpu.dot_dimension_numbers<[1], [0], [0], [1], [0, 0, 1, 1], [], []>} : vector<1x128xbf16>, vector<128x128xbf16>, vector<1x128xf32> -> vector<1x128xf32>
    %c0_176 = arith.constant 0 : index
    %c0_177 = arith.constant 0 : index
    %253 = vector.load %arg26[%c0_176, %c0_177] : memref<1x128xf32, #tpu.memory_space<vmem>>, vector<1x128xf32>
    %254 = arith.addf %252, %253 : vector<1x128xf32>
    %255 = arith.negf %254 : vector<1x128xf32>
    %256 = math.exp %255 : vector<1x128xf32>
    %cst_178 = arith.constant 1.000000e+00 : f32
    %257 = vector.broadcast %cst_178 : f32 to vector<1x128xf32>
    %258 = arith.addf %257, %256 : vector<1x128xf32>
    %259 = arith.divf %257, %258 : vector<1x128xf32>
    %260 = vector.broadcast %259 : vector<1x128xf32> to vector<16x128xf32>
    %261 = arith.mulf %234, %260 : vector<16x128xf32>
    %c0_179 = arith.constant 0 : index
    %c0_180 = arith.constant 0 : index
    %262 = vector.load %arg27[%c0_179, %c0_180] : memref<128x128xbf16, #tpu.memory_space<vmem>>, vector<128x128xbf16>
    %263 = arith.truncf %261 : vector<16x128xf32> to vector<16x128xbf16>
    %cst_181 = arith.constant dense<0.000000e+00> : vector<16x128xf32>
    %264 = tpu.matmul %263, %262, %cst_181 {dimension_numbers = #tpu.dot_dimension_numbers<[1], [0], [0], [1], [0, 0, 1, 1], [], []>} : vector<16x128xbf16>, vector<128x128xbf16>, vector<16x128xf32> -> vector<16x128xf32>
    %c0_182 = arith.constant 0 : index
    %c0_183 = arith.constant 0 : index
    %265 = vector.load %arg28[%c0_182, %c0_183] : memref<1x128xf32, #tpu.memory_space<vmem>>, vector<1x128xf32>
    %266 = vector.broadcast %265 : vector<1x128xf32> to vector<16x128xf32>
    %267 = arith.mulf %264, %266 : vector<16x128xf32>
    %c0_184 = arith.constant 0 : index
    %c0_185 = arith.constant 0 : index
    %268 = vector.load %arg29[%c0_184, %c0_185] : memref<1x128xf32, #tpu.memory_space<vmem>>, vector<1x128xf32>
    %269 = vector.broadcast %268 : vector<1x128xf32> to vector<16x128xf32>
    %270 = arith.addf %267, %269 : vector<16x128xf32>
    %c0_186 = arith.constant 0 : index
    %c0_187 = arith.constant 0 : index
    %271 = vector.load %arg30[%c0_186, %c0_187] : memref<128x128xbf16, #tpu.memory_space<vmem>>, vector<128x128xbf16>
    %272 = arith.truncf %270 : vector<16x128xf32> to vector<16x128xbf16>
    %cst_188 = arith.constant dense<0.000000e+00> : vector<16x128xf32>
    %273 = tpu.matmul %272, %271, %cst_188 {dimension_numbers = #tpu.dot_dimension_numbers<[1], [0], [0], [1], [0, 0, 1, 1], [], []>} : vector<16x128xbf16>, vector<128x128xbf16>, vector<16x128xf32> -> vector<16x128xf32>
    %c0_189 = arith.constant 0 : index
    %c0_190 = arith.constant 0 : index
    %274 = vector.load %arg31[%c0_189, %c0_190] : memref<1x128xf32, #tpu.memory_space<vmem>>, vector<1x128xf32>
    %275 = vector.broadcast %274 : vector<1x128xf32> to vector<16x128xf32>
    %276 = arith.mulf %273, %275 : vector<16x128xf32>
    %c0_191 = arith.constant 0 : index
    %c0_192 = arith.constant 0 : index
    %277 = vector.load %arg32[%c0_191, %c0_192] : memref<1x128xf32, #tpu.memory_space<vmem>>, vector<1x128xf32>
    %278 = vector.broadcast %277 : vector<1x128xf32> to vector<16x128xf32>
    %279 = arith.addf %276, %278 : vector<16x128xf32>
    %280 = arith.negf %279 : vector<16x128xf32>
    %281 = math.exp %280 : vector<16x128xf32>
    %cst_193 = arith.constant 1.000000e+00 : f32
    %282 = vector.broadcast %cst_193 : f32 to vector<16x128xf32>
    %283 = arith.addf %282, %281 : vector<16x128xf32>
    %284 = arith.divf %282, %283 : vector<16x128xf32>
    %285 = arith.mulf %279, %284 : vector<16x128xf32>
    %cst_194 = arith.constant dense<0.000000e+00> : vector<128xf32>
    %286 = vector.multi_reduction <add>, %285, %cst_194 [0] : vector<16x128xf32> to vector<128xf32>
    %287 = vector.shape_cast %286 : vector<128xf32> to vector<1x128xf32>
    %cst_195 = arith.constant 1.600000e+01 : f32
    %288 = vector.broadcast %cst_195 : f32 to vector<1x128xf32>
    %289 = arith.divf %287, %288 : vector<1x128xf32>
    %c0_196 = arith.constant 0 : index
    %c0_197 = arith.constant 0 : index
    %290 = vector.load %arg33[%c0_196, %c0_197] : memref<128x128xbf16, #tpu.memory_space<vmem>>, vector<128x128xbf16>
    %291 = arith.truncf %289 : vector<1x128xf32> to vector<1x128xbf16>
    %cst_198 = arith.constant dense<0.000000e+00> : vector<1x128xf32>
    %292 = tpu.matmul %291, %290, %cst_198 {dimension_numbers = #tpu.dot_dimension_numbers<[1], [0], [0], [1], [0, 0, 1, 1], [], []>} : vector<1x128xbf16>, vector<128x128xbf16>, vector<1x128xf32> -> vector<1x128xf32>
    %c0_199 = arith.constant 0 : index
    %c0_200 = arith.constant 0 : index
    %293 = vector.load %arg34[%c0_199, %c0_200] : memref<1x128xf32, #tpu.memory_space<vmem>>, vector<1x128xf32>
    %294 = arith.addf %292, %293 : vector<1x128xf32>
    %295 = math.tanh %294 : vector<1x128xf32>
    %cst_201 = arith.constant 1.000000e+00 : f32
    %296 = vector.broadcast %cst_201 : f32 to vector<1x128xf32>
    %297 = arith.addf %295, %296 : vector<1x128xf32>
    %cst_202 = arith.constant 1.500000e+02 : f32
    %298 = vector.broadcast %cst_202 : f32 to vector<1x128xf32>
    %299 = arith.mulf %298, %297 : vector<1x128xf32>
    %300 = vector.shape_cast %299 : vector<1x128xf32> to vector<1x128xf32>
    %301 = vector.broadcast %300 : vector<1x128xf32> to vector<8x128xf32>
    %c0_203 = arith.constant 0 : index
    %c0_204 = arith.constant 0 : index
    %302 = vector.load %arg35[%c0_203, %c0_204] : memref<8x128xf32, #tpu.memory_space<vmem>>, vector<8x128xf32>
    tpu.vector_store %arg35[%c0_203, %c0_204], %301 {strides = array<i32>} : memref<8x128xf32, #tpu.memory_space<vmem>>, vector<8x128xf32>,
    return
  }
  func.func @transform_0(%arg0: i32) -> (i32, i32) {
    %c0_i32 = arith.constant 0 : i32
    %c0_i32_0 = arith.constant 0 : i32
    return %arg0, %c0_i32 : i32, i32
  }
  func.func @transform_1(%arg0: i32) -> (i32, i32) {
    %c0_i32 = arith.constant 0 : i32
    %c0_i32_0 = arith.constant 0 : i32
    %c0_i32_1 = arith.constant 0 : i32
    return %c0_i32, %c0_i32_0 : i32, i32
  }
  func.func @transform_2(%arg0: i32) -> (i32, i32) {
    %c0_i32 = arith.constant 0 : i32
    %c0_i32_0 = arith.constant 0 : i32
    %c0_i32_1 = arith.constant 0 : i32
    return %c0_i32, %c0_i32_0 : i32, i32
  }
  func.func @transform_3(%arg0: i32) -> (i32, i32) {
    %c0_i32 = arith.constant 0 : i32
    %c0_i32_0 = arith.constant 0 : i32
    %c0_i32_1 = arith.constant 0 : i32
    return %c0_i32, %c0_i32_0 : i32, i32
  }
  func.func @transform_4(%arg0: i32) -> (i32, i32, i32) {
    %c0_i32 = arith.constant 0 : i32
    %c0_i32_0 = arith.constant 0 : i32
    %c0_i32_1 = arith.constant 0 : i32
    %c0_i32_2 = arith.constant 0 : i32
    return %c0_i32, %c0_i32_0, %c0_i32_1 : i32, i32, i32
  }
  func.func @transform_5(%arg0: i32) -> (i32, i32, i32) {
    %c0_i32 = arith.constant 0 : i32
    %c0_i32_0 = arith.constant 0 : i32
    %c0_i32_1 = arith.constant 0 : i32
    %c0_i32_2 = arith.constant 0 : i32
    return %c0_i32, %c0_i32_0, %c0_i32_1 : i32, i32, i32
  }
  func.func @transform_6(%arg0: i32) -> (i32, i32) {
    %c0_i32 = arith.constant 0 : i32
    %c0_i32_0 = arith.constant 0 : i32
    %c0_i32_1 = arith.constant 0 : i32
    return %c0_i32, %c0_i32_0 : i32, i32
  }
  func.func @transform_7(%arg0: i32) -> (i32, i32) {
    %c0_i32 = arith.constant 0 : i32
    %c0_i32_0 = arith.constant 0 : i32
    %c0_i32_1 = arith.constant 0 : i32
    return %c0_i32, %c0_i32_0 : i32, i32
  }
  func.func @transform_8(%arg0: i32) -> (i32, i32) {
    %c0_i32 = arith.constant 0 : i32
    %c0_i32_0 = arith.constant 0 : i32
    %c0_i32_1 = arith.constant 0 : i32
    return %c0_i32, %c0_i32_0 : i32, i32
  }
  func.func @transform_9(%arg0: i32) -> (i32, i32) {
    %c0_i32 = arith.constant 0 : i32
    %c0_i32_0 = arith.constant 0 : i32
    %c0_i32_1 = arith.constant 0 : i32
    return %c0_i32, %c0_i32_0 : i32, i32
  }
  func.func @transform_10(%arg0: i32) -> (i32, i32) {
    %c0_i32 = arith.constant 0 : i32
    %c0_i32_0 = arith.constant 0 : i32
    %c0_i32_1 = arith.constant 0 : i32
    return %c0_i32, %c0_i32_0 : i32, i32
  }
  func.func @transform_11(%arg0: i32) -> (i32, i32) {
    %c0_i32 = arith.constant 0 : i32
    %c0_i32_0 = arith.constant 0 : i32
    %c0_i32_1 = arith.constant 0 : i32
    return %c0_i32, %c0_i32_0 : i32, i32
  }
  func.func @transform_12(%arg0: i32) -> (i32, i32) {
    %c0_i32 = arith.constant 0 : i32
    %c0_i32_0 = arith.constant 0 : i32
    %c0_i32_1 = arith.constant 0 : i32
    return %c0_i32, %c0_i32_0 : i32, i32
  }
  func.func @transform_13(%arg0: i32) -> (i32, i32) {
    %c0_i32 = arith.constant 0 : i32
    %c0_i32_0 = arith.constant 0 : i32
    %c0_i32_1 = arith.constant 0 : i32
    return %c0_i32, %c0_i32_0 : i32, i32
  }
  func.func @transform_14(%arg0: i32) -> (i32, i32) {
    %c0_i32 = arith.constant 0 : i32
    %c0_i32_0 = arith.constant 0 : i32
    %c0_i32_1 = arith.constant 0 : i32
    return %c0_i32, %c0_i32_0 : i32, i32
  }
  func.func @transform_15(%arg0: i32) -> (i32, i32) {
    %c0_i32 = arith.constant 0 : i32
    %c0_i32_0 = arith.constant 0 : i32
    %c0_i32_1 = arith.constant 0 : i32
    return %c0_i32, %c0_i32_0 : i32, i32
  }
  func.func @transform_16(%arg0: i32) -> (i32, i32) {
    %c0_i32 = arith.constant 0 : i32
    %c0_i32_0 = arith.constant 0 : i32
    %c0_i32_1 = arith.constant 0 : i32
    return %c0_i32, %c0_i32_0 : i32, i32
  }
  func.func @transform_17(%arg0: i32) -> (i32, i32) {
    %c0_i32 = arith.constant 0 : i32
    %c0_i32_0 = arith.constant 0 : i32
    %c0_i32_1 = arith.constant 0 : i32
    return %c0_i32, %c0_i32_0 : i32, i32
  }
  func.func @transform_18(%arg0: i32) -> (i32, i32, i32) {
    %c0_i32 = arith.constant 0 : i32
    %c0_i32_0 = arith.constant 0 : i32
    %c0_i32_1 = arith.constant 0 : i32
    %c0_i32_2 = arith.constant 0 : i32
    return %c0_i32, %c0_i32_0, %c0_i32_1 : i32, i32, i32
  }
  func.func @transform_19(%arg0: i32) -> (i32, i32, i32) {
    %c0_i32 = arith.constant 0 : i32
    %c0_i32_0 = arith.constant 0 : i32
    %c0_i32_1 = arith.constant 0 : i32
    %c0_i32_2 = arith.constant 0 : i32
    return %c0_i32, %c0_i32_0, %c0_i32_1 : i32, i32, i32
  }
  func.func @transform_20(%arg0: i32) -> (i32, i32) {
    %c0_i32 = arith.constant 0 : i32
    %c0_i32_0 = arith.constant 0 : i32
    %c0_i32_1 = arith.constant 0 : i32
    return %c0_i32, %c0_i32_0 : i32, i32
  }
  func.func @transform_21(%arg0: i32) -> (i32, i32) {
    %c0_i32 = arith.constant 0 : i32
    %c0_i32_0 = arith.constant 0 : i32
    %c0_i32_1 = arith.constant 0 : i32
    return %c0_i32, %c0_i32_0 : i32, i32
  }
  func.func @transform_22(%arg0: i32) -> (i32, i32) {
    %c0_i32 = arith.constant 0 : i32
    %c0_i32_0 = arith.constant 0 : i32
    %c0_i32_1 = arith.constant 0 : i32
    return %c0_i32, %c0_i32_0 : i32, i32
  }
  func.func @transform_23(%arg0: i32) -> (i32, i32) {
    %c0_i32 = arith.constant 0 : i32
    %c0_i32_0 = arith.constant 0 : i32
    %c0_i32_1 = arith.constant 0 : i32
    return %c0_i32, %c0_i32_0 : i32, i32
  }
  func.func @transform_24(%arg0: i32) -> (i32, i32) {
    %c0_i32 = arith.constant 0 : i32
    %c0_i32_0 = arith.constant 0 : i32
    %c0_i32_1 = arith.constant 0 : i32
    return %c0_i32, %c0_i32_0 : i32, i32
  }
  func.func @transform_25(%arg0: i32) -> (i32, i32) {
    %c0_i32 = arith.constant 0 : i32
    %c0_i32_0 = arith.constant 0 : i32
    %c0_i32_1 = arith.constant 0 : i32
    return %c0_i32, %c0_i32_0 : i32, i32
  }
  func.func @transform_26(%arg0: i32) -> (i32, i32) {
    %c0_i32 = arith.constant 0 : i32
    %c0_i32_0 = arith.constant 0 : i32
    %c0_i32_1 = arith.constant 0 : i32
    return %c0_i32, %c0_i32_0 : i32, i32
  }
  func.func @transform_27(%arg0: i32) -> (i32, i32) {
    %c0_i32 = arith.constant 0 : i32
    %c0_i32_0 = arith.constant 0 : i32
    %c0_i32_1 = arith.constant 0 : i32
    return %c0_i32, %c0_i32_0 : i32, i32
  }
  func.func @transform_28(%arg0: i32) -> (i32, i32) {
    %c0_i32 = arith.constant 0 : i32
    %c0_i32_0 = arith.constant 0 : i32
    %c0_i32_1 = arith.constant 0 : i32
    return %c0_i32, %c0_i32_0 : i32, i32
  }
  func.func @transform_29(%arg0: i32) -> (i32, i32) {
    %c0_i32 = arith.constant 0 : i32
    %c0_i32_0 = arith.constant 0 : i32
    %c0_i32_1 = arith.constant 0 : i32
    return %c0_i32, %c0_i32_0 : i32, i32
  }
  func.func @transform_30(%arg0: i32) -> (i32, i32) {
    %c0_i32 = arith.constant 0 : i32
    %c0_i32_0 = arith.constant 0 : i32
    %c0_i32_1 = arith.constant 0 : i32
    return %c0_i32, %c0_i32_0 : i32, i32
  }
  func.func @transform_31(%arg0: i32) -> (i32, i32) {
    %c0_i32 = arith.constant 0 : i32
    %c0_i32_0 = arith.constant 0 : i32
    %c0_i32_1 = arith.constant 0 : i32
    return %c0_i32, %c0_i32_0 : i32, i32
  }
  func.func @transform_32(%arg0: i32) -> (i32, i32) {
    %c0_i32 = arith.constant 0 : i32
    %c0_i32_0 = arith.constant 0 : i32
    %c0_i32_1 = arith.constant 0 : i32
    return %c0_i32, %c0_i32_0 : i32, i32
  }
  func.func @transform_33(%arg0: i32) -> (i32, i32) {
    %c0_i32 = arith.constant 0 : i32
    %c0_i32_0 = arith.constant 0 : i32
    %c0_i32_1 = arith.constant 0 : i32
    return %c0_i32, %c0_i32_0 : i32, i32
  }
  func.func @transform_34(%arg0: i32) -> (i32, i32) {
    %c0_i32 = arith.constant 0 : i32
    %c0_i32_0 = arith.constant 0 : i32
    return %arg0, %c0_i32 : i32, i32
  }
}

</mosaic_0001>

<bundles_post_ra>
// kernel: tpu_custom_call.1
= control target key start
LH: loop header
LB: loop body
LE: loop exit
PB: predicated region body
PF: predicated region fallthrough
CT: control target
= control target key end

     0   :  { %s7373_s6 = smov 1   ;;  %s7374_s10 = smov 2   ;;  %s8615_s0 = inlined_call_operand.smem [shape: u32[35], index: -1, kind: input, shape index: {}] }
   0x1   :  { %s7443_s5 = sld [smem:[%s8615_s0]]   ;;  %s7375_s14 = smov 3  }
   0x2   :  { %s7448_s9 = sld [smem:[%s8615_s0 + %s7373_s6]]   ;;  %s7376_s18 = smov 4  }
   0x3   :  { %s7453_s13 = sld [smem:[%s8615_s0 + %s7374_s10]]   ;;  %s7377_s22 = smov 5  }
   0x4   :  { %s7458_s17 = sld [smem:[%s8615_s0 + %s7375_s14]]   ;;  %s7378_s26 = smov 6  }
   0x5   :  { %s7463_s21 = sld [smem:[%s8615_s0 + %s7376_s18]]   ;;  %s7379_s30 = smov 7  }
   0x6   :  { %s7468_s25 = sld [smem:[%s8615_s0 + %s7377_s22]]   ;;  %s7380_s4 = smov 8  }
   0x7   :  { %8651 = sst [smem:[#allocation52_spill]] %s7443_s5  ;;  %s7381_s10 = smov 9  }
   0x8   :  { %8652 = sst [smem:[#allocation53_spill]] %s7448_s9  ;;  %s7382_s15 = smov 10  }
   0x9   :  { %8653 = sst [smem:[#allocation54_spill]] %s7453_s13  ;;  %s7383_s20 = smov 11  }
   0xa   :  { %8654 = sst [smem:[#allocation55_spill]] %s7458_s17  ;;  %s7385_s1 = smov 13  }
   0xb   :  { %s7473_s29 = sld [smem:[%s8615_s0 + %s7378_s26]]   ;;  %s7384_s26 = smov 12  }
   0xc   :  { %8655 = sst [smem:[#allocation56_spill]] %s7468_s25  ;;  %s7386_s7 = smov 14  }
   0xd   :  { %s7478_s3 = sld [smem:[%s8615_s0 + %s7379_s30]]   ;;  %s7388_s22 = smov 16  }
   0xe   :  { %s7483_s8 = sld [smem:[%s8615_s0 + %s7380_s4]]   ;;  %s7389_s28 = smov 17  }
   0xf   :  { %s7488_s14 = sld [smem:[%s8615_s0 + %s7381_s10]]  }
  0x10   :  { %s7493_s19 = sld [smem:[%s8615_s0 + %s7382_s15]]   ;;  %s7387_s15 = smov 15  }
  0x11   :  { %8656 = sst [smem:[#allocation57_spill]] %s7473_s29 }
  0x12   :  { %s7498_s24 = sld [smem:[%s8615_s0 + %s7383_s20]]  }
  0x13   :  { %8657 = sst [smem:[#allocation58_spill]] %s7478_s3 }
  0x14   :  { %8658 = sst [smem:[#allocation59_spill]] %s7483_s8 }
  0x15   :  { %8659 = sst [smem:[#allocation60_spill]] %s7488_s14 }
  0x16   :  { %8660 = sst [smem:[#allocation61_spill]] %s7493_s19 }
  0x17   :  { %s7503_s30 = sld [smem:[%s8615_s0 + %s7384_s26]]  }
  0x18   :  { %s7508_s6 = sld [smem:[%s8615_s0 + %s7385_s1]]  }
  0x19   :  { %s7513_s12 = sld [smem:[%s8615_s0 + %s7386_s7]]   ;;  %s7390_s7 = smov 18  }
  0x1a   :  { %s7518_s20 = sld [smem:[%s8615_s0 + %s7387_s15]]   ;;  %s7391_s15 = smov 19  }
  0x1b   :  { %s7523_s27 = sld [smem:[%s8615_s0 + %s7388_s22]]   ;;  %s7392_s22 = smov 20  }
  0x1c   :  { %s7528_s4 = sld [smem:[%s8615_s0 + %s7389_s28]]   ;;  %s7393_s28 = smov 21  }
  0x1d   :  { %8661 = sst [smem:[#allocation62_spill]] %s7503_s30 }
  0x1e   :  { %8662 = sst [smem:[#allocation63_spill]] %s7508_s6 }
  0x1f   :  { %8663 = sst [smem:[#allocation64_spill]] %s7513_s12 }
  0x20   :  { %s7533_s29 = sld [smem:[%s8615_s0 + %s7390_s7]]   ;;  %s7394_s7 = smov 22  }
  0x21   :  { %8664 = sst [smem:[#allocation65_spill]] %s7523_s27 }
  0x22   :  { %8665 = sst [smem:[#allocation66_spill]] %s7528_s4 }
  0x23   :  { %s7538_s25 = sld [smem:[%s8615_s0 + %s7391_s15]]   ;;  %s7395_s15 = smov 23  }
  0x24   :  { %s7543_s5 = sld [smem:[%s8615_s0 + %s7392_s22]]   ;;  %s7396_s22 = smov 24  }
  0x25   :  { %s7548_s27 = sld [smem:[%s8615_s0 + %s7393_s28]]   ;;  %s7397_s28 = smov 25  }
  0x26   :  { %8666 = sst [smem:[#allocation67_spill]] %s7533_s29 }
  0x27   :  { %s7553_s29 = sld [smem:[%s8615_s0 + %s7394_s7]]   ;;  %s7398_s7 = smov 26  }
  0x28   :  { %s7563_s12 = sld [smem:[%s8615_s0 + %s7396_s22]]   ;;  %s7400_s22 = smov 28  }
  0x29   :  { %8667 = sst [smem:[#allocation68_spill]] %s7538_s25 }
  0x2a   :  { %8668 = sst [smem:[#allocation69_spill]] %s7543_s5 }
  0x2b   :  { %8669 = sst [smem:[#allocation70_spill]] %s7548_s27 }
  0x2c   :  { %s7558_s25 = sld [smem:[%s8615_s0 + %s7395_s15]]   ;;  %s7399_s15 = smov 27  }
  0x2d   :  { %8670 = sst [smem:[#allocation71_spill]] %s7553_s29 }
  0x2e   :  { %8672 = sst [smem:[#allocation73_spill]] %s7563_s12 }
  0x2f   :  { %s7568_s27 = sld [smem:[%s8615_s0 + %s7397_s28]]   ;;  %s7401_s28 = smov 29  }
  0x30   :  { %s7573_s29 = sld [smem:[%s8615_s0 + %s7398_s7]]   ;;  %s7402_s7 = smov 30  }
  0x31   :  { %s7583_s30 = sld [smem:[%s8615_s0 + %s7400_s22]]   ;;  %s7404_s22 = smov 32  }
  0x32   :  { %8671 = sst [smem:[#allocation72_spill]] %s7558_s25 }
  0x33   :  { %s7578_s25 = sld [smem:[%s8615_s0 + %s7399_s15]]   ;;  %s7403_s15 = smov 31  }
  0x35   :  { %8673 = sst [smem:[#allocation74_spill]] %s7568_s27 }
  0x36   :  { %8674 = sst [smem:[#allocation75_spill]] %s7573_s29 }
  0x37   :  { %8676 = sst [smem:[#allocation77_spill]] %s7583_s30 }
  0x38   :  { %s7588_s27 = sld [smem:[%s8615_s0 + %s7401_s28]]   ;;  %s7405_s28 = smov 33  }
  0x39   :  { %8675 = sst [smem:[#allocation76_spill]] %s7578_s25 }
  0x3a   :  { %s7593_s29 = sld [smem:[%s8615_s0 + %s7402_s7]]   ;;  %s7406_s7 = smov 34  }
  0x3b   :  { %s7598_s25 = sld [smem:[%s8615_s0 + %s7403_s15]]  }
  0x3c   :  { %s7603_s30 = sld [smem:[%s8615_s0 + %s7404_s22]]  }
  0x3d   :  { %s7608_s19 = sld [smem:[%s8615_s0 + %s7405_s28]]  }
  0x40   :  { %8677 = sst [smem:[#allocation78_spill]] %s7593_s29 }
  0x41   :  { %8678 = sst [smem:[#allocation79_spill]] %s7598_s25 }
  0x42   :  { %s7613_s29 = sld [smem:[%s8615_s0 + %s7406_s7]]  }
  0x43   :  { %8679 = sst [smem:[#allocation80_spill]] %s7608_s19 }
  0x48   :  { %8680 = sst [smem:[#allocation81_spill]] %s7613_s29 }
  0x49   :  { %74 = vsyncpa [#allocation3], 0 }
  0x4a   :  { %76 = vsyncpa [#allocation3 + $0x1], 0 }
  0x4b   :  { %77 = vsyncpa [#allocation6], 0 }
  0x4c   :  { %78 = vsyncpa [#allocation9], 0 }
  0x4d   :  { %79 = vsyncpa [#allocation12], 0 }
  0x4e   :  { %80 = vsyncpa [#allocation15], 0 }
  0x4f   :  { %81 = vsyncpa [#allocation18], 0 }
  0x50   :  { %82 = vsyncpa [#allocation21], 0 }
  0x51   :  { %83 = vsyncpa [#allocation24], 0 }
  0x52   :  { %84 = vsyncpa [#allocation27], 0 }
  0x53   :  { %85 = vsyncpa [#allocation30], 0 }
  0x54   :  { %86 = vsyncpa [#allocation33], 0 }
  0x55   :  { %87 = vsyncpa [#allocation36], 0 }
  0x56   :  { %88 = vsyncpa [#allocation4], 0 }
  0x57   :  { %90 = vsyncpa [#allocation4 + $0x1], 0  ;;  %s7615_s15 = smov 0   ;;  %s7617_s16 = smov 0  }
  0x58   :  { %s7619_s0 = smov 0   ;;  %s7621_s18 = smov 0  }
  0x59 LB: > { %s8681_s17 = sld [smem:[#allocation55_spill]]  ;;  %s8682_s14 = sld [smem:[#allocation60_spill]]  ;;  %s7363_s16 = sphi %s7617_s16, %s8749_s16   ;;  %s7359_s15 = sphi %s7615_s15, %s8748_s15   ;;  %s7371_s18 = sphi %s7621_s18, %s8751_s18   ;;  %s7367_s0 = sphi %s7619_s0, %s8750_s0  }
  0x5a   : > { %s8683_s13 = sld [smem:[#allocation54_spill]]  ;;  %s8684_s12 = sld [smem:[#allocation73_spill]] }
  0x5b   : > { %s8685_s9 = sld [smem:[#allocation53_spill]]  ;;  %s8686_s8 = sld [smem:[#allocation59_spill]] }
  0x5c   : > { %s8687_s6 = sld [smem:[#allocation63_spill]]  ;;  %s8688_s5 = sld [smem:[#allocation69_spill]] }
  0x5d   : > { %s8689_s4 = sld [smem:[#allocation66_spill]]  ;;  %s7407_s22 = smov [#allocation5]  }
  0x5e   : > { %s8690_s3 = sld [smem:[#allocation58_spill]]  ;;  %s858_s23 = sshll.u32 %s7407_s22, 4  ;;  %s7641_s23 = int_to_ptr.vmem [resolvable:$true] %s858_s23 }
  0x5f   : > { %s7636_s26 = sadd.s32 4294967295, %s7371_s18   ;;  %p5060_p0 = scmp.ge.s32.totalorder %s7371_s18, 1 }
  0x60   : > { %p8628_p1 = scmp.eq.s32.totalorder %s7636_s26, 0  ;;  %p846_p2 = scmp.lt.s32.totalorder %s7371_s18, 3 }
  0x61   : > { %s7408_s1 = smov [#allocation8]   ;;  %s7409_s10 = smov [#allocation11]  }
  0x62   : > { %p7643_p3 = pnand %p5060_p0, %p846_p2  ;;  %s883_s2 = sshll.u32 %s7408_s1, 4  ;;  %s7656_s2 = int_to_ptr.vmem [resolvable:$true] %s883_s2 }
  0x63   : > { %s913_s11 = sshll.u32 %s7409_s10, 4  ;;  %s6615_s22 = scalar_lea.hbm %s8685_s9, 1024  ;;  %s7658_s11 = int_to_ptr.vmem [resolvable:$true] %s913_s11 }
  0x64   : > { %s8691_s28 = scalar_select %p7643_p3, 1, 0 }
  0x65   : > { %p6143_p5 = pneg %p7643_p3  ;;  %p6616_p7 = scmp.ne.s32.totalorder %s8685_s9, %s6615_s22 }
  0x66   : > { %p6622_p11 = scmp.lt.u32.totalorder %s6615_s22, %s8685_s9 }
  0x67   : > { %p7652_p6 = pnand %p6143_p5, %p8628_p1 }
  0x69   : > { %p7664_p8 = pneg %p7652_p6 }
  0x6b   : > { %p6618_p9 = pnand %p7664_p8, %p6616_p7 }
  0x6d   : > { %p6619_p10 = pneg %p6618_p9 }
  0x6f   : > { %p6624_p12 = pnand %p6622_p11, %p6619_p10 }
  0x71   : > { %6627 = shalt.err (!%p6624_p12)
}
  0x72   : > { %s6628_s1 = scalar_lea.vmem %s7641_s23, 1024  ;;  %p6636_p5 = scmp.lt.s32.totalorder %s7641_s23, %s7641_s23 }
  0x73   : > { %p6629_p13 = scmp.ne.s32.totalorder %s7641_s23, %s6628_s1  ;;  %p6637_p4 = scmp.lt.s32.totalorder %s6628_s1, %s6628_s1 }
  0x75   : > { %p6631_p0 = pnand %p6629_p13, %p7664_p8  ;;  %p6638_p1 = por %p6637_p4, %p6636_p5 }
  0x77   : > { %p6632_p2 = pneg %p6631_p0 }
  0x79   : > { %p6639_p3 = pnand %p6638_p1, %p6632_p2 }
  0x7b   : > { %6642 = shalt.err (!%p6639_p3)
}
  0x7c   : > { %s8630_s10 = smov 64   ;;  %s8632_s22 = smov 4  }
  0x7d   : > { %6146 = dma.hbm_to_vmem [thread:$0]  (!%p7652_p6), %s8685_s9, 1024, %s7641_s23, [#allocation6], %s8630_s10, %s8630_s10, %s8632_s22  }
  0x7e   : > { %s6643_s19 = scalar_lea.hbm %s8681_s17, 16 }
  0x7f   : > { %p6644_p7 = scmp.ne.s32.totalorder %s8681_s17, %s6643_s19  ;;  %p6650_p3 = scmp.lt.u32.totalorder %s6643_s19, %s8681_s17 }
  0x81   : > { %p6646_p4 = pnand %p6644_p7, %p7664_p8 }
  0x83   : > { %p6647_p1 = pneg %p6646_p4 }
  0x85   : > { %p6652_p9 = pnand %p6650_p3, %p6647_p1 }
  0x87   : > { %6655 = shalt.err (!%p6652_p9)
}
  0x88   : > { %s6656_s1 = scalar_lea.vmem %s7656_s2, 16  ;;  %s6663_s25 = scalar_lea.vmem %s7656_s2, 32 }
  0x89   : > { %p6657_p10 = scmp.ne.s32.totalorder %s7656_s2, %s6656_s1  ;;  %p6664_p13 = scmp.lt.s32.totalorder %s7656_s2, %s7656_s2 }
  0x8a   : > { %p6665_p0 = scmp.lt.s32.totalorder %s6663_s25, %s6656_s1 }
  0x8b   : > { %p6659_p11 = pnand %p6657_p10, %p7664_p8 }
  0x8c   : > { %p6666_p2 = por %p6665_p0, %p6664_p13 }
  0x8d   : > { %p6660_p12 = pneg %p6659_p11 }
  0x8f   : > { %p6667_p5 = pnand %p6666_p2, %p6660_p12 }
  0x91   : > { %6670 = shalt.err (!%p6667_p5)
}
  0x92   : > { %6152 = dma.hbm_to_vmem [thread:$0]  (!%p7652_p6), %s8681_s17, 16, %s7656_s2, [#allocation9]  }
  0x93   : > { %s6671_s19 = scalar_lea.hbm %s8690_s3, 16 }
  0x94   : > { %p6672_p7 = scmp.ne.s32.totalorder %s8690_s3, %s6671_s19  ;;  %p6678_p3 = scmp.lt.u32.totalorder %s6671_s19, %s8690_s3 }
  0x96   : > { %p6674_p4 = pnand %p6672_p7, %p7664_p8 }
  0x98   : > { %p6675_p1 = pneg %p6674_p4 }
  0x9a   : > { %p6680_p9 = pnand %p6678_p3, %p6675_p1 }
  0x9c   : > { %6683 = shalt.err (!%p6680_p9)
}
  0x9d   : > { %s6684_s25 = scalar_lea.vmem %s7658_s11, 16  ;;  %s6691_s23 = scalar_lea.vmem %s7658_s11, 32 }
  0x9e   : > { %p6685_p10 = scmp.ne.s32.totalorder %s7658_s11, %s6684_s25  ;;  %p6692_p13 = scmp.lt.s32.totalorder %s7658_s11, %s7658_s11 }
  0x9f   : > { %p6693_p0 = scmp.lt.s32.totalorder %s6691_s23, %s6684_s25 }
  0xa0   : > { %p6687_p11 = pnand %p6685_p10, %p7664_p8 }
  0xa1   : > { %p6694_p2 = por %p6693_p0, %p6692_p13 }
  0xa2   : > { %p6688_p12 = pneg %p6687_p11 }
  0xa4   : > { %p6695_p5 = pnand %p6694_p2, %p6688_p12 }
  0xa6   : > { %6698 = shalt.err (!%p6695_p5)
}
  0xa7   : > { %6158 = dma.hbm_to_vmem [thread:$0]  (!%p7652_p6), %s8690_s3, 16, %s7658_s11, [#allocation12]  }
  0xa8   : > { %s7412_s2 = smov [#allocation14]   ;;  %s7413_s19 = smov [#allocation17]  }
  0xa9   : > { %s937_s1 = sshll.u32 %s7412_s2, 4  ;;  %s961_s10 = sshll.u32 %s7413_s19, 4  ;;  %s938_s1 = int_to_ptr.vmem [resolvable:$true] %s937_s1  ;;  %s962_s10 = int_to_ptr.vmem [resolvable:$true] %s961_s10 }
  0xaa   : > { %s6699_s22 = scalar_lea.hbm %s8682_s14, 16 }
  0xab   : > { %p6700_p7 = scmp.ne.s32.totalorder %s8682_s14, %s6699_s22  ;;  %p6706_p3 = scmp.lt.u32.totalorder %s6699_s22, %s8682_s14 }
  0xad   : > { %p6702_p4 = pnand %p6700_p7, %p7664_p8 }
  0xaf   : > { %p6703_p1 = pneg %p6702_p4 }
  0xb1   : > { %p6708_p9 = pnand %p6706_p3, %p6703_p1 }
  0xb3   : > { %6711 = shalt.err (!%p6708_p9)
}
  0xb4   : > { %s6712_s25 = scalar_lea.vmem %s938_s1, 16  ;;  %s6719_s11 = scalar_lea.vmem %s938_s1, 32 }
  0xb5   : > { %p6713_p10 = scmp.ne.s32.totalorder %s938_s1, %s6712_s25  ;;  %p6720_p13 = scmp.lt.s32.totalorder %s938_s1, %s938_s1 }
  0xb6   : > { %p6721_p0 = scmp.lt.s32.totalorder %s6719_s11, %s6712_s25 }
  0xb7   : > { %p6715_p11 = pnand %p6713_p10, %p7664_p8 }
  0xb8   : > { %p6722_p2 = por %p6721_p0, %p6720_p13 }
  0xb9   : > { %p6716_p12 = pneg %p6715_p11 }
  0xbb   : > { %p6723_p5 = pnand %p6722_p2, %p6716_p12 }
  0xbd   : > { %6726 = shalt.err (!%p6723_p5)
}
  0xbe   : > { %6164 = dma.hbm_to_vmem [thread:$0]  (!%p7652_p6), %s8682_s14, 16, %s938_s1, [#allocation15]  }
  0xbf   : > { %s6727_s22 = scalar_lea.hbm %s7498_s24, 16 }
  0xc0   : > { %p6728_p7 = scmp.ne.s32.totalorder %s7498_s24, %s6727_s22  ;;  %p6734_p3 = scmp.lt.u32.totalorder %s6727_s22, %s7498_s24 }
  0xc2   : > { %p6730_p4 = pnand %p6728_p7, %p7664_p8 }
  0xc4   : > { %p6731_p1 = pneg %p6730_p4 }
  0xc6   : > { %p6736_p9 = pnand %p6734_p3, %p6731_p1 }
  0xc8   : > { %6739 = shalt.err (!%p6736_p9)
}
  0xc9   : > { %s6740_s23 = scalar_lea.vmem %s962_s10, 16  ;;  %s6747_s2 = scalar_lea.vmem %s962_s10, 32 }
  0xca   : > { %p6741_p10 = scmp.ne.s32.totalorder %s962_s10, %s6740_s23  ;;  %p6748_p13 = scmp.lt.s32.totalorder %s962_s10, %s962_s10 }
  0xcb   : > { %p6749_p0 = scmp.lt.s32.totalorder %s6747_s2, %s6740_s23 }
  0xcc   : > { %p6743_p11 = pnand %p6741_p10, %p7664_p8 }
  0xcd   : > { %p6750_p2 = por %p6749_p0, %p6748_p13 }
  0xce   : > { %p6744_p12 = pneg %p6743_p11 }
  0xd0   : > { %p6751_p5 = pnand %p6750_p2, %p6744_p12 }
  0xd2   : > { %6754 = shalt.err (!%p6751_p5)
}
  0xd3   : > { %6170 = dma.hbm_to_vmem [thread:$0]  (!%p7652_p6), %s7498_s24, 16, %s962_s10, [#allocation18]  }
  0xd4   : > { %s7414_s1 = smov [#allocation20]   ;;  %s7415_s25 = smov [#allocation23]  }
  0xd5   : > { %s985_s19 = sshll.u32 %s7414_s1, 4  ;;  %s1006_s11 = sshll.u32 %s7415_s25, 4  ;;  %s986_s19 = int_to_ptr.vmem [resolvable:$true] %s985_s19  ;;  %s1007_s11 = int_to_ptr.vmem [resolvable:$true] %s1006_s11 }
  0xd6   : > { %s6755_s22 = scalar_lea.hbm %s8687_s6, 16 }
  0xd7   : > { %p6756_p7 = scmp.ne.s32.totalorder %s8687_s6, %s6755_s22  ;;  %p6762_p3 = scmp.lt.u32.totalorder %s6755_s22, %s8687_s6 }
  0xd9   : > { %p6758_p4 = pnand %p6756_p7, %p7664_p8 }
  0xdb   : > { %p6759_p1 = pneg %p6758_p4 }
  0xdd   : > { %p6764_p9 = pnand %p6762_p3, %p6759_p1 }
  0xdf   : > { %6767 = shalt.err (!%p6764_p9)
}
  0xe0   : > { %s6768_s23 = scalar_lea.vmem %s986_s19, 16  ;;  %s6775_s10 = scalar_lea.vmem %s986_s19, 32 }
  0xe1   : > { %p6769_p10 = scmp.ne.s32.totalorder %s986_s19, %s6768_s23  ;;  %p6776_p13 = scmp.lt.s32.totalorder %s986_s19, %s986_s19 }
  0xe2   : > { %p6777_p0 = scmp.lt.s32.totalorder %s6775_s10, %s6768_s23 }
  0xe3   : > { %p6771_p11 = pnand %p6769_p10, %p7664_p8 }
  0xe4   : > { %p6778_p2 = por %p6777_p0, %p6776_p13 }
  0xe5   : > { %p6772_p12 = pneg %p6771_p11 }
  0xe7   : > { %p6779_p5 = pnand %p6778_p2, %p6772_p12 }
  0xe9   : > { %6782 = shalt.err (!%p6779_p5)
}
  0xea   : > { %6176 = dma.hbm_to_vmem [thread:$0]  (!%p7652_p6), %s8687_s6, 16, %s986_s19, [#allocation21]  }
  0xeb   : > { %s6783_s2 = scalar_lea.hbm %s7518_s20, 1024 }
  0xec   : > { %p6784_p7 = scmp.ne.s32.totalorder %s7518_s20, %s6783_s2  ;;  %p6790_p3 = scmp.lt.u32.totalorder %s6783_s2, %s7518_s20 }
  0xee   : > { %p6786_p4 = pnand %p6784_p7, %p7664_p8 }
  0xf0   : > { %p6787_p1 = pneg %p6786_p4 }
  0xf2   : > { %p6792_p9 = pnand %p6790_p3, %p6787_p1 }
  0xf4   : > { %6795 = shalt.err (!%p6792_p9)
}
  0xf5   : > { %s6796_s1 = scalar_lea.vmem %s1007_s11, 1024  ;;  %p6804_p13 = scmp.lt.s32.totalorder %s1007_s11, %s1007_s11 }
  0xf6   : > { %p6797_p10 = scmp.ne.s32.totalorder %s1007_s11, %s6796_s1  ;;  %p6805_p0 = scmp.lt.s32.totalorder %s6796_s1, %s6796_s1 }
  0xf8   : > { %p6799_p11 = pnand %p6797_p10, %p7664_p8  ;;  %p6806_p2 = por %p6805_p0, %p6804_p13 }
  0xfa   : > { %p6800_p12 = pneg %p6799_p11 }
  0xfc   : > { %p6807_p5 = pnand %p6806_p2, %p6800_p12 }
  0xfe   : > { %6810 = shalt.err (!%p6807_p5)
}
  0xff   : > { %s8694_s19 = smov 4   ;;  %s8695_s25 = smov 64  }
 0x100   : > { %6182 = dma.hbm_to_vmem [thread:$0]  (!%p7652_p6), %s7518_s20, 1024, %s1007_s11, [#allocation24], %s8695_s25, %s8695_s25, %s8694_s19  }
 0x101   : > { %s7416_s22 = smov [#allocation26]   ;;  %s7417_s10 = smov [#allocation29]  }
 0x102   : > { %s1031_s23 = sshll.u32 %s7416_s22, 4  ;;  %s1058_s2 = sshll.u32 %s7417_s10, 4  ;;  %s1032_s23 = int_to_ptr.vmem [resolvable:$true] %s1031_s23  ;;  %s1059_s2 = int_to_ptr.vmem [resolvable:$true] %s1058_s2 }
 0x103   : > { %s6811_s1 = scalar_lea.hbm %s8689_s4, 16 }
 0x104   : > { %p6812_p7 = scmp.ne.s32.totalorder %s8689_s4, %s6811_s1  ;;  %p6818_p3 = scmp.lt.u32.totalorder %s6811_s1, %s8689_s4 }
 0x106   : > { %p6814_p4 = pnand %p6812_p7, %p7664_p8 }
 0x108   : > { %p6815_p1 = pneg %p6814_p4 }
 0x10a   : > { %p6820_p9 = pnand %p6818_p3, %p6815_p1 }
 0x10c   : > { %6823 = shalt.err (!%p6820_p9)
}
 0x10d   : > { %s6824_s3 = scalar_lea.vmem %s1032_s23, 16  ;;  %s6831_s11 = scalar_lea.vmem %s1032_s23, 32 }
 0x10e   : > { %p6825_p10 = scmp.ne.s32.totalorder %s1032_s23, %s6824_s3  ;;  %p6832_p13 = scmp.lt.s32.totalorder %s1032_s23, %s1032_s23 }
 0x10f   : > { %p6833_p0 = scmp.lt.s32.totalorder %s6831_s11, %s6824_s3 }
 0x110   : > { %p6827_p11 = pnand %p6825_p10, %p7664_p8 }
 0x111   : > { %p6834_p2 = por %p6833_p0, %p6832_p13 }
 0x112   : > { %p6828_p12 = pneg %p6827_p11 }
 0x114   : > { %p6835_p5 = pnand %p6834_p2, %p6828_p12 }
 0x116   : > { %6838 = shalt.err (!%p6835_p5)
}
 0x117   : > { %6188 = dma.hbm_to_vmem [thread:$0]  (!%p7652_p6), %s8689_s4, 16, %s1032_s23, [#allocation27]  }
 0x118   : > { %s6839_s22 = scalar_lea.hbm %s8688_s5, 16 }
 0x119   : > { %p6840_p7 = scmp.ne.s32.totalorder %s8688_s5, %s6839_s22  ;;  %p6846_p3 = scmp.lt.u32.totalorder %s6839_s22, %s8688_s5 }
 0x11b   : > { %p6842_p4 = pnand %p6840_p7, %p7664_p8 }
 0x11d   : > { %p6843_p1 = pneg %p6842_p4 }
 0x11f   : > { %p6848_p9 = pnand %p6846_p3, %p6843_p1 }
 0x121   : > { %6851 = shalt.err (!%p6848_p9)
}
 0x122   : > { %s6852_s3 = scalar_lea.vmem %s1059_s2, 16  ;;  %s6859_s10 = scalar_lea.vmem %s1059_s2, 32 }
 0x123   : > { %p6853_p10 = scmp.ne.s32.totalorder %s1059_s2, %s6852_s3  ;;  %p6860_p13 = scmp.lt.s32.totalorder %s1059_s2, %s1059_s2 }
 0x124   : > { %p6861_p0 = scmp.lt.s32.totalorder %s6859_s10, %s6852_s3 }
 0x125   : > { %p6855_p11 = pnand %p6853_p10, %p7664_p8 }
 0x126   : > { %p6862_p2 = por %p6861_p0, %p6860_p13 }
 0x127   : > { %p6856_p12 = pneg %p6855_p11 }
 0x129   : > { %p6863_p5 = pnand %p6862_p2, %p6856_p12 }
 0x12b   : > { %6866 = shalt.err (!%p6863_p5)
}
 0x12c   : > { %6194 = dma.hbm_to_vmem [thread:$0]  (!%p7652_p6), %s8688_s5, 16, %s1059_s2, [#allocation30]  }
 0x12d   : > { %s7418_s23 = smov [#allocation32]   ;;  %s7419_s11 = smov [#allocation35]  }
 0x12e   : > { %s1085_s1 = sshll.u32 %s7418_s23, 4  ;;  %s1120_s22 = sshll.u32 %s7419_s11, 4  ;;  %s1086_s1 = int_to_ptr.vmem [resolvable:$true] %s1085_s1  ;;  %s1121_s22 = int_to_ptr.vmem [resolvable:$true] %s1120_s22 }
 0x12f   : > { %s6867_s4 = scalar_lea.hbm %s8684_s12, 1024 }
 0x130   : > { %p6868_p7 = scmp.ne.s32.totalorder %s8684_s12, %s6867_s4  ;;  %p6874_p3 = scmp.lt.u32.totalorder %s6867_s4, %s8684_s12 }
 0x132   : > { %p6870_p4 = pnand %p6868_p7, %p7664_p8 }
 0x134   : > { %p6871_p1 = pneg %p6870_p4 }
 0x136   : > { %p6876_p9 = pnand %p6874_p3, %p6871_p1 }
 0x138   : > { %6879 = shalt.err (!%p6876_p9)
}
 0x139   : > { %s6880_s3 = scalar_lea.vmem %s1086_s1, 1024  ;;  %p6888_p13 = scmp.lt.s32.totalorder %s1086_s1, %s1086_s1 }
 0x13a   : > { %p6881_p10 = scmp.ne.s32.totalorder %s1086_s1, %s6880_s3  ;;  %p6889_p0 = scmp.lt.s32.totalorder %s6880_s3, %s6880_s3 }
 0x13c   : > { %p6883_p11 = pnand %p6881_p10, %p7664_p8  ;;  %p6890_p2 = por %p6889_p0, %p6888_p13 }
 0x13e   : > { %p6884_p12 = pneg %p6883_p11 }
 0x140   : > { %p6891_p5 = pnand %p6890_p2, %p6884_p12 }
 0x142   : > { %6894 = shalt.err (!%p6891_p5)
}
 0x143   : > { %6200 = dma.hbm_to_vmem [thread:$0]  (!%p7652_p6), %s8684_s12, 1024, %s1086_s1, [#allocation33], %s8695_s25, %s8695_s25, %s8694_s19  }
 0x144   : > { %s6895_s4 = scalar_lea.hbm %s7588_s27, 1024 }
 0x145   : > { %p6896_p7 = scmp.ne.s32.totalorder %s7588_s27, %s6895_s4  ;;  %p6902_p3 = scmp.lt.u32.totalorder %s6895_s4, %s7588_s27 }
 0x147   : > { %p6898_p4 = pnand %p6896_p7, %p7664_p8 }
 0x149   : > { %p6899_p1 = pneg %p6898_p4 }
 0x14b   : > { %p6904_p9 = pnand %p6902_p3, %p6899_p1 }
 0x14d   : > { %6907 = shalt.err (!%p6904_p9)
}
 0x14e   : > { %s6908_s2 = scalar_lea.vmem %s1121_s22, 1024  ;;  %p6916_p13 = scmp.lt.s32.totalorder %s1121_s22, %s1121_s22 }
 0x14f   : > { %p6909_p10 = scmp.ne.s32.totalorder %s1121_s22, %s6908_s2  ;;  %p6917_p0 = scmp.lt.s32.totalorder %s6908_s2, %s6908_s2 }
 0x151   : > { %p6911_p11 = pnand %p6909_p10, %p7664_p8  ;;  %p6918_p2 = por %p6917_p0, %p6916_p13 }
 0x153   : > { %p6912_p12 = pneg %p6911_p11 }
 0x155   : > { %p6919_p5 = pnand %p6918_p2, %p6912_p12 }
 0x157   : > { %6922 = shalt.err (!%p6919_p5)
}
 0x158   : > { %6206 = dma.hbm_to_vmem [thread:$0]  (!%p7652_p6), %s7588_s27, 1024, %s1121_s22, [#allocation36], %s8695_s25, %s8695_s25, %s8694_s19  }
 0x159   : > { %s7420_s10 = smov [#allocation7]   ;;  %s7421_s1 = smov [#allocation10]  }
 0x15a   : > { %s872_s23 = sshll.u32 %s7420_s10, 4  ;;  %s893_s11 = sshll.u32 %s7421_s1, 4  ;;  %s873_s23 = int_to_ptr.vmem [resolvable:$true] %s872_s23  ;;  %s894_s11 = int_to_ptr.vmem [resolvable:$true] %s893_s11 }
 0x15b   : > { %s6923_s3 = scalar_lea.hbm %s8683_s13, 16 }
 0x15c   : > { %p6924_p7 = scmp.ne.s32.totalorder %s8683_s13, %s6923_s3  ;;  %p6930_p3 = scmp.lt.u32.totalorder %s6923_s3, %s8683_s13 }
 0x15e   : > { %p6926_p4 = pnand %p6924_p7, %p7664_p8 }
 0x160   : > { %p6927_p1 = pneg %p6926_p4 }
 0x162   : > { %p6932_p9 = pnand %p6930_p3, %p6927_p1 }
 0x164   : > { %6935 = shalt.err (!%p6932_p9)
}
 0x165   : > { %s6936_s4 = scalar_lea.vmem %s873_s23, 16  ;;  %s6943_s22 = scalar_lea.vmem %s873_s23, 32 }
 0x166   : > { %p6937_p10 = scmp.ne.s32.totalorder %s873_s23, %s6936_s4  ;;  %p6944_p13 = scmp.lt.s32.totalorder %s873_s23, %s873_s23 }
 0x167   : > { %p6945_p0 = scmp.lt.s32.totalorder %s6943_s22, %s6936_s4 }
 0x168   : > { %p6939_p11 = pnand %p6937_p10, %p7664_p8 }
 0x169   : > { %p6946_p2 = por %p6945_p0, %p6944_p13 }
 0x16a   : > { %p6940_p12 = pneg %p6939_p11 }
 0x16c   : > { %p6947_p5 = pnand %p6946_p2, %p6940_p12 }
 0x16e   : > { %6950 = shalt.err (!%p6947_p5)
}
 0x16f   : > { %6149 = dma.hbm_to_vmem [thread:$0]  (!%p7652_p6), %s8683_s13, 16, %s873_s23, [#allocation6]  }
 0x170   : > { %s6951_s2 = scalar_lea.hbm %s7463_s21, 4608 }
 0x171   : > { %p6952_p7 = scmp.ne.s32.totalorder %s7463_s21, %s6951_s2  ;;  %p6958_p3 = scmp.lt.u32.totalorder %s6951_s2, %s7463_s21 }
 0x173   : > { %p6954_p4 = pnand %p6952_p7, %p7664_p8 }
 0x175   : > { %p6955_p1 = pneg %p6954_p4 }
 0x177   : > { %p6960_p9 = pnand %p6958_p3, %p6955_p1 }
 0x179   : > { %6963 = shalt.err (!%p6960_p9)
}
 0x17a   : > { %s6964_s10 = scalar_lea.vmem %s894_s11, 4608  ;;  %p6972_p13 = scmp.lt.s32.totalorder %s894_s11, %s894_s11 }
 0x17b   : > { %p6965_p10 = scmp.ne.s32.totalorder %s894_s11, %s6964_s10  ;;  %p6973_p0 = scmp.lt.s32.totalorder %s6964_s10, %s6964_s10 }
 0x17d   : > { %p6967_p11 = pnand %p6965_p10, %p7664_p8  ;;  %p6974_p2 = por %p6973_p0, %p6972_p13 }
 0x17f   : > { %p6968_p12 = pneg %p6967_p11 }
 0x181   : > { %p6975_p5 = pnand %p6974_p2, %p6968_p12 }
 0x183   : > { %6978 = shalt.err (!%p6975_p5)
}
 0x184   : > { %6155 = dma.hbm_to_vmem [thread:$0]  (!%p7652_p6), %s7463_s21, 4608, %s894_s11, [#allocation9], %s8695_s25, %s8695_s25, %s8694_s19  }
 0x185   : > { %s7422_s23 = smov [#allocation13]   ;;  %s7423_s3 = smov [#allocation16]  }
 0x186   : > { %s923_s1 = sshll.u32 %s7422_s23, 4  ;;  %s947_s4 = sshll.u32 %s7423_s3, 4  ;;  %s924_s1 = int_to_ptr.vmem [resolvable:$true] %s923_s1  ;;  %s948_s4 = int_to_ptr.vmem [resolvable:$true] %s947_s4 }
 0x187   : > { %s6979_s22 = scalar_lea.hbm %s8686_s8, 1024 }
 0x188   : > { %p6980_p7 = scmp.ne.s32.totalorder %s8686_s8, %s6979_s22  ;;  %p6986_p3 = scmp.lt.u32.totalorder %s6979_s22, %s8686_s8 }
 0x18a   : > { %p6982_p4 = pnand %p6980_p7, %p7664_p8 }
 0x18c   : > { %p6983_p1 = pneg %p6982_p4 }
 0x18e   : > { %p6988_p9 = pnand %p6986_p3, %p6983_p1 }
 0x190   : > { %6991 = shalt.err (!%p6988_p9)
}
 0x191   : > { %s6992_s2 = scalar_lea.vmem %s924_s1, 1024  ;;  %p7000_p13 = scmp.lt.s32.totalorder %s924_s1, %s924_s1 }
 0x192   : > { %p6993_p10 = scmp.ne.s32.totalorder %s924_s1, %s6992_s2  ;;  %p7001_p0 = scmp.lt.s32.totalorder %s6992_s2, %s6992_s2 }
 0x194   : > { %p6995_p11 = pnand %p6993_p10, %p7664_p8  ;;  %p7002_p2 = por %p7001_p0, %p7000_p13 }
 0x196   : > { %p6996_p12 = pneg %p6995_p11 }
 0x198   : > { %p7003_p5 = pnand %p7002_p2, %p6996_p12 }
 0x19a   : > { %7006 = shalt.err (!%p7003_p5)
}
 0x19b   : > { %s8696_s11 = sld [smem:[#allocation61_spill]] }
 0x19c   : > { %6161 = dma.hbm_to_vmem [thread:$0]  (!%p7652_p6), %s8686_s8, 1024, %s924_s1, [#allocation12], %s8695_s25, %s8695_s25, %s8694_s19  }
 0x1a1   : > { %s7007_s10 = scalar_lea.hbm %s8696_s11, 1024 }
 0x1a2   : > { %p7008_p7 = scmp.ne.s32.totalorder %s8696_s11, %s7007_s10  ;;  %p7014_p3 = scmp.lt.u32.totalorder %s7007_s10, %s8696_s11 }
 0x1a4   : > { %p7010_p4 = pnand %p7008_p7, %p7664_p8 }
 0x1a6   : > { %p7011_p1 = pneg %p7010_p4 }
 0x1a8   : > { %p7016_p9 = pnand %p7014_p3, %p7011_p1 }
 0x1aa   : > { %7019 = shalt.err (!%p7016_p9)
}
 0x1ab   : > { %s7020_s23 = scalar_lea.vmem %s948_s4, 1024  ;;  %p7028_p13 = scmp.lt.s32.totalorder %s948_s4, %s948_s4 }
 0x1ac   : > { %p7021_p10 = scmp.ne.s32.totalorder %s948_s4, %s7020_s23  ;;  %p7029_p0 = scmp.lt.s32.totalorder %s7020_s23, %s7020_s23 }
 0x1ae   : > { %p7023_p11 = pnand %p7021_p10, %p7664_p8  ;;  %p7030_p2 = por %p7029_p0, %p7028_p13 }
 0x1b0   : > { %p7024_p12 = pneg %p7023_p11 }
 0x1b2   : > { %p7031_p5 = pnand %p7030_p2, %p7024_p12 }
 0x1b4   : > { %7034 = shalt.err (!%p7031_p5)
}
 0x1b5   : > { %s8697_s1 = sld [smem:[#allocation62_spill]]  ;;  %s7424_s3 = smov [#allocation19]  }
 0x1b6   : > { %6167 = dma.hbm_to_vmem [thread:$0]  (!%p7652_p6), %s8696_s11, 1024, %s948_s4, [#allocation15], %s8695_s25, %s8695_s25, %s8694_s19  }
 0x1b7   : > { %s971_s22 = sshll.u32 %s7424_s3, 4  ;;  %s7425_s2 = smov [#allocation22]   ;;  %s972_s22 = int_to_ptr.vmem [resolvable:$true] %s971_s22 }
 0x1b8   : > { %s996_s10 = sshll.u32 %s7425_s2, 4  ;;  %s997_s10 = int_to_ptr.vmem [resolvable:$true] %s996_s10 }
 0x1bb   : > { %s7035_s23 = scalar_lea.hbm %s8697_s1, 1024 }
 0x1bc   : > { %p7036_p7 = scmp.ne.s32.totalorder %s8697_s1, %s7035_s23  ;;  %p7042_p3 = scmp.lt.u32.totalorder %s7035_s23, %s8697_s1 }
 0x1be   : > { %p7038_p4 = pnand %p7036_p7, %p7664_p8 }
 0x1c0   : > { %p7039_p1 = pneg %p7038_p4 }
 0x1c2   : > { %p7044_p9 = pnand %p7042_p3, %p7039_p1 }
 0x1c4   : > { %7047 = shalt.err (!%p7044_p9)
}
 0x1c5   : > { %s7048_s5 = scalar_lea.vmem %s972_s22, 1024  ;;  %p7056_p13 = scmp.lt.s32.totalorder %s972_s22, %s972_s22 }
 0x1c6   : > { %p7049_p10 = scmp.ne.s32.totalorder %s972_s22, %s7048_s5  ;;  %p7057_p0 = scmp.lt.s32.totalorder %s7048_s5, %s7048_s5 }
 0x1c8   : > { %p7051_p11 = pnand %p7049_p10, %p7664_p8  ;;  %p7058_p2 = por %p7057_p0, %p7056_p13 }
 0x1ca   : > { %p7052_p12 = pneg %p7051_p11 }
 0x1cc   : > { %p7059_p5 = pnand %p7058_p2, %p7052_p12 }
 0x1ce   : > { %7062 = shalt.err (!%p7059_p5)
}
 0x1cf   : > { %s8698_s4 = sld [smem:[#allocation64_spill]] }
 0x1d0   : > { %6173 = dma.hbm_to_vmem [thread:$0]  (!%p7652_p6), %s8697_s1, 1024, %s972_s22, [#allocation18], %s8695_s25, %s8695_s25, %s8694_s19  }
 0x1d5   : > { %s7063_s3 = scalar_lea.hbm %s8698_s4, 16 }
 0x1d6   : > { %p7064_p7 = scmp.ne.s32.totalorder %s8698_s4, %s7063_s3  ;;  %p7070_p3 = scmp.lt.u32.totalorder %s7063_s3, %s8698_s4 }
 0x1d8   : > { %p7066_p4 = pnand %p7064_p7, %p7664_p8 }
 0x1da   : > { %p7067_p1 = pneg %p7066_p4 }
 0x1dc   : > { %p7072_p9 = pnand %p7070_p3, %p7067_p1 }
 0x1de   : > { %7075 = shalt.err (!%p7072_p9)
}
 0x1df   : > { %s7076_s5 = scalar_lea.vmem %s997_s10, 16  ;;  %s7083_s2 = scalar_lea.vmem %s997_s10, 32 }
 0x1e0   : > { %p7077_p10 = scmp.ne.s32.totalorder %s997_s10, %s7076_s5  ;;  %p7084_p13 = scmp.lt.s32.totalorder %s997_s10, %s997_s10 }
 0x1e1   : > { %p7085_p0 = scmp.lt.s32.totalorder %s7083_s2, %s7076_s5 }
 0x1e2   : > { %p7079_p11 = pnand %p7077_p10, %p7664_p8 }
 0x1e3   : > { %p7086_p2 = por %p7085_p0, %p7084_p13 }
 0x1e4   : > { %p7080_p12 = pneg %p7079_p11 }
 0x1e6   : > { %p7087_p5 = pnand %p7086_p2, %p7080_p12 }
 0x1e8   : > { %7090 = shalt.err (!%p7087_p5)
}
 0x1e9   : > { %s8699_s22 = sld [smem:[#allocation65_spill]]  ;;  %s7426_s23 = smov [#allocation25]  }
 0x1ea   : > { %6179 = dma.hbm_to_vmem [thread:$0]  (!%p7652_p6), %s8698_s4, 16, %s997_s10, [#allocation21]  }
 0x1eb   : > { %s1020_s3 = sshll.u32 %s7426_s23, 4  ;;  %s7427_s1 = smov [#allocation28]   ;;  %s1021_s3 = int_to_ptr.vmem [resolvable:$true] %s1020_s3 }
 0x1ec   : > { %s1041_s6 = sshll.u32 %s7427_s1, 4  ;;  %s1042_s6 = int_to_ptr.vmem [resolvable:$true] %s1041_s6 }
 0x1ef   : > { %s7091_s8 = scalar_lea.hbm %s8699_s22, 16 }
 0x1f0   : > { %p7092_p7 = scmp.ne.s32.totalorder %s8699_s22, %s7091_s8  ;;  %p7098_p3 = scmp.lt.u32.totalorder %s7091_s8, %s8699_s22 }
 0x1f2   : > { %p7094_p4 = pnand %p7092_p7, %p7664_p8 }
 0x1f4   : > { %p7095_p1 = pneg %p7094_p4 }
 0x1f6   : > { %p7100_p9 = pnand %p7098_p3, %p7095_p1 }
 0x1f8   : > { %7103 = shalt.err (!%p7100_p9)
}
 0x1f9   : > { %s7104_s5 = scalar_lea.vmem %s1021_s3, 16  ;;  %s7111_s10 = scalar_lea.vmem %s1021_s3, 32 }
 0x1fa   : > { %p7105_p10 = scmp.ne.s32.totalorder %s1021_s3, %s7104_s5  ;;  %p7112_p13 = scmp.lt.s32.totalorder %s1021_s3, %s1021_s3 }
 0x1fb   : > { %p7113_p0 = scmp.lt.s32.totalorder %s7111_s10, %s7104_s5 }
 0x1fc   : > { %p7107_p11 = pnand %p7105_p10, %p7664_p8 }
 0x1fd   : > { %p7114_p2 = por %p7113_p0, %p7112_p13 }
 0x1fe   : > { %p7108_p12 = pneg %p7107_p11 }
 0x200   : > { %p7115_p5 = pnand %p7114_p2, %p7108_p12 }
 0x202   : > { %7118 = shalt.err (!%p7115_p5)
}
 0x203   : > { %s8700_s1 = sld [smem:[#allocation67_spill]] }
 0x204   : > { %6185 = dma.hbm_to_vmem [thread:$0]  (!%p7652_p6), %s8699_s22, 16, %s1021_s3, [#allocation24]  }
 0x209   : > { %s7119_s8 = scalar_lea.hbm %s8700_s1, 1152 }
 0x20a   : > { %p7120_p7 = scmp.ne.s32.totalorder %s8700_s1, %s7119_s8  ;;  %p7126_p3 = scmp.lt.u32.totalorder %s7119_s8, %s8700_s1 }
 0x20c   : > { %p7122_p4 = pnand %p7120_p7, %p7664_p8 }
 0x20e   : > { %p7123_p1 = pneg %p7122_p4 }
 0x210   : > { %p7128_p9 = pnand %p7126_p3, %p7123_p1 }
 0x212   : > { %7131 = shalt.err (!%p7128_p9)
}
 0x213   : > { %s7132_s2 = scalar_lea.vmem %s1042_s6, 1152  ;;  %p7140_p13 = scmp.lt.s32.totalorder %s1042_s6, %s1042_s6 }
 0x214   : > { %p7133_p10 = scmp.ne.s32.totalorder %s1042_s6, %s7132_s2  ;;  %p7141_p0 = scmp.lt.s32.totalorder %s7132_s2, %s7132_s2 }
 0x216   : > { %p7135_p11 = pnand %p7133_p10, %p7664_p8  ;;  %p7142_p2 = por %p7141_p0, %p7140_p13 }
 0x218   : > { %p7136_p12 = pneg %p7135_p11 }
 0x21a   : > { %p7143_p5 = pnand %p7142_p2, %p7136_p12 }
 0x21c   : > { %7146 = shalt.err (!%p7143_p5)
}
 0x21d   : > { %s8701_s23 = sld [smem:[#allocation70_spill]]  ;;  %s7428_s3 = smov [#allocation31]  }
 0x21e   : > { %6191 = dma.hbm_to_vmem [thread:$0]  (!%p7652_p6), %s8700_s1, 1152, %s1042_s6, [#allocation27], %s8695_s25, %s8695_s25, %s8694_s19  }
 0x21f   : > { %s1069_s5 = sshll.u32 %s7428_s3, 4  ;;  %s7429_s10 = smov [#allocation34]   ;;  %s1070_s5 = int_to_ptr.vmem [resolvable:$true] %s1069_s5 }
 0x220   : > { %s1101_s8 = sshll.u32 %s7429_s10, 4  ;;  %s1102_s8 = int_to_ptr.vmem [resolvable:$true] %s1101_s8 }
 0x223   : > { %s7147_s2 = scalar_lea.hbm %s8701_s23, 16 }
 0x224   : > { %p7148_p7 = scmp.ne.s32.totalorder %s8701_s23, %s7147_s2  ;;  %p7154_p3 = scmp.lt.u32.totalorder %s7147_s2, %s8701_s23 }
 0x226   : > { %p7150_p4 = pnand %p7148_p7, %p7664_p8 }
 0x228   : > { %p7151_p1 = pneg %p7150_p4 }
 0x22a   : > { %p7156_p9 = pnand %p7154_p3, %p7151_p1 }
 0x22c   : > { %7159 = shalt.err (!%p7156_p9)
}
 0x22d   : > { %s7160_s4 = scalar_lea.vmem %s1070_s5, 16  ;;  %s7167_s6 = scalar_lea.vmem %s1070_s5, 32 }
 0x22e   : > { %p7161_p10 = scmp.ne.s32.totalorder %s1070_s5, %s7160_s4  ;;  %p7168_p13 = scmp.lt.s32.totalorder %s1070_s5, %s1070_s5 }
 0x22f   : > { %p7169_p0 = scmp.lt.s32.totalorder %s7167_s6, %s7160_s4 }
 0x230   : > { %p7163_p11 = pnand %p7161_p10, %p7664_p8 }
 0x231   : > { %p7170_p2 = por %p7169_p0, %p7168_p13 }
 0x232   : > { %p7164_p12 = pneg %p7163_p11 }
 0x234   : > { %p7171_p5 = pnand %p7170_p2, %p7164_p12 }
 0x236   : > { %7174 = shalt.err (!%p7171_p5)
}
 0x237   : > { %s8702_s3 = sld [smem:[#allocation75_spill]] }
 0x238   : > { %6197 = dma.hbm_to_vmem [thread:$0]  (!%p7652_p6), %s8701_s23, 16, %s1070_s5, [#allocation30]  }
 0x23d   : > { %s7175_s10 = scalar_lea.hbm %s8702_s3, 1024 }
 0x23e   : > { %p7176_p7 = scmp.ne.s32.totalorder %s8702_s3, %s7175_s10  ;;  %p7182_p3 = scmp.lt.u32.totalorder %s7175_s10, %s8702_s3 }
 0x240   : > { %p7178_p4 = pnand %p7176_p7, %p7664_p8 }
 0x242   : > { %p7179_p1 = pneg %p7178_p4 }
 0x244   : > { %p7184_p9 = pnand %p7182_p3, %p7179_p1 }
 0x246   : > { %7187 = shalt.err (!%p7184_p9)
}
 0x247   : > { %s7188_s4 = scalar_lea.vmem %s1102_s8, 1024  ;;  %p7196_p13 = scmp.lt.s32.totalorder %s1102_s8, %s1102_s8 }
 0x248   : > { %p7189_p10 = scmp.ne.s32.totalorder %s1102_s8, %s7188_s4  ;;  %p7197_p0 = scmp.lt.s32.totalorder %s7188_s4, %s7188_s4 }
 0x24a   : > { %p7191_p11 = pnand %p7189_p10, %p7664_p8  ;;  %p7198_p2 = por %p7197_p0, %p7196_p13 }
 0x24c   : > { %p7192_p12 = pneg %p7191_p11 }
 0x24e   : > { %p7199_p5 = pnand %p7198_p2, %p7192_p12 }
 0x250   : > { %7202 = shalt.err (!%p7199_p5)
}
 0x251   : > { %6203 = dma.hbm_to_vmem [thread:$0]  (!%p7652_p6), %s8702_s3, 1024, %s1102_s8, [#allocation33], %s8695_s25, %s8695_s25, %s8694_s19  }
 0x252   : > { %s7430_s5 = smov [#allocation37]   ;;  %s7203_s6 = scalar_lea.hbm %s7603_s30, 1024 }
 0x253   : > { %s1139_s2 = sshll.u32 %s7430_s5, 4  ;;  %p7204_p7 = scmp.ne.s32.totalorder %s7603_s30, %s7203_s6  ;;  %s1140_s2 = int_to_ptr.vmem [resolvable:$true] %s1139_s2 }
 0x254   : > { %p7210_p3 = scmp.lt.u32.totalorder %s7203_s6, %s7603_s30 }
 0x255   : > { %p7206_p4 = pnand %p7204_p7, %p7664_p8 }
 0x257   : > { %p7207_p1 = pneg %p7206_p4 }
 0x259   : > { %p7212_p9 = pnand %p7210_p3, %p7207_p1 }
 0x25b   : > { %7215 = shalt.err (!%p7212_p9)
}
 0x25c   : > { %s7216_s10 = scalar_lea.vmem %s1140_s2, 1024  ;;  %p7224_p13 = scmp.lt.s32.totalorder %s1140_s2, %s1140_s2 }
 0x25d   : > { %p7217_p10 = scmp.ne.s32.totalorder %s1140_s2, %s7216_s10  ;;  %p7225_p0 = scmp.lt.s32.totalorder %s7216_s10, %s7216_s10 }
 0x25f   : > { %p7219_p11 = pnand %p7217_p10, %p7664_p8  ;;  %p7226_p2 = por %p7225_p0, %p7224_p13 }
 0x261   : > { %p7220_p12 = pneg %p7219_p11 }
 0x263   : > { %p7227_p5 = pnand %p7226_p2, %p7220_p12 }
 0x265   : > { %7230 = shalt.err (!%p7227_p5)
}
 0x266   : > { %6209 = dma.hbm_to_vmem [thread:$0]  (!%p7652_p6), %s7603_s30, 1024, %s1140_s2, [#allocation36], %s8695_s25, %s8695_s25, %s8694_s19  }
 0x267   : > { %s5059_s29 = sadd.s32 4294967294, %s7371_s18   ;;  %s7938_s7 = sadd.s32 1, %s7371_s18  }
 0x268   : > { %s100_s8 = ssub.s32 %s7371_s18, %s7938_s7  ;;  %s103_s4 = sadd.s32 1, %s7367_s0 }
 0x269   : > { %s8703_s5 = sld [smem:[#allocation52_spill]]  ;;  %p101_p8 = scmp.eq.s32.totalorder %s100_s8, 0 }
 0x26a   : > { %p110_p7 = scmp.ne.s32.totalorder %s7367_s0, %s7363_s16  ;;  %p111_p4 = scmp.eq.s32.totalorder %s7371_s18, 0 }
 0x26b   : > { %p116_p1 = scmp.ne.s32.totalorder %s7363_s16, %s7359_s15  ;;  %p8705_p9 = scmp.eq.s32.totalorder %s7636_s26, 0 }
 0x26c   : > { %s7949_s6 = scalar_select %p101_p8, %s7367_s0, %s103_s4  }
 0x26d   : > { %p7951_p3 = por %p111_p4, %p110_p7  ;;  %p7957_p6 = por %p8705_p9, %p116_p1 }
 0x26e   : > { %p833_p10 = scmp.eq.s32.totalorder %s7636_s26, 1  ;;  %p839_p11 = scmp.eq.s32.totalorder %s5059_s29, 1 }
 0x26f   : > { %s8706_s2 = scalar_select %p7957_p6, 1, 0 }
 0x270   : > { %p6240_p12 = scmp.lt.s32.totalorder %s7371_s18, 2  ;;  %s1156_s1 = sand.u32 1, %s7367_s0  }
 0x271   : > { %p7964_p13 = por %p833_p10, %p110_p7  ;;  %p7968_p0 = por %p839_p11, %p116_p1 }
 0x272   : > { %s5084_s3 = sshll.u32 %s1156_s1, 5  ;;  %s5370_s9 = sshll.u32 %s7371_s18, 9 }
 0x273   : > { %s8707_s8 = scalar_select %p7964_p13, 1, 0 }
 0x274   : > { %s8708_s4 = scalar_select %p7968_p0, 1, 0 }
 0x275   : > { %s7974_s11 = scalar_lea.hbm %s8703_s5, %s5370_s9  ;;  %s1160_s29 = scalar_lea.vmem [#allocation2], %s5084_s3 }
 0x276   : > { %s1167_s12 = sshll.u32 %s1160_s29, 4  ;;  %p7980_p2 = pnand %p6240_p12, %p7951_p3  ;;  %s7976_s12 = int_to_ptr.vmem [resolvable:$true] %s1167_s12 }
 0x277   : > { %s7984_s14 = scalar_lea.sflag [#allocation3], %s1156_s1  ;;  %s7231_s17 = scalar_lea.hbm %s7974_s11, 512 }
 0x278   : > { %p7232_p5 = scmp.ne.s32.totalorder %s7974_s11, %s7231_s17  ;;  %p7233_p8 = pneg %p7980_p2 }
 0x279   : > { %s7236_s9 = scalar_lea.hbm %s8703_s5, 1024  ;;  %p7237_p1 = scmp.lt.u32.totalorder %s7974_s11, %s8703_s5 }
 0x27a   : > { %p7234_p7 = pnand %p7233_p8, %p7232_p5  ;;  %p7238_p9 = scmp.lt.u32.totalorder %s7236_s9, %s7231_s17 }
 0x27b   : > { %p7240_p3 = scmp.lt.u32.totalorder %s7231_s17, %s7974_s11 }
 0x27c   : > { %p7235_p4 = pneg %p7234_p7  ;;  %p7239_p10 = por %p7238_p9, %p7237_p1 }
 0x27e   : > { %p7241_p11 = por %p7240_p3, %p7239_p10 }
 0x280   : > { %p7242_p12 = pnand %p7241_p11, %p7235_p4 }
 0x282   : > { %7245 = shalt.err (!%p7242_p12)
}
 0x283   : > { %s7246_s1 = scalar_lea.vmem %s7976_s12, 512  ;;  %s7431_s3 = smov [#allocation2]  }
 0x284   : > { %p7247_p0 = scmp.ne.s32.totalorder %s7976_s12, %s7246_s1  ;;  %s7251_s10 = sshll.u32 %s7431_s3, 4  ;;  %s7252_s10 = int_to_ptr.vmem [resolvable:$false] %s7251_s10 }
 0x285   : > { %s7253_s29 = scalar_lea.vmem %s7252_s10, 1024  ;;  %p7254_p5 = scmp.lt.s32.totalorder %s7976_s12, %s7252_s10 }
 0x286   : > { %p7249_p13 = pnand %p7247_p0, %p7233_p8  ;;  %p7255_p7 = scmp.lt.s32.totalorder %s7253_s29, %s7246_s1 }
 0x288   : > { %p7250_p6 = pneg %p7249_p13  ;;  %p7256_p1 = por %p7255_p7, %p7254_p5 }
 0x28a   : > { %p7257_p9 = pnand %p7256_p1, %p7250_p6 }
 0x28c   : > { %7260 = shalt.err (!%p7257_p9)
}
 0x28d   : > { %6213 = dma.hbm_to_vmem [thread:$0]  (!%p7980_p2), %s7974_s11, 512, %s7976_s12, %s7984_s14, %s8695_s25, %s8695_s25, %s8694_s19  }
 0x28e   : > { %p8710_p13 = scmp.ne.s32.totalorder %s8691_s28, 0 }
 0x28f   : > { %s8014_s17 = sand.u32 (!%p8710_p13), 1, %s7363_s16   ;;  %p8711_p6 = scmp.ne.s32.totalorder (!%p8710_p13), %s8706_s2, 0 }
 0x290   : > { %1179 = sbr.rel (%p8710_p13) target bundleno = 3888 (0xf30), region = 156  ;;  %s5088_s9 = sshll.u32 (!%p8710_p13), %s8014_s17, 5 }
 0x291   : > { %s1182_s1 = scalar_lea.sflag (!%p8710_p13), [#allocation3], %s8014_s17  ;;  %s8018_s3 = scalar_lea.vmem (!%p8710_p13), [#allocation2], %s5088_s9 }
 0x297   : > { %7306 = dma.done.wait (%p8711_p6), %s1182_s1, 512  }
 0x298   : > { %7308 = vsyncadd (%p8711_p6), %s1182_s1, 4294966784  ;;  %p8712_p0 = scmp.eq.s32.totalorder %s7636_s26, 0 }
 0x29a   : > { %7310 = dma.done.wait (%p8712_p0), [#allocation6], 1040   ;;  %p8713_p2 = pmov %p8712_p0 }
 0x29b   : > { %p8714_p8 = pmov %p8712_p0 }
 0x29c   : > { %7312 = vsyncadd (%p8713_p2), [#allocation6], 4294966256 }
 0x29d   : > { %7314 = dma.done.wait (%p8714_p8), [#allocation9], 4624   ;;  %p8715_p4 = pmov %p8712_p0 }
 0x29e   : > { %p8716_p10 = pmov %p8712_p0 }
 0x29f   : > { %7316 = vsyncadd (%p8715_p4), [#allocation9], 4294962672 }
 0x2a0   : > { %7318 = dma.done.wait (%p8716_p10), [#allocation12], 1040   ;;  %p8717_p3 = pmov %p8712_p0 }
 0x2a1   : > { %p8718_p11 = pmov %p8712_p0 }
 0x2a2   : > { %7320 = vsyncadd (%p8717_p3), [#allocation12], 4294966256 }
 0x2a3   : > { %7322 = dma.done.wait (%p8718_p11), [#allocation15], 1040   ;;  %p8719_p12 = pmov %p8712_p0 }
 0x2a4   : > { %p8720_p5 = pmov %p8712_p0 }
 0x2a5   : > { %7324 = vsyncadd (%p8719_p12), [#allocation15], 4294966256 }
 0x2a6   : > { %7326 = dma.done.wait (%p8720_p5), [#allocation18], 1040   ;;  %p8721_p7 = pmov %p8712_p0 }
 0x2a7   : > { %p8722_p1 = pmov %p8712_p0 }
 0x2a8   : > { %7328 = vsyncadd (%p8721_p7), [#allocation18], 4294966256 }
 0x2a9   : > { %7330 = dma.done.wait (%p8722_p1), [#allocation21], 32   ;;  %p8723_p9 = pmov %p8712_p0 }
 0x2aa   : > { %p8724_p13 = pmov %p8712_p0 }
 0x2ab   : > { %7332 = vsyncadd (%p8723_p9), [#allocation21], 4294967264 }
 0x2ac   : > { %7334 = dma.done.wait (%p8724_p13), [#allocation24], 1040   ;;  %p8725_p6 = pmov %p8712_p0 }
 0x2ae   : > { %7336 = vsyncadd (%p8725_p6), [#allocation24], 4294966256 }
 0x2af   : > { %7338 = dma.done.wait (%p8712_p0), [#allocation27], 1168   ;;  %p8726_p2 = pmov %p8712_p0 }
 0x2b0   : > { %p8727_p8 = pmov %p8712_p0 }
 0x2b1   : > { %7340 = vsyncadd (%p8726_p2), [#allocation27], 4294966128 }
 0x2b2   : > { %7342 = dma.done.wait (%p8727_p8), [#allocation30], 32   ;;  %p8728_p4 = pmov %p8712_p0 }
 0x2b3   : > { %p8729_p10 = pmov %p8712_p0 }
 0x2b4   : > { %7344 = vsyncadd (%p8728_p4), [#allocation30], 4294967264 }
 0x2b5   : > { %7346 = dma.done.wait (%p8729_p10), [#allocation33], 2048   ;;  %p8730_p3 = pmov %p8712_p0 }
 0x2b6   : > { %p8731_p11 = pmov %p8712_p0 }
 0x2b7   : > { %7348 = vsyncadd (%p8730_p3), [#allocation33], 4294965248 }
 0x2b8   : > { %7350 = dma.done.wait (%p8731_p11), [#allocation36], 2048   ;;  %p8732_p12 = pmov %p8712_p0 }
 0x2b9   : > { %v6356_v0 = vld [vmem:[#allocation5] sm:$0xff]   ;;  %v6357_v1 = vld [vmem:[#allocation5 + $0x8] sm:$0xff]   ;;  %v6358_v2 = vld [vmem:[#allocation5 + $0x10] sm:$0xff]   ;;  %vm1639_vm0 = vcmask 523264   ;;  %s8733_s13 = sld [smem:[#allocation56_spill]]  ;;  %vm7433_vm1 = vmmov 0  }
 0x2ba   : > { %7352 = vsyncadd (%p8732_p12), [#allocation36], 4294965248  ;;  %5587 = vmatprep.subr.bf16.mxu0 %v6356_v0  ;;  %v6359_v3 = vld [vmem:[#allocation5 + $0x18] sm:$0xff]   ;;  %v6364_v4 = vld [vmem:[%s8018_s3] sm:$0xff]   ;;  %s8734_s14 = sld [smem:[#allocation57_spill]]  ;;  %s8735_s12 = sld [smem:[#allocation71_spill]] }
 0x2bb   : > { %5588 = vmatpush3.bf16.msra.mxu0 %v6356_v0  ;;  %5603 = vmatprep.mubr.bf16.mxu0 %v6364_v4  ;;  %v6360_v5 = vld [vmem:[#allocation5 + $0x20] sm:$0xff]   ;;  %v6361_v6 = vld [vmem:[#allocation5 + $0x28] sm:$0xff]   ;;  %v6362_v7 = vld [vmem:[#allocation5 + $0x30] sm:$0xff]   ;;  %s8736_s28 = sld [smem:[#allocation68_spill]]  ;;  %s8737_s19 = sld [smem:[#allocation72_spill]] }
 0x2bc   : > { %5589 = vmatprep.subr.bf16.mxu0 %v6357_v1  ;;  %v6363_v8 = vld [vmem:[#allocation5 + $0x38] sm:$0xff]   ;;  %v6365_v9 = vld [vmem:[%s8018_s3 + $0x8] sm:$0xff]   ;;  %v6366_v10 = vld [vmem:[%s8018_s3 + $0x10] sm:$0xff]   ;;  %s8738_s25 = sld [smem:[#allocation74_spill]]  ;;  %s8739_s11 = sld [smem:[#allocation76_spill]] }
 0x2bd   : > { %v6367_v11 = vld [vmem:[%s8018_s3 + $0x18] sm:$0xff]   ;;  %v6368_v12 = vld [vmem:[#allocation10] sm:$0xff]   ;;  %v5124_v14 = vld [vmem:[#allocation7] ss:$0 sm:$0xff]  ;;  %s8740_s2 = sld [smem:[#allocation77_spill]]  ;;  %s8741_s10 = sld [smem:[#allocation78_spill]] }
 0x2be   : > { %v6370_v13 = vld [vmem:[#allocation10 + $0x80] sm:$0xff]   ;;  %5619 = vmatprep.mubr.msk.bf16.mxu1 %vm1639_vm0, %v6368_v12  ;;  %v5125_v16 = vld [vmem:[#allocation8] ss:$0 sm:$0xff]  ;;  %s8742_s29 = sld [smem:[#allocation79_spill]]  ;;  %s8743_s9 = sld [smem:[#allocation80_spill]] }
 0x2bf   : > { %5590 = vmatpush3.bf16.msra.mxu0 %v6357_v1  ;;  %s8744_s1 = sld [smem:[#allocation81_spill]]  ;;  %s5111_s3 = sshll.u32 %s8014_s17, 3 }
 0x2c0   : > { %5591 = vmatprep.subr.bf16.mxu0 %v6358_v2  ;;  %p8745_p7 = scmp.ne.s32.totalorder %s8707_s8, 0 }
 0x2c3   : > { %5592 = vmatpush3.bf16.msra.mxu0 %v6358_v2 }
 0x2c4   : > { %5593 = vmatprep.subr.bf16.mxu0 %v6359_v3 }
 0x2c7   : > { %5594 = vmatpush3.bf16.msra.mxu0 %v6359_v3 }
 0x2c8   : > { %5595 = vmatprep.subr.bf16.mxu0 %v6360_v5 }
 0x2cb   : > { %5596 = vmatpush3.bf16.msra.mxu0 %v6360_v5 }
 0x2cc   : > { %5597 = vmatprep.subr.bf16.mxu0 %v6361_v6 }
 0x2cf   : > { %5598 = vmatpush3.bf16.msra.mxu0 %v6361_v6 }
 0x2d0   : > { %5599 = vmatprep.subr.bf16.mxu0 %v6362_v7 }
 0x2d3   : > { %5600 = vmatpush3.bf16.msra.mxu0 %v6362_v7 }
 0x2d4   : > { %5601 = vmatprep.subr.bf16.mxu0 %v6363_v8 }
 0x2d7   : > { %5602 = vmatpush3.bf16.msra.mxu0 %v6363_v8 }
 0x2da   : > { %5604 = vmatmul.mubr.bf16.vlgmr.msra.gmra.mrb[0].mxu0 %v6365_v9 }
 0x2db   : > { %5607 = vmatprep.mubr.bf16.mxu0 %v6366_v10 }
 0x2e2   : > { %5608 = vmatmul.mubr.bf16.gmra.mrb[4].mxu0 %v6367_v11 }
 0x2e3   : > { %5683 = vmatprep.mubr.msk.bf16.mxu0 %vm1639_vm0, %v6370_v13 }
 0x3ad   : > { %v5605_v15 = vpop.f32.mrb[0].mxu0 }
 0x3ae   : > { %v1530_v17 = vmul.f32 %v5605_v15, %v5124_v14  ;;  %v1490_v18 = vpop.f32.mrb[1].mxu0 }
 0x3af   : > { %v1528_v19 = vmul.f32 %v5124_v14, %v1490_v18  ;;  %v5606_v20 = vpop.f32.mrb[2].mxu0 }
 0x3b0   : > { %v8074_v21 = vadd.f32 %v5125_v16, %v1530_v17  ;;  %v1531_v22 = vmul.f32 %v5606_v20, %v5124_v14  ;;  %v1493_v23 = vpop.f32.mrb[3].mxu0  ;;  %v6369_v20 = vld [vmem:[#allocation10 + $0x8] sm:$0xff]  }
 0x3b1   : > { %v1543_v24 = vadd.f32 %v5125_v16, %v1528_v19  ;;  %v1529_v25 = vmul.f32 %v5124_v14, %v1493_v23  ;;  %v6374_v23 = vld [vmem:[#allocation10 + $0x90] sm:$0xff]  }
 0x3b2   : > { %v5128_v26 = vmul.f32 -1.442695, %v8074_v21  ;;  %v1546_v27 = vadd.f32 %v5125_v16, %v1531_v22  ;;  %v6372_v22 = vld [vmem:[#allocation10 + $0x10] sm:$0xff]  }
 0x3b3   : > { %v5126_v28 = vmul.f32 -1.442695, %v1543_v24  ;;  %v1544_v29 = vadd.f32 %v5125_v16, %v1529_v25  ;;  %v6375_v25 = vld [vmem:[#allocation10 + $0x98] sm:$0xff]  }
 0x3b4   : > { %6485 = vpow2.f32 %v5128_v26  ;;  %v5129_v30 = vmul.f32 -1.442695, %v1546_v27  ;;  %v6376_v26 = vld [vmem:[#allocation10 + $0x20] sm:$0xff]  }
 0x3b5   : > { %6487 = vpow2.f32 %v5126_v28  ;;  %v5127_v31 = vmul.f32 -1.442695, %v1544_v29  ;;  %v5609_v32 = vpop.f32.mrb[4].mxu0  ;;  %v6377_v28 = vld [vmem:[#allocation10 + $0x28] sm:$0xff]  }
 0x3b6   : > { %6489 = vpow2.f32 %v5129_v30  ;;  %v1534_v33 = vmul.f32 %v5609_v32, %v5124_v14  ;;  %v1506_v34 = vpop.f32.mrb[5].mxu0  ;;  %v6380_v30 = vld [vmem:[#allocation10 + $0x30] sm:$0xff]   ;;  %v6381_v32 = vld [vmem:[#allocation10 + $0x38] sm:$0xff]  }
 0x3b7   : > { %6491 = vpow2.f32 %v5127_v31  ;;  %v1532_v35 = vmul.f32 %v5124_v14, %v1506_v34  ;;  %v5610_v36 = vpop.f32.mrb[6].mxu0  ;;  %v6393_v31 = vld [vmem:[#allocation10 + $0xd0] sm:$0xff]   ;;  %v6382_v34 = vld [vmem:[#allocation10 + $0x40] sm:$0xff]  }
 0x3b8   : > { %v8077_v37 = vadd.f32 %v5125_v16, %v1534_v33  ;;  %v1535_v38 = vmul.f32 %v5610_v36, %v5124_v14  ;;  %v1509_v39 = vpop.f32.mrb[7].mxu0  ;;  %v6395_v33 = vld [vmem:[#allocation10 + $0xd8] sm:$0xff]   ;;  %v6383_v36 = vld [vmem:[#allocation10 + $0x48] sm:$0xff]  }
 0x3b9   : > { %v1547_v40 = vadd.f32 %v5125_v16, %v1532_v35  ;;  %v1533_v41 = vmul.f32 %v5124_v14, %v1509_v39  ;;  %v6397_v35 = vld [vmem:[#allocation10 + $0x100] sm:$0xff]   ;;  %v6401_v39 = vld [vmem:[#allocation10 + $0x110] sm:$0xff]  }
 0x3ba   : > { %v5132_v42 = vmul.f32 -1.442695, %v8077_v37  ;;  %v1550_v43 = vadd.f32 %v5125_v16, %v1535_v38  ;;  %v6384_v38 = vld [vmem:[#allocation10 + $0x50] sm:$0xff]  }
 0x3bb   : > { %v5130_v44 = vmul.f32 -1.442695, %v1547_v40  ;;  %v1548_v45 = vadd.f32 %v5125_v16, %v1533_v41  ;;  %v6403_v41 = vld [vmem:[#allocation10 + $0x118] sm:$0xff]  }
 0x3bc   : > { %6493 = vpow2.f32 %v5132_v42  ;;  %v5133_v46 = vmul.f32 -1.442695, %v1550_v43  ;;  %v6386_v42 = vld [vmem:[#allocation10 + $0x60] sm:$0xff]  }
 0x3bd   : > { %6495 = vpow2.f32 %v5130_v44  ;;  %v5131_v47 = vmul.f32 -1.442695, %v1548_v45  ;;  %v6388_v44 = vld [vmem:[#allocation10 + $0x70] sm:$0xff]  }
 0x3be   : > { %v6486_v48 = vpop.eup %6485  ;;  %6497 = vpow2.f32 %v5133_v46  ;;  %v6390_v46 = vld [vmem:[#allocation10 + $0xa0] sm:$0xff]  }
 0x3bf   : > { %v6488_v49 = vpop.eup %6487  ;;  %v1577_v50 = vadd.f32 1.0, %v6486_v48  ;;  %6499 = vpow2.f32 %v5131_v47  ;;  %v6391_v47 = vld [vmem:[#allocation10 + $0xa8] sm:$0xff]   ;;  %v6392_v48 = vld [vmem:[#allocation10 + $0xb0] sm:$0xff]  }
 0x3c0   : > { %v6490_v51 = vpop.eup %6489  ;;  %v1575_v52 = vadd.f32 1.0, %v6488_v49  ;;  %v6394_v49 = vld [vmem:[#allocation10 + $0xb8] sm:$0xff]  }
 0x3c1   : > { %v6492_v53 = vpop.eup %6491  ;;  %6501 = vrcp.f32 %v1577_v50  ;;  %v1578_v54 = vadd.f32 1.0, %v6490_v51  ;;  %v6396_v50 = vld [vmem:[#allocation10 + $0xe0] sm:$0xff]   ;;  %v6398_v51 = vld [vmem:[#allocation10 + $0xe8] sm:$0xff]  }
 0x3c2   : > { %6503 = vrcp.f32 %v1575_v52  ;;  %v1576_v55 = vadd.f32 1.0, %v6492_v53  ;;  %v6400_v52 = vld [vmem:[#allocation10 + $0xf0] sm:$0xff]   ;;  %v6402_v53 = vld [vmem:[#allocation10 + $0xf8] sm:$0xff]  }
 0x3c3   : > { %6505 = vrcp.f32 %v1578_v54  ;;  %v6404_v54 = vld [vmem:[#allocation13] sm:$0xff]  }
 0x3c4   : > { %6507 = vrcp.f32 %v1576_v55  ;;  %v7432_v55 = vmov 0.0  }
 0x3c6   : > { %v6494_v56 = vpop.eup %6493 }
 0x3c7   : > { %v6496_v57 = vpop.eup %6495  ;;  %v1581_v58 = vadd.f32 1.0, %v6494_v56  ;;  %v6405_v56 = vld [vmem:[#allocation13 + $0x8] sm:$0xff]  }
 0x3c8   : > { %v6498_v59 = vpop.eup %6497  ;;  %v1579_v60 = vadd.f32 1.0, %v6496_v57  ;;  %v6406_v57 = vld [vmem:[#allocation13 + $0x10] sm:$0xff]  }
 0x3c9   : > { %v6500_v61 = vpop.eup %6499  ;;  %6509 = vrcp.f32 %v1581_v58  ;;  %v1582_v62 = vadd.f32 1.0, %v6498_v59 }
 0x3ca   : > { %6511 = vrcp.f32 %v1579_v60  ;;  %v1580_v63 = vadd.f32 1.0, %v6500_v61 }
 0x3cb   : > { %v6502_v0 = vpop.eup %6501  ;;  %6513 = vrcp.f32 %v1582_v62 }
 0x3cc   : > { %v6504_v1 = vpop.eup %6503  ;;  %6515 = vrcp.f32 %v1580_v63  ;;  %v8087_v7 = vmul.f32 %v6502_v0, %v8074_v21  ;;  %v6371_v21 = vld [vmem:[#allocation10 + $0x88] sm:$0xff]  }
 0x3cd   : > { %v6506_v2 = vpop.eup %6505  ;;  %v8080_v4 = vmul.f32 %v6504_v1, %v1543_v24  ;;  %v6373_v24 = vld [vmem:[#allocation10 + $0x18] sm:$0xff]  }
 0x3ce   : > { %v6508_v3 = vpop.eup %6507  ;;  %v8082_v5 = vmul.f32 %v6506_v2, %v1546_v27  ;;  %v6378_v27 = vld [vmem:[#allocation10 + $0xc0] sm:$0xff]  }
 0x3cf   : > { %v8084_v6 = vmul.f32 %v6508_v3, %v1544_v29  ;;  %v6379_v29 = vld [vmem:[#allocation10 + $0xc8] sm:$0xff]   ;;  %v6407_v2 = vld [vmem:[#allocation13 + $0x18] sm:$0xff]  }
 0x3d0   : > { %v8095_v10 = vpack.c.bf16 %v8082_v5, %v8087_v7  ;;  %v6408_v3 = vld [vmem:[#allocation13 + $0x20] sm:$0xff]  }
 0x3d1   : > { %v8091_v8 = vpack.c.bf16 %v8084_v6, %v8080_v4 }
 0x3d3   : > { %v6510_v9 = vpop.eup %6509  ;;  %5611 = vmatprep.subr.bf16.mxu1 %v8091_v8  ;;  %5675 = vmatprep.subr.bf16.mxu0 %v8091_v8 }
 0x3d4   : > { %v6512_v11 = vpop.eup %6511  ;;  %5612 = vmatpush3.bf16.msra.mxu1 %v8091_v8  ;;  %5676 = vmatpush3.bf16.msra.mxu0 %v8091_v8  ;;  %v8112_v17 = vmul.f32 %v6510_v9, %v8077_v37  ;;  %v6399_v37 = vld [vmem:[#allocation10 + $0x108] sm:$0xff]  }
 0x3d5   : > { %v6514_v12 = vpop.eup %6513  ;;  %5613 = vmatprep.subr.bf16.mxu1 %v8095_v10  ;;  %5677 = vmatprep.subr.bf16.mxu0 %v8095_v10  ;;  %v8103_v14 = vmul.f32 %v6512_v11, %v1547_v40  ;;  %v6385_v40 = vld [vmem:[#allocation10 + $0x58] sm:$0xff]  }
 0x3d6   : > { %v6516_v13 = vpop.eup %6515  ;;  %v8105_v15 = vmul.f32 %v6514_v12, %v1550_v43  ;;  %v6387_v43 = vld [vmem:[#allocation10 + $0x68] sm:$0xff]  }
 0x3d7   : > { %v8107_v16 = vmul.f32 %v6516_v13, %v1548_v45  ;;  %v6389_v45 = vld [vmem:[#allocation10 + $0x78] sm:$0xff]  }
 0x3d8   : > { %5614 = vmatpush3.bf16.msra.mxu1 %v8095_v10  ;;  %5678 = vmatpush3.bf16.msra.mxu0 %v8095_v10  ;;  %v8120_v19 = vpack.c.bf16 %v8105_v15, %v8112_v17 }
 0x3d9   : > { %v8116_v18 = vpack.c.bf16 %v8107_v16, %v8103_v14 }
 0x3db   : > { %5615 = vmatprep.subr.bf16.mxu1 %v8116_v18  ;;  %5679 = vmatprep.subr.bf16.mxu0 %v8116_v18 }
 0x3dc   : > { %5616 = vmatpush3.bf16.msra.mxu1 %v8116_v18  ;;  %5680 = vmatpush3.bf16.msra.mxu0 %v8116_v18 }
 0x3dd   : > { %5617 = vmatprep.subr.bf16.mxu1 %v8120_v19  ;;  %5681 = vmatprep.subr.bf16.mxu0 %v8120_v19 }
 0x3e0   : > { %5618 = vmatpush3.bf16.msra.mxu1 %v8120_v19  ;;  %5682 = vmatpush3.bf16.msra.mxu0 %v8120_v19 }
 0x3e1   : > { %5627 = vmatprep.subr.bf16.mxu1 %v8091_v8  ;;  %5707 = vmatprep.subr.bf16.mxu0 %v8091_v8 }
 0x3e3   : > { %5620 = vmatmul.mubr.msk.bf16.vlgmr.msra.gmra.mrb[0].mxu1 %vm1639_vm0, %v6369_v20  ;;  %5684 = vmatmul.mubr.msk.bf16.vlgmr.msra.gmra.mrb[8].mxu0 %vm1639_vm0, %v6371_v21  ;;  %v6410_v21 = vld [vmem:[#allocation13 + $0x30] sm:$0xff]  }
 0x3e4   : > { %5628 = vmatpush3.bf16.msra.mxu1 %v8091_v8  ;;  %5708 = vmatpush3.bf16.msra.mxu0 %v8091_v8 }
 0x3e5   : > { %5629 = vmatprep.subr.bf16.mxu1 %v8095_v10  ;;  %5709 = vmatprep.subr.bf16.mxu0 %v8095_v10 }
 0x3e6   : > { %5623 = vmatprep.mubr.msk.bf16.mxu1 %vm1639_vm0, %v6372_v22  ;;  %5687 = vmatprep.mubr.msk.bf16.mxu0 %vm1639_vm0, %v6374_v23  ;;  %v5142_v22 = vld [vmem:[%s8733_s13] ss:$0 sm:$0xff]  ;;  %v5152_v23 = vld [vmem:[%s8733_s13 + $0x1] ss:$0 sm:$0xff] }
 0x3e8   : > { %5630 = vmatpush3.bf16.msra.mxu1 %v8095_v10  ;;  %5710 = vmatpush3.bf16.msra.mxu0 %v8095_v10 }
 0x3e9   : > { %5631 = vmatprep.subr.bf16.mxu1 %v8116_v18  ;;  %5711 = vmatprep.subr.bf16.mxu0 %v8116_v18 }
 0x3eb   : > { %5624 = vmatmul.mubr.msk.bf16.gmra.mrb[4].mxu1 %vm1639_vm0, %v6373_v24  ;;  %5688 = vmatmul.mubr.msk.bf16.gmra.mrb[12].mxu0 %vm1639_vm0, %v6375_v25 }
 0x3ec   : > { %5632 = vmatpush3.bf16.msra.mxu1 %v8116_v18  ;;  %5712 = vmatpush3.bf16.msra.mxu0 %v8116_v18 }
 0x3ed   : > { %5633 = vmatprep.subr.bf16.mxu1 %v8120_v19  ;;  %5713 = vmatprep.subr.bf16.mxu0 %v8120_v19 }
 0x3ee   : > { %5635 = vmatprep.mubr.msk.bf16.mxu1 %vm1639_vm0, %v6376_v26  ;;  %5715 = vmatprep.mubr.msk.bf16.mxu0 %vm1639_vm0, %v6378_v27 }
 0x3f0   : > { %5634 = vmatpush3.bf16.msra.mxu1 %v8120_v19  ;;  %5714 = vmatpush3.bf16.msra.mxu0 %v8120_v19 }
 0x3f1   : > { %5643 = vmatprep.subr.bf16.mxu1 %v8091_v8  ;;  %5739 = vmatprep.subr.bf16.mxu0 %v8091_v8 }
 0x3f3   : > { %5636 = vmatmul.mubr.msk.bf16.vlgmr.msra.gmra.mrb[8].mxu1 %vm1639_vm0, %v6377_v28  ;;  %5716 = vmatmul.mubr.msk.bf16.vlgmr.msra.gmra.mrb[16].mxu0 %vm1639_vm0, %v6379_v29 }
 0x3f4   : > { %5644 = vmatpush3.bf16.msra.mxu1 %v8091_v8  ;;  %5740 = vmatpush3.bf16.msra.mxu0 %v8091_v8 }
 0x3f5   : > { %5645 = vmatprep.subr.bf16.mxu1 %v8095_v10  ;;  %5741 = vmatprep.subr.bf16.mxu0 %v8095_v10 }
 0x3f6   : > { %5639 = vmatprep.mubr.msk.bf16.mxu1 %vm1639_vm0, %v6380_v30  ;;  %5719 = vmatprep.mubr.msk.bf16.mxu0 %vm1639_vm0, %v6393_v31  ;;  %v6411_v30 = vld [vmem:[#allocation13 + $0x38] sm:$0xff]  }
 0x3f8   : > { %5646 = vmatpush3.bf16.msra.mxu1 %v8095_v10  ;;  %5742 = vmatpush3.bf16.msra.mxu0 %v8095_v10 }
 0x3f9   : > { %5647 = vmatprep.subr.bf16.mxu1 %v8116_v18  ;;  %5743 = vmatprep.subr.bf16.mxu0 %v8116_v18 }
 0x3fb   : > { %5640 = vmatmul.mubr.msk.bf16.gmra.mrb[12].mxu1 %vm1639_vm0, %v6381_v32  ;;  %5720 = vmatmul.mubr.msk.bf16.gmra.mrb[20].mxu0 %vm1639_vm0, %v6395_v33 }
 0x3fc   : > { %5648 = vmatpush3.bf16.msra.mxu1 %v8116_v18  ;;  %5744 = vmatpush3.bf16.msra.mxu0 %v8116_v18 }
 0x3fd   : > { %5649 = vmatprep.subr.bf16.mxu1 %v8120_v19  ;;  %5745 = vmatprep.subr.bf16.mxu0 %v8120_v19 }
 0x3fe   : > { %5651 = vmatprep.mubr.msk.bf16.mxu1 %vm1639_vm0, %v6382_v34  ;;  %5747 = vmatprep.mubr.msk.bf16.mxu0 %vm1639_vm0, %v6397_v35 }
 0x400   : > { %5650 = vmatpush3.bf16.msra.mxu1 %v8120_v19  ;;  %5746 = vmatpush3.bf16.msra.mxu0 %v8120_v19 }
 0x401   : > { %5659 = vmatprep.subr.bf16.mxu1 %v8091_v8  ;;  %5775 = vmatprep.subr.bf16.mxu0 %v7432_v55 }
 0x403   : > { %5652 = vmatmul.mubr.msk.bf16.vlgmr.msra.gmra.mrb[16].mxu1 %vm1639_vm0, %v6383_v36  ;;  %5748 = vmatmul.mubr.msk.bf16.vlgmr.msra.gmra.mrb[24].mxu0 %vm1639_vm0, %v6399_v37 }
 0x404   : > { %5660 = vmatpush3.bf16.msra.mxu1 %v8091_v8  ;;  %5655 = vmatprep.mubr.msk.bf16.mxu1 %vm1639_vm0, %v6384_v38 }
 0x405   : > { %5661 = vmatprep.subr.bf16.mxu1 %v8095_v10  ;;  %5751 = vmatprep.mubr.msk.bf16.mxu0 %vm1639_vm0, %v6401_v39 }
 0x408   : > { %5662 = vmatpush3.bf16.msra.mxu1 %v8095_v10 }
 0x409   : > { %5663 = vmatprep.subr.bf16.mxu1 %v8116_v18 }
 0x40b   : > { %5656 = vmatmul.mubr.msk.bf16.gmra.mrb[20].mxu1 %vm1639_vm0, %v6385_v40  ;;  %5752 = vmatmul.mubr.msk.bf16.gmra.mrb[28].mxu0 %vm1639_vm0, %v6403_v41 }
 0x40c   : > { %5664 = vmatpush3.bf16.msra.mxu1 %v8116_v18  ;;  %5667 = vmatprep.mubr.msk.bf16.mxu1 %vm1639_vm0, %v6386_v42 }
 0x40d   : > { %5665 = vmatprep.subr.bf16.mxu1 %v8120_v19  ;;  %5791 = vmatprep.mubr.msk.bf16.mxu0 %vm7433_vm1, %v7432_v55 }
 0x410   : > { %5666 = vmatpush3.bf16.msra.mxu1 %v8120_v19 }
 0x411   : > { %5691 = vmatprep.subr.bf16.mxu1 %v8091_v8 }
 0x413   : > { %5668 = vmatmul.mubr.msk.bf16.vlgmr.msra.gmra.mrb[24].mxu1 %vm1639_vm0, %v6387_v43 }
 0x414   : > { %5692 = vmatpush3.bf16.msra.mxu1 %v8091_v8  ;;  %5671 = vmatprep.mubr.msk.bf16.mxu1 %vm1639_vm0, %v6388_v44 }
 0x415   : > { %5693 = vmatprep.subr.bf16.mxu1 %v8095_v10 }
 0x418   : > { %5694 = vmatpush3.bf16.msra.mxu1 %v8095_v10 }
 0x419   : > { %5695 = vmatprep.subr.bf16.mxu1 %v8116_v18 }
 0x41b   : > { %5672 = vmatmul.mubr.msk.bf16.gmra.mrb[28].mxu1 %vm1639_vm0, %v6389_v45 }
 0x41c   : > { %5696 = vmatpush3.bf16.msra.mxu1 %v8116_v18  ;;  %5699 = vmatprep.mubr.msk.bf16.mxu1 %vm1639_vm0, %v6390_v46 }
 0x41d   : > { %5697 = vmatprep.subr.bf16.mxu1 %v8120_v19 }
 0x420   : > { %5698 = vmatpush3.bf16.msra.mxu1 %v8120_v19 }
 0x421   : > { %5723 = vmatprep.subr.bf16.mxu1 %v8091_v8 }
 0x423   : > { %5700 = vmatmul.mubr.msk.bf16.vlgmr.msra.gmra.mrb[32].mxu1 %vm1639_vm0, %v6391_v47 }
 0x424   : > { %5724 = vmatpush3.bf16.msra.mxu1 %v8091_v8  ;;  %5703 = vmatprep.mubr.msk.bf16.mxu1 %vm1639_vm0, %v6392_v48 }
 0x425   : > { %5725 = vmatprep.subr.bf16.mxu1 %v8095_v10 }
 0x428   : > { %5726 = vmatpush3.bf16.msra.mxu1 %v8095_v10 }
 0x429   : > { %5727 = vmatprep.subr.bf16.mxu1 %v8116_v18 }
 0x42b   : > { %5704 = vmatmul.mubr.msk.bf16.gmra.mrb[36].mxu1 %vm1639_vm0, %v6394_v49 }
 0x42c   : > { %5728 = vmatpush3.bf16.msra.mxu1 %v8116_v18  ;;  %5731 = vmatprep.mubr.msk.bf16.mxu1 %vm1639_vm0, %v6396_v50  ;;  %v6409_v18 = vld [vmem:[#allocation13 + $0x28] sm:$0xff]  }
 0x42d   : > { %5729 = vmatprep.subr.bf16.mxu1 %v8120_v19 }
 0x430   : > { %5730 = vmatpush3.bf16.msra.mxu1 %v8120_v19 }
 0x431   : > { %5755 = vmatprep.subr.bf16.mxu1 %v7432_v55 }
 0x433   : > { %5732 = vmatmul.mubr.msk.bf16.vlgmr.msra.gmra.mrb[40].mxu1 %vm1639_vm0, %v6398_v51 }
 0x434   : > { %5735 = vmatprep.mubr.msk.bf16.mxu1 %vm1639_vm0, %v6400_v52  ;;  %5756 = vmatpush3.bf16.msra.mxu1 %v6404_v54 }
 0x435   : > { %5757 = vmatprep.subr.bf16.mxu1 %v7432_v55 }
 0x438   : > { %5758 = vmatpush3.bf16.msra.mxu1 %v6405_v56 }
 0x439   : > { %5759 = vmatprep.subr.bf16.mxu1 %v7432_v55 }
 0x43b   : > { %5736 = vmatmul.mubr.msk.bf16.gmra.mrb[44].mxu1 %vm1639_vm0, %v6402_v53 }
 0x43c   : > { %5760 = vmatpush3.bf16.msra.mxu1 %v6406_v57  ;;  %5771 = vmatprep.mubr.msk.bf16.mxu1 %vm7433_vm1, %v7432_v55 }
 0x43d   : > { %5761 = vmatprep.subr.bf16.mxu1 %v7432_v55 }
 0x440   : > { %5762 = vmatpush3.bf16.msra.mxu1 %v6407_v2 }
 0x441   : > { %5763 = vmatprep.subr.bf16.mxu1 %v7432_v55 }
 0x444   : > { %5764 = vmatpush3.bf16.msra.mxu1 %v6408_v3 }
 0x445   : > { %5765 = vmatprep.subr.bf16.mxu1 %v7432_v55 }
 0x448   : > { %5766 = vmatpush3.bf16.msra.mxu1 %v6409_v18 }
 0x449   : > { %5767 = vmatprep.subr.bf16.mxu1 %v7432_v55 }
 0x44c   : > { %5768 = vmatpush3.bf16.msra.mxu1 %v6410_v21  ;;  %v5162_v21 = vld [vmem:[%s8733_s13 + $0x2] ss:$0 sm:$0xff] }
 0x44d   : > { %5769 = vmatprep.subr.bf16.mxu1 %v7432_v55 }
 0x450   : > { %5770 = vmatpush3.bf16.msra.mxu1 %v6411_v30 }
 0x4b6   : > { %v5621_v58 = vpop.f32.mrb[0].mxu1  ;;  %v8224_v59 = vpop.f32.mrb[8].mxu0 }
 0x4b7   : > { %v1686_v60 = vpop.f32.mrb[1].mxu1  ;;  %v8226_v61 = vpop.f32.mrb[9].mxu0  ;;  %v1726_v26 = vmul.f32 %v5621_v58, %v5142_v22 }
 0x4b8   : > { %v5622_v62 = vpop.f32.mrb[2].mxu1  ;;  %v8228_v63 = vpop.f32.mrb[10].mxu0  ;;  %v1724_v31 = vmul.f32 %v5142_v22, %v1686_v60 }
 0x4b9   : > { %v1689_v0 = vpop.f32.mrb[3].mxu1  ;;  %v8231_v1 = vpop.f32.mrb[11].mxu0  ;;  %v1727_v35 = vmul.f32 %v5622_v62, %v5142_v22 }
 0x4ba   : > { %v1725_v40 = vmul.f32 %v5142_v22, %v1689_v0 }
 0x4be   : > { %v5625_v8 = vpop.f32.mrb[4].mxu1  ;;  %v8234_v9 = vpop.f32.mrb[12].mxu0 }
 0x4bf   : > { %v1702_v10 = vpop.f32.mrb[5].mxu1  ;;  %v8236_v11 = vpop.f32.mrb[13].mxu0  ;;  %v1730_v47 = vmul.f32 %v5625_v8, %v5142_v22 }
 0x4c0   : > { %v5626_v12 = vpop.f32.mrb[6].mxu1  ;;  %v8238_v13 = vpop.f32.mrb[14].mxu0  ;;  %v1728_v51 = vmul.f32 %v5142_v22, %v1702_v10 }
 0x4c1   : > { %v1705_v19 = vpop.f32.mrb[7].mxu1  ;;  %v8241_v20 = vpop.f32.mrb[15].mxu0  ;;  %v1731_v56 = vmul.f32 %v5626_v12, %v5142_v22 }
 0x4c2   : > { %v1729_v0 = vmul.f32 %v5142_v22, %v1705_v19 }
 0x4c6   : > { %v5637_v24 = vpop.f32.mrb[8].mxu1  ;;  %v8250_v25 = vpop.f32.mrb[16].mxu0 }
 0x4c7   : > { %v1848_v27 = vmul.f32 %v5637_v24, %v5152_v23  ;;  %v1807_v28 = vpop.f32.mrb[9].mxu1  ;;  %v8252_v29 = vpop.f32.mrb[17].mxu0 }
 0x4c8   : > { %v1846_v32 = vmul.f32 %v5152_v23, %v1807_v28  ;;  %v5638_v33 = vpop.f32.mrb[10].mxu1  ;;  %v8254_v34 = vpop.f32.mrb[18].mxu0 }
 0x4c9   : > { %v1856_v36 = vadd.f32 %v1848_v27, %v1726_v26  ;;  %v1849_v37 = vmul.f32 %v5638_v33, %v5152_v23  ;;  %v1810_v38 = vpop.f32.mrb[11].mxu1  ;;  %v8257_v39 = vpop.f32.mrb[19].mxu0 }
 0x4ca   : > { %v1854_v41 = vadd.f32 %v1846_v32, %v1724_v31  ;;  %v1847_v42 = vmul.f32 %v5152_v23, %v1810_v38 }
 0x4cb   : > { %v1857_v43 = vadd.f32 %v1849_v37, %v1727_v35 }
 0x4cc   : > { %v1855_v44 = vadd.f32 %v1847_v42, %v1725_v40 }
 0x4ce   : > { %v5641_v45 = vpop.f32.mrb[12].mxu1  ;;  %v8259_v46 = vpop.f32.mrb[20].mxu0 }
 0x4cf   : > { %v1852_v48 = vmul.f32 %v5641_v45, %v5152_v23  ;;  %v1823_v49 = vpop.f32.mrb[13].mxu1  ;;  %v8261_v50 = vpop.f32.mrb[21].mxu0 }
 0x4d0   : > { %v1850_v52 = vmul.f32 %v5152_v23, %v1823_v49  ;;  %v5642_v53 = vpop.f32.mrb[14].mxu1  ;;  %v8263_v54 = vpop.f32.mrb[22].mxu0 }
 0x4d1   : > { %v1860_v57 = vadd.f32 %v1852_v48, %v1730_v47  ;;  %v1853_v58 = vmul.f32 %v5642_v53, %v5152_v23  ;;  %v1826_v60 = vpop.f32.mrb[15].mxu1  ;;  %v8265_v62 = vpop.f32.mrb[23].mxu0 }
 0x4d2   : > { %v1858_v2 = vadd.f32 %v1850_v52, %v1728_v51  ;;  %v1851_v3 = vmul.f32 %v5152_v23, %v1826_v60 }
 0x4d3   : > { %v1861_v8 = vadd.f32 %v1853_v58, %v1731_v56 }
 0x4d4   : > { %v1859_v18 = vadd.f32 %v1851_v3, %v1729_v0  ;;  %v5172_v0 = vld [vmem:[%s8733_s13 + $0x3] ss:$0 sm:$0xff]  ;;  %v5182_v3 = vld [vmem:[%s8733_s13 + $0x4] ss:$0 sm:$0xff] }
 0x4d6   : > { %v5653_v24 = vpop.f32.mrb[16].mxu1  ;;  %v8268_v26 = vpop.f32.mrb[24].mxu0 }
 0x4d7   : > { %v1978_v10 = vmul.f32 %v5653_v24, %v5162_v21  ;;  %v1937_v27 = vpop.f32.mrb[17].mxu1  ;;  %v8270_v28 = vpop.f32.mrb[25].mxu0 }
 0x4d8   : > { %v1976_v30 = vmul.f32 %v5162_v21, %v1937_v27  ;;  %v5654_v12 = vpop.f32.mrb[18].mxu1  ;;  %v8272_v31 = vpop.f32.mrb[26].mxu0  ;;  %v2238_v27 = vmul.f32 %v8224_v59, %v5182_v3 }
 0x4d9   : > { %v1986_v32 = vadd.f32 %v1978_v10, %v1856_v36  ;;  %v1979_v33 = vmul.f32 %v5654_v12, %v5162_v21  ;;  %v1940_v35 = vpop.f32.mrb[19].mxu1  ;;  %v8274_v19 = vpop.f32.mrb[27].mxu0 }
 0x4da   : > { %v1984_v22 = vadd.f32 %v1976_v30, %v1854_v41  ;;  %v1977_v23 = vmul.f32 %v5162_v21, %v1940_v35 }
 0x4db   : > { %v1987_v37 = vadd.f32 %v1979_v33, %v1857_v43  ;;  %v2236_v33 = vmul.f32 %v5182_v3, %v8226_v61  ;;  %v2242_v61 = vmul.f32 %v8234_v9, %v5182_v3  ;;  %v2241_v9 = vmul.f32 %v5182_v3, %v8241_v20 }
 0x4dc   : > { %v1985_v38 = vadd.f32 %v1977_v23, %v1855_v44 }
 0x4de   : > { %v5657_v40 = vpop.f32.mrb[20].mxu1  ;;  %v8276_v42 = vpop.f32.mrb[28].mxu0 }
 0x4df   : > { %v1982_v45 = vmul.f32 %v5657_v40, %v5162_v21  ;;  %v1953_v47 = vpop.f32.mrb[21].mxu1  ;;  %v8278_v48 = vpop.f32.mrb[29].mxu0 }
 0x4e0   : > { %v1980_v49 = vmul.f32 %v5162_v21, %v1953_v47  ;;  %v5658_v51 = vpop.f32.mrb[22].mxu1  ;;  %v8280_v36 = vpop.f32.mrb[30].mxu0 }
 0x4e1   : > { %v1990_v52 = vadd.f32 %v1982_v45, %v1860_v57  ;;  %v1983_v53 = vmul.f32 %v5658_v51, %v5162_v21  ;;  %v1956_v56 = vpop.f32.mrb[23].mxu1  ;;  %v8282_v41 = vpop.f32.mrb[31].mxu0  ;;  %v2237_v51 = vmul.f32 %v5182_v3, %v8231_v1 }
 0x4e2   : > { %v1988_v43 = vadd.f32 %v1980_v49, %v1858_v2  ;;  %v1981_v44 = vmul.f32 %v5162_v21, %v1956_v56 }
 0x4e3   : > { %v1991_v58 = vadd.f32 %v1983_v53, %v1861_v8  ;;  %v2239_v8 = vmul.f32 %v8228_v63, %v5182_v3 }
 0x4e4   : > { %v1989_v60 = vadd.f32 %v1981_v44, %v1859_v18 }
 0x4e6   : > { %v5669_v24 = vpop.f32.mrb[24].mxu1 }
 0x4e7   : > { %v2108_v10 = vmul.f32 %v5669_v24, %v5172_v0  ;;  %v2067_v30 = vpop.f32.mrb[25].mxu1 }
 0x4e8   : > { %v2106_v12 = vmul.f32 %v5172_v0, %v2067_v30  ;;  %v5670_v35 = vpop.f32.mrb[26].mxu1 }
 0x4e9   : > { %v2116_v57 = vadd.f32 %v2108_v10, %v1986_v32  ;;  %v2109_v23 = vmul.f32 %v5670_v35, %v5172_v0  ;;  %v2070_v40 = vpop.f32.mrb[27].mxu1 }
 0x4ea   : > { %v2114_v45 = vadd.f32 %v2106_v12, %v1984_v22  ;;  %v2107_v47 = vmul.f32 %v5172_v0, %v2070_v40  ;;  %v2240_v22 = vmul.f32 %v5182_v3, %v8236_v11  ;;  %v5202_v40 = vld [vmem:[%s8733_s13 + $0x6] ss:$0 sm:$0xff] }
 0x4eb   : > { %v2246_v2 = vadd.f32 %v2238_v27, %v2116_v57  ;;  %v2117_v21 = vadd.f32 %v2109_v23, %v1987_v37  ;;  %v5192_v23 = vld [vmem:[%s8733_s13 + $0x5] ss:$0 sm:$0xff] }
 0x4ec   : > { %v2244_v18 = vadd.f32 %v2236_v33, %v2114_v45  ;;  %v2115_v49 = vadd.f32 %v2107_v47, %v1985_v38  ;;  %v2243_v33 = vmul.f32 %v8238_v13, %v5182_v3  ;;  %v2499_v3 = vmul.f32 %v8254_v34, %v5202_v40 }
 0x4ed   : > { %v2247_v53 = vadd.f32 %v2239_v8, %v2117_v21 }
 0x4ee   : > { %v2245_v59 = vadd.f32 %v2237_v51, %v2115_v49  ;;  %v5673_v56 = vpop.f32.mrb[28].mxu1 }
 0x4ef   : > { %v2112_v44 = vmul.f32 %v5673_v56, %v5172_v0  ;;  %v2083_v32 = vpop.f32.mrb[29].mxu1 }
 0x4f0   : > { %v2110_v24 = vmul.f32 %v5172_v0, %v2083_v32  ;;  %v5674_v10 = vpop.f32.mrb[30].mxu1 }
 0x4f1   : > { %v2120_v37 = vadd.f32 %v2112_v44, %v1990_v52  ;;  %v2113_v27 = vmul.f32 %v5674_v10, %v5172_v0  ;;  %v2086_v63 = vpop.f32.mrb[31].mxu1  ;;  %v2498_v52 = vmul.f32 %v8250_v25, %v5202_v40 }
 0x4f2   : > { %v2118_v30 = vadd.f32 %v2110_v24, %v1988_v43  ;;  %v2111_v38 = vmul.f32 %v5172_v0, %v2086_v63  ;;  %v2496_v43 = vmul.f32 %v5202_v40, %v8252_v29  ;;  %v2497_v24 = vmul.f32 %v5202_v40, %v8257_v39 }
 0x4f3   : > { %v2250_v12 = vadd.f32 %v2242_v61, %v2120_v37  ;;  %v2121_v1 = vadd.f32 %v2113_v27, %v1991_v58  ;;  %v2502_v29 = vmul.f32 %v8259_v46, %v5202_v40  ;;  %v2501_v46 = vmul.f32 %v5202_v40, %v8265_v62 }
 0x4f4   : > { %v2248_v35 = vadd.f32 %v2240_v22, %v2118_v30  ;;  %v2119_v57 = vadd.f32 %v2111_v38, %v1989_v60 }
 0x4f5   : > { %v2251_v45 = vadd.f32 %v2243_v33, %v2121_v1  ;;  %v2503_v33 = vmul.f32 %v8263_v54, %v5202_v40 }
 0x4f6   : > { %v2249_v47 = vadd.f32 %v2241_v9, %v2119_v57  ;;  %v5701_v21 = vpop.f32.mrb[32].mxu1 }
 0x4f7   : > { %v2368_v11 = vmul.f32 %v5701_v21, %v5192_v23  ;;  %v2327_v8 = vpop.f32.mrb[33].mxu1  ;;  %v5212_v21 = vld [vmem:[%s8733_s13 + $0x7] ss:$0 sm:$0xff] }
 0x4f8   : > { %v2366_v49 = vmul.f32 %v5192_v23, %v2327_v8  ;;  %v5702_v0 = vpop.f32.mrb[34].mxu1 }
 0x4f9   : > { %v2376_v58 = vadd.f32 %v2368_v11, %v2246_v2  ;;  %v2369_v51 = vmul.f32 %v5702_v0, %v5192_v23  ;;  %v2330_v13 = vpop.f32.mrb[35].mxu1  ;;  %v5222_v11 = vld [vmem:[%s8733_s13 + $0x8] ss:$0 sm:$0xff] }
 0x4fa   : > { %v2374_v56 = vadd.f32 %v2366_v49, %v2244_v18  ;;  %v2367_v60 = vmul.f32 %v5192_v23, %v2330_v13  ;;  %v2500_v18 = vmul.f32 %v5202_v40, %v8261_v50 }
 0x4fb   : > { %v2506_v44 = vadd.f32 %v2498_v52, %v2376_v58  ;;  %v2377_v20 = vadd.f32 %v2369_v51, %v2247_v53 }
 0x4fc   : > { %v2504_v61 = vadd.f32 %v2496_v43, %v2374_v56  ;;  %v2375_v32 = vadd.f32 %v2367_v60, %v2245_v59  ;;  %v2759_v56 = vmul.f32 %v8272_v31, %v5222_v11  ;;  %v5224_v60 = vld [vmem:[#allocation11] ss:$0 sm:$0xff]  ;;  %v2763_v31 = vmul.f32 %v8280_v36, %v5222_v11 }
 0x4fd   : > { %v2507_v22 = vadd.f32 %v2499_v3, %v2377_v20 }
 0x4fe   : > { %v2505_v25 = vadd.f32 %v2497_v24, %v2375_v32  ;;  %v5705_v10 = vpop.f32.mrb[36].mxu1 }
 0x4ff   : > { %v2372_v37 = vmul.f32 %v5705_v10, %v5192_v23  ;;  %v2343_v2 = vpop.f32.mrb[37].mxu1 }
 0x500   : > { %v2370_v27 = vmul.f32 %v5192_v23, %v2343_v2  ;;  %v5706_v63 = vpop.f32.mrb[38].mxu1 }
 0x501   : > { %v2380_v53 = vadd.f32 %v2372_v37, %v2250_v12  ;;  %v2373_v30 = vmul.f32 %v5706_v63, %v5192_v23  ;;  %v2346_v34 = vpop.f32.mrb[39].mxu1  ;;  %v2758_v12 = vmul.f32 %v8268_v26, %v5222_v11  ;;  %v2757_v26 = vmul.f32 %v5222_v11, %v8274_v19 }
 0x502   : > { %v2378_v38 = vadd.f32 %v2370_v27, %v2248_v35  ;;  %v2371_v59 = vmul.f32 %v5192_v23, %v2346_v34  ;;  %v2756_v23 = vmul.f32 %v5222_v11, %v8270_v28 }
 0x503   : > { %v2510_v1 = vadd.f32 %v2502_v29, %v2380_v53  ;;  %v2381_v39 = vadd.f32 %v2373_v30, %v2251_v45  ;;  %v2760_v29 = vmul.f32 %v5222_v11, %v8278_v48  ;;  %v2761_v53 = vmul.f32 %v5222_v11, %v8282_v41 }
 0x504   : > { %v2508_v57 = vadd.f32 %v2500_v18, %v2378_v38  ;;  %v2379_v9 = vadd.f32 %v2371_v59, %v2249_v47  ;;  %v5223_v47 = vld [vmem:[%s8734_s14] ss:$0 sm:$0xff]  ;;  %s5367_s14 = sshll.u32 %s7636_s26, 7  ;;  %s7434_s26 = smov [#allocation38]  }
 0x505   : > { %v2511_v52 = vadd.f32 %v2503_v33, %v2381_v39 }
 0x506   : > { %v2509_v8 = vadd.f32 %v2501_v46, %v2379_v9  ;;  %v5733_v50 = vpop.f32.mrb[40].mxu1 }
 0x507   : > { %v2628_v49 = vmul.f32 %v5733_v50, %v5212_v21  ;;  %v2587_v43 = vpop.f32.mrb[41].mxu1 }
 0x508   : > { %v2626_v35 = vmul.f32 %v5212_v21, %v2587_v43  ;;  %v5734_v45 = vpop.f32.mrb[42].mxu1 }
 0x509   : > { %v2636_v0 = vadd.f32 %v2628_v49, %v2506_v44  ;;  %v2629_v54 = vmul.f32 %v5734_v45, %v5212_v21  ;;  %v2590_v58 = vpop.f32.mrb[43].mxu1  ;;  %v2762_v44 = vmul.f32 %v8276_v42, %v5222_v11 }
 0x50a   : > { %v2634_v51 = vadd.f32 %v2626_v35, %v2504_v61  ;;  %v2627_v13 = vmul.f32 %v5212_v21, %v2590_v58 }
 0x50b   : > { %v2766_v62 = vadd.f32 %v2758_v12, %v2636_v0  ;;  %v2637_v40 = vadd.f32 %v2629_v54, %v2507_v22 }
 0x50c   : > { %v2764_v20 = vadd.f32 %v2756_v23, %v2634_v51  ;;  %v2635_v3 = vadd.f32 %v2627_v13, %v2505_v25 }
 0x50d   : > { %v2781_v32 = vmul.f32 %v5223_v47, %v2766_v62  ;;  %v2767_v24 = vadd.f32 %v2759_v56, %v2637_v40 }
 0x50e   : > { %v2779_v10 = vmul.f32 %v5223_v47, %v2764_v20  ;;  %v2765_v28 = vadd.f32 %v2757_v26, %v2635_v3  ;;  %v5737_v37 = vpop.f32.mrb[44].mxu1 }
 0x50f   : > { %v8313_v61 = vadd.f32 %v5224_v60, %v2781_v32  ;;  %v2782_v2 = vmul.f32 %v5223_v47, %v2767_v24  ;;  %v2632_v22 = vmul.f32 %v5737_v37, %v5212_v21  ;;  %v2603_v27 = vpop.f32.mrb[45].mxu1 }
 0x510   : > { %v8316_v18 = vadd.f32 %v5224_v60, %v2779_v10  ;;  %v2780_v25 = vmul.f32 %v5223_v47, %v2765_v28  ;;  %v2630_v19 = vmul.f32 %v5212_v21, %v2603_v27  ;;  %v5738_v63 = vpop.f32.mrb[46].mxu1 }
 0x511   : > { %v5227_v30 = vmul.f32 -1.442695, %v8313_v61  ;;  %v8320_v34 = vadd.f32 %v5224_v60, %v2782_v2  ;;  %v2640_v42 = vadd.f32 %v2632_v22, %v2510_v1  ;;  %v2633_v48 = vmul.f32 %v5738_v63, %v5212_v21  ;;  %v2606_v38 = vpop.f32.mrb[47].mxu1 }
 0x512   : > { %v5225_v59 = vmul.f32 -1.442695, %v8316_v18  ;;  %v2795_v39 = vadd.f32 %v5224_v60, %v2780_v25  ;;  %v2638_v33 = vadd.f32 %v2630_v19, %v2508_v57  ;;  %v2631_v9 = vmul.f32 %v5212_v21, %v2606_v38 }
 0x513   : > { %6517 = vpow2.f32 %v5227_v30  ;;  %v5228_v36 = vmul.f32 -1.442695, %v8320_v34  ;;  %v2770_v46 = vadd.f32 %v2762_v44, %v2640_v42  ;;  %v2641_v50 = vadd.f32 %v2633_v48, %v2511_v52 }
 0x514   : > { %6519 = vpow2.f32 %v5225_v59  ;;  %v5226_v49 = vmul.f32 -1.442695, %v2795_v39  ;;  %v2768_v41 = vadd.f32 %v2760_v29, %v2638_v33  ;;  %v2639_v11 = vadd.f32 %v2631_v9, %v2509_v8 }
 0x515   : > { %6521 = vpow2.f32 %v5228_v36  ;;  %v2785_v12 = vmul.f32 %v5223_v47, %v2770_v46  ;;  %v2771_v43 = vadd.f32 %v2763_v31, %v2641_v50 }
 0x516   : > { %6523 = vpow2.f32 %v5226_v49  ;;  %v2783_v1 = vmul.f32 %v5223_v47, %v2768_v41  ;;  %v2769_v35 = vadd.f32 %v2761_v53, %v2639_v11 }
 0x517   : > { %v2800_v23 = vadd.f32 %v5224_v60, %v2785_v12  ;;  %v2786_v45 = vmul.f32 %v5223_v47, %v2771_v43 }
 0x518   : > { %v2798_v0 = vadd.f32 %v5224_v60, %v2783_v1  ;;  %v2784_v57 = vmul.f32 %v5223_v47, %v2769_v35 }
 0x519   : > { %v5231_v21 = vmul.f32 -1.442695, %v2800_v23  ;;  %v2801_v54 = vadd.f32 %v5224_v60, %v2786_v45 }
 0x51a   : > { %v5229_v58 = vmul.f32 -1.442695, %v2798_v0  ;;  %v2799_v51 = vadd.f32 %v5224_v60, %v2784_v57  ;;  %v6412_v57 = vld [vmem:[#allocation16] sm:$0xff]  }
 0x51b   : > { %6525 = vpow2.f32 %v5231_v21  ;;  %v5232_v52 = vmul.f32 -1.442695, %v2801_v54  ;;  %5776 = vmatpush3.bf16.msra.mxu0 %v6412_v57  ;;  %v6414_v21 = vld [vmem:[#allocation16 + $0x10] sm:$0xff]  }
 0x51c   : > { %6527 = vpow2.f32 %v5229_v58  ;;  %v5230_v13 = vmul.f32 -1.442695, %v2799_v51  ;;  %5777 = vmatprep.subr.bf16.mxu0 %v7432_v55  ;;  %v6416_v58 = vld [vmem:[#allocation16 + $0x20] sm:$0xff]  }
 0x51d   : > { %v6518_v62 = vpop.eup %6517  ;;  %6529 = vpow2.f32 %v5232_v52  ;;  %v6418_v52 = vld [vmem:[#allocation16 + $0x30] sm:$0xff]  }
 0x51e   : > { %v6520_v8 = vpop.eup %6519  ;;  %v2828_v40 = vadd.f32 1.0, %v6518_v62  ;;  %6531 = vpow2.f32 %v5230_v13  ;;  %v6419_v13 = vld [vmem:[#allocation16 + $0x38] sm:$0xff]  }
 0x51f   : > { %v6522_v56 = vpop.eup %6521  ;;  %v2826_v20 = vadd.f32 1.0, %v6520_v8  ;;  %v2890_v62 = vld [vmem:[#allocation14] sm:$0x1] }
 0x520   : > { %v6524_v3 = vpop.eup %6523  ;;  %v2829_v26 = vadd.f32 1.0, %v6522_v56 }
 0x521   : > { %6533 = vrcp.f32 %v2826_v20  ;;  %v2827_v32 = vadd.f32 1.0, %v6524_v3 }
 0x522   : > { %6535 = vrcp.f32 %v2828_v40 }
 0x523   : > { %6537 = vrcp.f32 %v2827_v32 }
 0x524   : > { %6539 = vrcp.f32 %v2829_v26 }
 0x525   : > { %v6526_v47 = vpop.eup %6525 }
 0x526   : > { %v6528_v60 = vpop.eup %6527  ;;  %v2832_v24 = vadd.f32 1.0, %v6526_v47 }
 0x527   : > { %v6530_v10 = vpop.eup %6529  ;;  %v2830_v28 = vadd.f32 1.0, %v6528_v60 }
 0x528   : > { %v6532_v37 = vpop.eup %6531  ;;  %v2833_v44 = vadd.f32 1.0, %v6530_v10 }
 0x529   : > { %6541 = vrcp.f32 %v2830_v28  ;;  %v2831_v29 = vadd.f32 1.0, %v6532_v37  ;;  %v6420_v28 = vld [vmem:[#allocation19] sm:$0xff]   ;;  %v6421_v37 = vld [vmem:[#allocation19 + $0x8] sm:$0xff]  }
 0x52a   : > { %6543 = vrcp.f32 %v2832_v24  ;;  %5795 = vmatprep.subr.bf16.mxu1 %v6420_v28 }
 0x52b   : > { %v6534_v2 = vpop.eup %6533  ;;  %6545 = vrcp.f32 %v2831_v29  ;;  %v6423_v29 = vld [vmem:[#allocation19 + $0x18] sm:$0xff]  }
 0x52c   : > { %v6536_v22 = vpop.eup %6535  ;;  %6547 = vrcp.f32 %v2833_v44  ;;  %v8325_v31 = vmul.f32 %v6534_v2, %v8316_v18  ;;  %v6422_v44 = vld [vmem:[#allocation19 + $0x10] sm:$0xff]   ;;  %v6424_v2 = vld [vmem:[#allocation19 + $0x20] sm:$0xff]  }
 0x52d   : > { %v6538_v27 = vpop.eup %6537  ;;  %v8330_v63 = vmul.f32 %v6536_v22, %v8313_v61  ;;  %v6425_v22 = vld [vmem:[#allocation19 + $0x28] sm:$0xff]  }
 0x52e   : > { %v8327_v25 = vmul.f32 %v6538_v27, %v2795_v39  ;;  %v6540_v19 = vpop.eup %6539  ;;  %v6426_v27 = vld [vmem:[#allocation19 + $0x30] sm:$0xff]  }
 0x52f   : > { %v8335_v30 = vmul.f32 %v6540_v19, %v8320_v34  ;;  %v6427_v19 = vld [vmem:[#allocation19 + $0x38] sm:$0xff]  }
 0x530   : > { %v2858_v53 = vadd.f32 %v8327_v25, %v8325_v31 }
 0x532   : > { %v2859_v42 = vadd.f32 %v2858_v53, %v8330_v63  ;;  %v6428_v53 = vld [vmem:[#allocation23] sm:$0xff]  }
 0x533   : > { %v6542_v48 = vpop.eup %6541 }
 0x534   : > { %v6544_v38 = vpop.eup %6543  ;;  %v8338_v59 = vmul.f32 %v6542_v48, %v2798_v0  ;;  %v2860_v18 = vadd.f32 %v2859_v42, %v8335_v30  ;;  %v6429_v42 = vld [vmem:[#allocation23 + $0x8] sm:$0xff]   ;;  %v6430_v48 = vld [vmem:[#allocation23 + $0x10] sm:$0xff]  }
 0x535   : > { %v6546_v39 = vpop.eup %6545  ;;  %v8344_v36 = vmul.f32 %v6544_v38, %v2800_v23  ;;  %v6413_v23 = vld [vmem:[#allocation16 + $0x8] sm:$0xff]   ;;  %v6431_v38 = vld [vmem:[#allocation23 + $0x18] sm:$0xff]  }
 0x536   : > { %v2861_v33 = vadd.f32 %v2860_v18, %v8338_v59  ;;  %v8342_v9 = vmul.f32 %v6546_v39, %v2799_v51  ;;  %v6548_v61 = vpop.eup %6547  ;;  %5778 = vmatpush3.bf16.msra.mxu0 %v6413_v23  ;;  %v6417_v51 = vld [vmem:[#allocation16 + $0x28] sm:$0xff]   ;;  %v3003_v39 = vld [vmem:[#allocation17] sm:$0x1] }
 0x537   : > { %v8347_v34 = vmul.f32 %v6548_v61, %v2801_v54  ;;  %5779 = vmatprep.subr.bf16.mxu0 %v7432_v55  ;;  %v6415_v54 = vld [vmem:[#allocation16 + $0x18] sm:$0xff]   ;;  %v6432_v18 = vld [vmem:[#allocation23 + $0x20] sm:$0xff]  }
 0x538   : > { %v2862_v46 = vadd.f32 %v2861_v33, %v8342_v9 }
 0x53a   : > { %v2863_v50 = vadd.f32 %v2862_v46, %v8344_v36  ;;  %5780 = vmatpush3.bf16.msra.mxu0 %v6414_v21 }
 0x53b   : > { %5781 = vmatprep.subr.bf16.mxu0 %v7432_v55 }
 0x53c   : > { %v2864_v49 = vadd.f32 %v2863_v50, %v8347_v34 }
 0x53e   : > { %v2865_v41 = vrot.slane %v2864_v49, 4  ;;  %5782 = vmatpush3.bf16.msra.mxu0 %v6415_v54 }
 0x53f   : > { %5783 = vmatprep.subr.bf16.mxu0 %v7432_v55 }
 0x540   : > { %v2866_v11 = vadd.f32 %v2865_v41, %v2864_v49 }
 0x542   : > { %v2867_v12 = vrot.slane %v2866_v11, 2  ;;  %5784 = vmatpush3.bf16.msra.mxu0 %v6416_v58 }
 0x543   : > { %5785 = vmatprep.subr.bf16.mxu0 %v7432_v55 }
 0x544   : > { %v2868_v43 = vadd.f32 %v2867_v12, %v2866_v11 }
 0x546   : > { %v2869_v1 = vrot.slane %v2868_v43, 1  ;;  %5786 = vmatpush3.bf16.msra.mxu0 %v6417_v51 }
 0x547   : > { %5787 = vmatprep.subr.bf16.mxu0 %v7432_v55 }
 0x548   : > { %v2870_v35 = vadd.f32 %v2869_v1, %v2868_v43  ;;  %v3098_v43 = vlaneseq }
 0x54a   : > { %v2872_v45 = vmul.f32 0.015625, %v2870_v35  ;;  %5788 = vmatpush3.bf16.msra.mxu0 %v6418_v52  ;;  %v3099_v1 = vshrl.u32 %v3098_v43, 7 }
 0x54b   : > { %5789 = vmatprep.subr.bf16.mxu0 %v7432_v55 }
 0x54c   : > { %v2889_v0 = vpack.c.bf16 %v2872_v45, %v2872_v45  ;;  %v8359_v35 = vsub.s32 0, %v3099_v1  ;;  %v5270_v1 = vld [vmem:[#allocation26] ss:$0 sm:$0xff] }
 0x54e   : > { %5772 = vmatmul.mubr.bf16.vlgmr.msra.gmra.mrb[48].mxu1 %v2889_v0  ;;  %5790 = vmatpush3.bf16.msra.mxu0 %v6419_v13 }
 0x54f   : > { %5796 = vmatpush3.bf16.msra.mxu1 %v6420_v28  ;;  %5819 = vmatprep.subr.bf16.mxu0 %v6428_v53 }
 0x550   : > { %5797 = vmatprep.subr.bf16.mxu1 %v6421_v37 }
 0x553   : > { %5798 = vmatpush3.bf16.msra.mxu1 %v6421_v37 }
 0x554   : > { %5799 = vmatprep.subr.bf16.mxu1 %v6422_v44 }
 0x557   : > { %5800 = vmatpush3.bf16.msra.mxu1 %v6422_v44 }
 0x558   : > { %5801 = vmatprep.subr.bf16.mxu1 %v6423_v29 }
 0x55b   : > { %5802 = vmatpush3.bf16.msra.mxu1 %v6423_v29 }
 0x55c   : > { %5803 = vmatprep.subr.bf16.mxu1 %v6424_v2 }
 0x55f   : > { %5804 = vmatpush3.bf16.msra.mxu1 %v6424_v2 }
 0x560   : > { %5805 = vmatprep.subr.bf16.mxu1 %v6425_v22 }
 0x563   : > { %5806 = vmatpush3.bf16.msra.mxu1 %v6425_v22 }
 0x564   : > { %5807 = vmatprep.subr.bf16.mxu1 %v6426_v27 }
 0x567   : > { %5808 = vmatpush3.bf16.msra.mxu1 %v6426_v27 }
 0x568   : > { %5809 = vmatprep.subr.bf16.mxu1 %v6427_v19 }
 0x56b   : > { %5810 = vmatpush3.bf16.msra.mxu1 %v6427_v19 }
 0x56c   : > { %5843 = vmatprep.subr.bf16.mxu1 %v7432_v55 }
 0x621   : > { %v2973_v8 = vpop.f32.mrb[48].mxu1 }
 0x622   : > { %v2974_v40 = vadd.f32 %v2973_v8, %v2890_v62  ;;  %v5773_v56 = vpop.f32.mrb[49].mxu1 }
 0x623   : > { %v2976_v20 = vpop.f32.mrb[50].mxu1 }
 0x624   : > { %v5241_v3 = vmul.f32 -1.442695, %v2974_v40  ;;  %v5774_v26 = vpop.f32.mrb[51].mxu1 }
 0x626   : > { %6549 = vpow2.f32 %v5241_v3 }
 0x630   : > { %v6550_v32 = vpop.eup %6549 }
 0x631   : > { %v2982_v47 = vadd.f32 1.0, %v6550_v32 }
 0x633   : > { %6551 = vrcp.f32 %v2982_v47 }
 0x63d   : > { %v6552_v60 = vpop.eup %6551 }
 0x63e   : > { %v2985_v24 = vmul.f32 %v6552_v60, %v2974_v40 }
 0x640   : > { %v3002_v10 = vpack.c.bf16 %v2985_v24, %v2985_v24 }
 0x642   : > { %5792 = vmatmul.mubr.bf16.vlgmr.msra.gmra.mrb[32].mxu0 %v3002_v10 }
 0x643   : > { %5820 = vmatpush3.bf16.msra.mxu0 %v6428_v53 }
 0x644   : > { %5821 = vmatprep.subr.bf16.mxu0 %v6429_v42 }
 0x647   : > { %5822 = vmatpush3.bf16.msra.mxu0 %v6429_v42 }
 0x648   : > { %5823 = vmatprep.subr.bf16.mxu0 %v6430_v48 }
 0x64b   : > { %5824 = vmatpush3.bf16.msra.mxu0 %v6430_v48 }
 0x64c   : > { %5825 = vmatprep.subr.bf16.mxu0 %v6431_v38 }
 0x64f   : > { %5826 = vmatpush3.bf16.msra.mxu0 %v6431_v38 }
 0x650   : > { %5827 = vmatprep.subr.bf16.mxu0 %v6432_v18 }
 0x653   : > { %5828 = vmatpush3.bf16.msra.mxu0 %v6432_v18 }
 0x715   : > { %v3086_v33 = vpop.f32.mrb[32].mxu0 }
 0x716   : > { %v3087_v61 = vadd.f32 %v3086_v33, %v3003_v39  ;;  %v5793_v46 = vpop.f32.mrb[33].mxu0 }
 0x717   : > { %v3089_v50 = vpop.f32.mrb[34].mxu0 }
 0x718   : > { %v5250_v49 = vmul.f32 -1.442695, %v3087_v61  ;;  %v5794_v41 = vpop.f32.mrb[35].mxu0 }
 0x71a   : > { %6553 = vpow2.f32 %v5250_v49 }
 0x724   : > { %v6554_v11 = vpop.eup %6553 }
 0x725   : > { %v3095_v12 = vadd.f32 1.0, %v6554_v11 }
 0x727   : > { %6555 = vrcp.f32 %v3095_v12  ;;  %v5269_v12 = vld [vmem:[#allocation25] ss:$0 sm:$0xff] }
 0x731   : > { %v6556_v45 = vpop.eup %6555 }
 0x732   : > { %v3101_v0 = vrot.slane %v6556_v45, %v8359_v35 }
 0x734   : > { %v3102_v57 = vmul.f32 %v3101_v0, %v8325_v31  ;;  %v3103_v23 = vmul.f32 %v3101_v0, %v8327_v25  ;;  %v3104_v21 = vmul.f32 %v3101_v0, %v8330_v63  ;;  %v3105_v54 = vmul.f32 %v3101_v0, %v8335_v30  ;;  %v6433_v25 = vld [vmem:[#allocation23 + $0x28] sm:$0xff]   ;;  %v6434_v63 = vld [vmem:[#allocation23 + $0x30] sm:$0xff]   ;;  %v6435_v30 = vld [vmem:[#allocation23 + $0x38] sm:$0xff]  }
 0x735   : > { %v3106_v58 = vmul.f32 %v3101_v0, %v8338_v59  ;;  %v3107_v51 = vmul.f32 %v3101_v0, %v8342_v9  ;;  %v3108_v8 = vmul.f32 %v3101_v0, %v8344_v36  ;;  %v3109_v31 = vmul.f32 %v3101_v0, %v8347_v34  ;;  %5829 = vmatprep.subr.bf16.mxu0 %v6433_v25  ;;  %v5259_v59 = vld [vmem:[#allocation20] ss:$0 sm:$0xff]  ;;  %v5260_v36 = vld [vmem:[#allocation22] ss:$0 sm:$0xff] }
 0x736   : > { %v3126_v52 = vpack.c.bf16 %v3103_v23, %v3102_v57  ;;  %v3127_v13 = vpack.c.bf16 %v3105_v54, %v3104_v21  ;;  %5830 = vmatpush3.bf16.msra.mxu0 %v6433_v25 }
 0x737   : > { %v3128_v62 = vpack.c.bf16 %v3107_v51, %v3106_v58  ;;  %v3129_v40 = vpack.c.bf16 %v3109_v31, %v3108_v8  ;;  %5831 = vmatprep.subr.bf16.mxu0 %v6434_v63 }
 0x738   : > { %5811 = vmatprep.mubr.bf16.mxu1 %v3126_v52 }
 0x739   : > { %5812 = vmatmul.mubr.bf16.vlgmr.msra.gmra.mrb[52].mxu1 %v3127_v13 }
 0x73a   : > { %5815 = vmatprep.mubr.bf16.mxu1 %v3128_v62  ;;  %5832 = vmatpush3.bf16.msra.mxu0 %v6434_v63 }
 0x73b   : > { %5833 = vmatprep.subr.bf16.mxu0 %v6435_v30 }
 0x73e   : > { %5834 = vmatpush3.bf16.msra.mxu0 %v6435_v30 }
 0x73f   : > { %5855 = vmatprep.subr.bf16.mxu0 %v7432_v55 }
 0x741   : > { %5816 = vmatmul.mubr.bf16.gmra.mrb[56].mxu1 %v3129_v40 }
 0x742   : > { %5851 = vmatprep.mubr.msk.bf16.mxu1 %vm7433_vm1, %v7432_v55 }
 0x80c   : > { %v5813_v9 = vpop.f32.mrb[52].mxu1 }
 0x80d   : > { %v3252_v34 = vmul.f32 %v5813_v9, %v5259_v59  ;;  %v3212_v56 = vpop.f32.mrb[53].mxu1 }
 0x80e   : > { %v3250_v20 = vmul.f32 %v5259_v59, %v3212_v56  ;;  %v5814_v3 = vpop.f32.mrb[54].mxu1 }
 0x80f   : > { %v3267_v26 = vadd.f32 %v5260_v36, %v3252_v34  ;;  %v3253_v32 = vmul.f32 %v5814_v3, %v5259_v59  ;;  %v3215_v47 = vpop.f32.mrb[55].mxu1 }
 0x810   : > { %v3265_v60 = vadd.f32 %v5260_v36, %v3250_v20  ;;  %v3251_v24 = vmul.f32 %v5259_v59, %v3215_v47 }
 0x811   : > { %v3268_v10 = vadd.f32 %v5260_v36, %v3253_v32  ;;  %v3275_v37 = vadd.f32 %v3267_v26, %v8087_v7 }
 0x812   : > { %v3266_v28 = vadd.f32 %v5260_v36, %v3251_v24  ;;  %v3273_v29 = vadd.f32 %v3265_v60, %v8080_v4 }
 0x813   : > { %v3276_v44 = vadd.f32 %v3268_v10, %v8082_v5 }
 0x814   : > { %v3274_v2 = vadd.f32 %v3266_v28, %v8084_v6  ;;  %v5817_v22 = vpop.f32.mrb[56].mxu1 }
 0x815   : > { %v3298_v27 = vpack.c.bf16 %v3276_v44, %v3275_v37  ;;  %v3256_v19 = vmul.f32 %v5817_v22, %v5259_v59  ;;  %v3228_v53 = vpop.f32.mrb[57].mxu1 }
 0x816   : > { %v3254_v42 = vmul.f32 %v5259_v59, %v3228_v53  ;;  %v5818_v48 = vpop.f32.mrb[58].mxu1  ;;  %v3297_v38 = vpack.c.bf16 %v3274_v2, %v3273_v29 }
 0x817   : > { %v3271_v18 = vadd.f32 %v5260_v36, %v3256_v19  ;;  %v3257_v39 = vmul.f32 %v5818_v48, %v5259_v59  ;;  %v3231_v33 = vpop.f32.mrb[59].mxu1 }
 0x818   : > { %v3269_v61 = vadd.f32 %v5260_v36, %v3254_v42  ;;  %v3255_v46 = vmul.f32 %v5259_v59, %v3231_v33  ;;  %5835 = vmatprep.mubr.bf16.mxu0 %v3297_v38 }
 0x819   : > { %v3272_v7 = vadd.f32 %v5260_v36, %v3257_v39  ;;  %5836 = vmatmul.mubr.bf16.vlgmr.msra.gmra.mrb[36].mxu0 %v3298_v27  ;;  %v3279_v4 = vadd.f32 %v3271_v18, %v8112_v17 }
 0x81a   : > { %v3270_v5 = vadd.f32 %v5260_v36, %v3255_v46  ;;  %v3277_v50 = vadd.f32 %v3269_v61, %v8103_v14 }
 0x81b   : > { %v3280_v6 = vadd.f32 %v3272_v7, %v8105_v15 }
 0x81c   : > { %v3278_v49 = vadd.f32 %v3270_v5, %v8107_v16 }
 0x81d   : > { %v3300_v41 = vpack.c.bf16 %v3280_v6, %v3279_v4 }
 0x81e   : > { %v3299_v11 = vpack.c.bf16 %v3278_v49, %v3277_v50 }
 0x820   : > { %5839 = vmatprep.mubr.bf16.mxu0 %v3299_v11 }
 0x821   : > { %5840 = vmatmul.mubr.bf16.gmra.mrb[40].mxu0 %v3300_v41 }
 0x822   : > { %5863 = vmatprep.mubr.msk.bf16.mxu0 %vm7433_vm1, %v7432_v55 }
 0x8ec   : > { %v5837_v43 = vpop.f32.mrb[36].mxu0 }
 0x8ed   : > { %v3423_v45 = vmul.f32 %v5837_v43, %v5269_v12  ;;  %v3383_v0 = vpop.f32.mrb[37].mxu0 }
 0x8ee   : > { %v3421_v57 = vmul.f32 %v5269_v12, %v3383_v0  ;;  %v5838_v17 = vpop.f32.mrb[38].mxu0 }
 0x8ef   : > { %v8383_v23 = vadd.f32 %v5270_v1, %v3423_v45  ;;  %v3424_v15 = vmul.f32 %v5838_v17, %v5269_v12  ;;  %v3386_v14 = vpop.f32.mrb[39].mxu0 }
 0x8f0   : > { %v3436_v21 = vadd.f32 %v5270_v1, %v3421_v57  ;;  %v3422_v16 = vmul.f32 %v5269_v12, %v3386_v14  ;;  %v6437_v14 = vld [vmem:[#allocation28 + $0x8] sm:$0xff]  }
 0x8f1   : > { %v5273_v54 = vmul.f32 -1.442695, %v8383_v23  ;;  %v3439_v58 = vadd.f32 %v5270_v1, %v3424_v15  ;;  %v6436_v15 = vld [vmem:[#allocation28] sm:$0xff]  }
 0x8f2   : > { %v5271_v51 = vmul.f32 -1.442695, %v3436_v21  ;;  %v3437_v52 = vadd.f32 %v5270_v1, %v3422_v16  ;;  %v6439_v16 = vld [vmem:[#allocation28 + $0x18] sm:$0xff]  }
 0x8f3   : > { %6557 = vpow2.f32 %v5273_v54  ;;  %v5274_v13 = vmul.f32 -1.442695, %v3439_v58  ;;  %v6440_v54 = vld [vmem:[#allocation28 + $0x20] sm:$0xff]  }
 0x8f4   : > { %6559 = vpow2.f32 %v5271_v51  ;;  %v5272_v62 = vmul.f32 -1.442695, %v3437_v52  ;;  %v5841_v8 = vpop.f32.mrb[40].mxu0  ;;  %v6442_v51 = vld [vmem:[#allocation28 + $0x30] sm:$0xff]  }
 0x8f5   : > { %6561 = vpow2.f32 %v5274_v13  ;;  %v3427_v31 = vmul.f32 %v5841_v8, %v5269_v12  ;;  %v3399_v40 = vpop.f32.mrb[41].mxu0  ;;  %v6444_v13 = vld [vmem:[#allocation28 + $0x40] sm:$0xff]   ;;  %v6446_v8 = vld [vmem:[%s8735_s12 + $0x8] sm:$0xff]  }
 0x8f6   : > { %6563 = vpow2.f32 %v5272_v62  ;;  %v3425_v25 = vmul.f32 %v5269_v12, %v3399_v40  ;;  %v5842_v63 = vpop.f32.mrb[42].mxu0  ;;  %v6445_v62 = vld [vmem:[%s8735_s12] sm:$0xff]   ;;  %v6448_v40 = vld [vmem:[%s8735_s12 + $0x18] sm:$0xff]  }
 0x8f7   : > { %v3442_v30 = vadd.f32 %v5270_v1, %v3427_v31  ;;  %v3428_v59 = vmul.f32 %v5842_v63, %v5269_v12  ;;  %v3402_v9 = vpop.f32.mrb[43].mxu0  ;;  %v6447_v31 = vld [vmem:[%s8735_s12 + $0x10] sm:$0xff]   ;;  %v6450_v63 = vld [vmem:[%s8735_s12 + $0x28] sm:$0xff]  }
 0x8f8   : > { %v3440_v36 = vadd.f32 %v5270_v1, %v3425_v25  ;;  %v3426_v34 = vmul.f32 %v5269_v12, %v3402_v9  ;;  %v6449_v25 = vld [vmem:[%s8735_s12 + $0x20] sm:$0xff]  }
 0x8f9   : > { %v5277_v56 = vmul.f32 -1.442695, %v3442_v30  ;;  %v3443_v20 = vadd.f32 %v5270_v1, %v3428_v59  ;;  %v6452_v59 = vld [vmem:[%s8735_s12 + $0x38] sm:$0xff]   ;;  %v5281_v9 = vld [vmem:[%s8736_s28] ss:$0 sm:$0xff] }
 0x8fa   : > { %v5275_v3 = vmul.f32 -1.442695, %v3440_v36  ;;  %v3441_v26 = vadd.f32 %v5270_v1, %v3426_v34 }
 0x8fb   : > { %6565 = vpow2.f32 %v5277_v56  ;;  %v5278_v32 = vmul.f32 -1.442695, %v3443_v20 }
 0x8fc   : > { %6567 = vpow2.f32 %v5275_v3  ;;  %v5276_v47 = vmul.f32 -1.442695, %v3441_v26 }
 0x8fd   : > { %v6558_v60 = vpop.eup %6557  ;;  %6569 = vpow2.f32 %v5278_v32 }
 0x8fe   : > { %v6560_v24 = vpop.eup %6559  ;;  %v3470_v10 = vadd.f32 1.0, %v6558_v60  ;;  %6571 = vpow2.f32 %v5276_v47 }
 0x8ff   : > { %v6562_v28 = vpop.eup %6561  ;;  %v3468_v37 = vadd.f32 1.0, %v6560_v24 }
 0x900   : > { %v6564_v44 = vpop.eup %6563  ;;  %6573 = vrcp.f32 %v3470_v10  ;;  %v3471_v29 = vadd.f32 1.0, %v6562_v28 }
 0x901   : > { %6575 = vrcp.f32 %v3468_v37  ;;  %v3469_v2 = vadd.f32 1.0, %v6564_v44 }
 0x902   : > { %6577 = vrcp.f32 %v3471_v29 }
 0x903   : > { %6579 = vrcp.f32 %v3469_v2  ;;  %v5289_v2 = vld [vmem:[%s8736_s28 + $0x2] ss:$0 sm:$0xff] }
 0x905   : > { %v6566_v22 = vpop.eup %6565 }
 0x906   : > { %v6568_v27 = vpop.eup %6567  ;;  %v3474_v19 = vadd.f32 1.0, %v6566_v22  ;;  %v5293_v22 = vld [vmem:[%s8736_s28 + $0x3] ss:$0 sm:$0xff] }
 0x907   : > { %v6570_v53 = vpop.eup %6569  ;;  %v3472_v42 = vadd.f32 1.0, %v6568_v27 }
 0x908   : > { %v6572_v48 = vpop.eup %6571  ;;  %6581 = vrcp.f32 %v3474_v19  ;;  %v3475_v38 = vadd.f32 1.0, %v6570_v53 }
 0x909   : > { %6583 = vrcp.f32 %v3472_v42  ;;  %v3473_v18 = vadd.f32 1.0, %v6572_v48 }
 0x90a   : > { %v6574_v39 = vpop.eup %6573  ;;  %6585 = vrcp.f32 %v3475_v38 }
 0x90b   : > { %v6576_v33 = vpop.eup %6575  ;;  %6587 = vrcp.f32 %v3473_v18  ;;  %v3494_v7 = vmul.f32 %v6574_v39, %v8383_v23 }
 0x90c   : > { %v6578_v61 = vpop.eup %6577  ;;  %v3492_v4 = vmul.f32 %v6576_v33, %v3436_v21  ;;  %v6438_v21 = vld [vmem:[#allocation28 + $0x10] sm:$0xff]  }
 0x90d   : > { %v6580_v46 = vpop.eup %6579  ;;  %v3495_v5 = vmul.f32 %v6578_v61, %v3439_v58  ;;  %v6441_v58 = vld [vmem:[#allocation28 + $0x28] sm:$0xff]  }
 0x90e   : > { %v3493_v6 = vmul.f32 %v6580_v46, %v3437_v52  ;;  %v6443_v52 = vld [vmem:[#allocation28 + $0x38] sm:$0xff]  }
 0x90f   : > { %v8387_v50 = vpack.c.bf16 %v3495_v5, %v3494_v7 }
 0x910   : > { %v8389_v49 = vpack.c.bf16 %v3493_v6, %v3492_v4 }
 0x912   : > { %v6582_v41 = vpop.eup %6581  ;;  %5844 = vmatpush3.bf16.msra.mxu1 %v8389_v49  ;;  %5856 = vmatpush3.bf16.msra.mxu0 %v8389_v49 }
 0x913   : > { %v6584_v11 = vpop.eup %6583  ;;  %5845 = vmatprep.subr.bf16.mxu1 %v7432_v55  ;;  %5857 = vmatprep.subr.bf16.mxu0 %v7432_v55  ;;  %v3498_v1 = vmul.f32 %v6582_v41, %v3442_v30  ;;  %v6451_v30 = vld [vmem:[%s8735_s12 + $0x30] sm:$0xff]   ;;  %v5301_v41 = vld [vmem:[%s8736_s28 + $0x5] ss:$0 sm:$0xff] }
 0x914   : > { %v6586_v12 = vpop.eup %6585  ;;  %v3496_v0 = vmul.f32 %v6584_v11, %v3440_v36  ;;  %v5285_v36 = vld [vmem:[%s8736_s28 + $0x1] ss:$0 sm:$0xff] }
 0x915   : > { %v6588_v43 = vpop.eup %6587  ;;  %v3499_v45 = vmul.f32 %v6586_v12, %v3443_v20 }
 0x916   : > { %v3497_v57 = vmul.f32 %v6588_v43, %v3441_v26  ;;  %5846 = vmatpush3.bf16.msra.mxu1 %v8387_v50  ;;  %5858 = vmatpush3.bf16.msra.mxu0 %v8387_v50 }
 0x917   : > { %v8397_v17 = vpack.c.bf16 %v3499_v45, %v3498_v1  ;;  %5847 = vmatprep.subr.bf16.mxu1 %v7432_v55  ;;  %5859 = vmatprep.subr.bf16.mxu0 %v7432_v55 }
 0x918   : > { %v8401_v23 = vpack.c.bf16 %v3497_v57, %v3496_v0 }
 0x91a   : > { %5848 = vmatpush3.bf16.msra.mxu1 %v8401_v23  ;;  %5860 = vmatpush3.bf16.msra.mxu0 %v8401_v23 }
 0x91b   : > { %5849 = vmatprep.subr.bf16.mxu1 %v7432_v55  ;;  %5861 = vmatprep.subr.bf16.mxu0 %v7432_v55 }
 0x91e   : > { %5850 = vmatpush3.bf16.msra.mxu1 %v8397_v17  ;;  %5862 = vmatpush3.bf16.msra.mxu0 %v8397_v17 }
 0x91f   : > { %5867 = vmatprep.subr.bf16.mxu1 %v7432_v55  ;;  %5879 = vmatprep.subr.bf16.mxu0 %v7432_v55 }
 0x921   : > { %5852 = vmatmul.mubr.msk.bf16.vlgmr.msra.gmra.mrb[60].mxu1 %vm1639_vm0, %v6436_v15  ;;  %5864 = vmatmul.mubr.msk.bf16.vlgmr.msra.gmra.mrb[44].mxu0 %vm1639_vm0, %v6437_v14 }
 0x922   : > { %5868 = vmatpush3.bf16.msra.mxu1 %v8389_v49  ;;  %5880 = vmatpush3.bf16.msra.mxu0 %v8389_v49 }
 0x923   : > { %5869 = vmatprep.subr.bf16.mxu1 %v7432_v55  ;;  %5881 = vmatprep.subr.bf16.mxu0 %v7432_v55 }
 0x924   : > { %5875 = vmatprep.mubr.msk.bf16.mxu1 %vm7433_vm1, %v7432_v55  ;;  %5887 = vmatprep.mubr.msk.bf16.mxu0 %vm7433_vm1, %v7432_v55 }
 0x926   : > { %5870 = vmatpush3.bf16.msra.mxu1 %v8387_v50  ;;  %5882 = vmatpush3.bf16.msra.mxu0 %v8387_v50 }
 0x927   : > { %5871 = vmatprep.subr.bf16.mxu1 %v7432_v55  ;;  %5883 = vmatprep.subr.bf16.mxu0 %v7432_v55 }
 0x92a   : > { %5872 = vmatpush3.bf16.msra.mxu1 %v8401_v23  ;;  %5884 = vmatpush3.bf16.msra.mxu0 %v8401_v23 }
 0x92b   : > { %5873 = vmatprep.subr.bf16.mxu1 %v7432_v55  ;;  %5885 = vmatprep.subr.bf16.mxu0 %v7432_v55 }
 0x92e   : > { %5874 = vmatpush3.bf16.msra.mxu1 %v8397_v17  ;;  %5886 = vmatpush3.bf16.msra.mxu0 %v8397_v17 }
 0x92f   : > { %5891 = vmatprep.subr.bf16.mxu1 %v7432_v55  ;;  %5903 = vmatprep.subr.bf16.mxu0 %v7432_v55 }
 0x931   : > { %5876 = vmatmul.mubr.msk.bf16.vlgmr.msra.gmra.mrb[64].mxu1 %vm1639_vm0, %v6438_v21  ;;  %5888 = vmatmul.mubr.msk.bf16.vlgmr.msra.gmra.mrb[48].mxu0 %vm1639_vm0, %v6439_v16 }
 0x932   : > { %5892 = vmatpush3.bf16.msra.mxu1 %v8389_v49  ;;  %5904 = vmatpush3.bf16.msra.mxu0 %v8389_v49 }
 0x933   : > { %5893 = vmatprep.subr.bf16.mxu1 %v7432_v55  ;;  %5905 = vmatprep.subr.bf16.mxu0 %v7432_v55 }
 0x934   : > { %5899 = vmatprep.mubr.msk.bf16.mxu1 %vm7433_vm1, %v7432_v55  ;;  %5911 = vmatprep.mubr.msk.bf16.mxu0 %vm7433_vm1, %v7432_v55 }
 0x936   : > { %5894 = vmatpush3.bf16.msra.mxu1 %v8387_v50  ;;  %5906 = vmatpush3.bf16.msra.mxu0 %v8387_v50 }
 0x937   : > { %5895 = vmatprep.subr.bf16.mxu1 %v7432_v55  ;;  %5907 = vmatprep.subr.bf16.mxu0 %v7432_v55 }
 0x93a   : > { %5896 = vmatpush3.bf16.msra.mxu1 %v8401_v23  ;;  %5908 = vmatpush3.bf16.msra.mxu0 %v8401_v23 }
 0x93b   : > { %5897 = vmatprep.subr.bf16.mxu1 %v7432_v55  ;;  %5909 = vmatprep.subr.bf16.mxu0 %v7432_v55 }
 0x93e   : > { %5898 = vmatpush3.bf16.msra.mxu1 %v8397_v17  ;;  %5910 = vmatpush3.bf16.msra.mxu0 %v8397_v17 }
 0x93f   : > { %5915 = vmatprep.subr.bf16.mxu1 %v7432_v55  ;;  %5927 = vmatprep.subr.bf16.mxu0 %v7432_v55 }
 0x941   : > { %5900 = vmatmul.mubr.msk.bf16.vlgmr.msra.gmra.mrb[68].mxu1 %vm1639_vm0, %v6440_v54  ;;  %5912 = vmatmul.mubr.msk.bf16.vlgmr.msra.gmra.mrb[52].mxu0 %vm1639_vm0, %v6441_v58 }
 0x942   : > { %5916 = vmatpush3.bf16.msra.mxu1 %v8389_v49  ;;  %5928 = vmatpush3.bf16.msra.mxu0 %v8389_v49 }
 0x943   : > { %5917 = vmatprep.subr.bf16.mxu1 %v7432_v55  ;;  %5929 = vmatprep.subr.bf16.mxu0 %v7432_v55 }
 0x944   : > { %5923 = vmatprep.mubr.msk.bf16.mxu1 %vm7433_vm1, %v7432_v55  ;;  %5935 = vmatprep.mubr.msk.bf16.mxu0 %vm7433_vm1, %v7432_v55 }
 0x946   : > { %5918 = vmatpush3.bf16.msra.mxu1 %v8387_v50  ;;  %5930 = vmatpush3.bf16.msra.mxu0 %v8387_v50 }
 0x947   : > { %5919 = vmatprep.subr.bf16.mxu1 %v7432_v55  ;;  %5931 = vmatprep.subr.bf16.mxu0 %v7432_v55 }
 0x94a   : > { %5920 = vmatpush3.bf16.msra.mxu1 %v8401_v23  ;;  %5932 = vmatpush3.bf16.msra.mxu0 %v8401_v23 }
 0x94b   : > { %5921 = vmatprep.subr.bf16.mxu1 %v7432_v55  ;;  %5933 = vmatprep.subr.bf16.mxu0 %v7432_v55 }
 0x94e   : > { %5922 = vmatpush3.bf16.msra.mxu1 %v8397_v17  ;;  %5934 = vmatpush3.bf16.msra.mxu0 %v8397_v17 }
 0x94f   : > { %5939 = vmatprep.subr.bf16.mxu1 %v7432_v55  ;;  %5951 = vmatprep.subr.bf16.mxu0 %v7432_v55 }
 0x951   : > { %5924 = vmatmul.mubr.msk.bf16.vlgmr.msra.gmra.mrb[72].mxu1 %vm1639_vm0, %v6442_v51  ;;  %5936 = vmatmul.mubr.msk.bf16.vlgmr.msra.gmra.mrb[56].mxu0 %vm1639_vm0, %v6443_v52  ;;  %v5305_v52 = vld [vmem:[%s8736_s28 + $0x6] ss:$0 sm:$0xff] }
 0x952   : > { %5940 = vmatpush3.bf16.msra.mxu1 %v8389_v49  ;;  %5947 = vmatprep.mubr.msk.bf16.mxu1 %vm7433_vm1, %v7432_v55  ;;  %v5297_v49 = vld [vmem:[%s8736_s28 + $0x4] ss:$0 sm:$0xff] }
 0x953   : > { %5941 = vmatprep.subr.bf16.mxu1 %v7432_v55  ;;  %5967 = vmatprep.mubr.msk.bf16.mxu0 %vm7433_vm1, %v7432_v55 }
 0x954   : > { %5952 = vmatpush3.bf16.msra.mxu0 %v6445_v62 }
 0x955   : > { %5953 = vmatprep.subr.bf16.mxu0 %v7432_v55 }
 0x956   : > { %5942 = vmatpush3.bf16.msra.mxu1 %v8387_v50 }
 0x957   : > { %5943 = vmatprep.subr.bf16.mxu1 %v7432_v55 }
 0x958   : > { %5954 = vmatpush3.bf16.msra.mxu0 %v6446_v8 }
 0x959   : > { %5955 = vmatprep.subr.bf16.mxu0 %v7432_v55 }
 0x95a   : > { %5944 = vmatpush3.bf16.msra.mxu1 %v8401_v23 }
 0x95b   : > { %5945 = vmatprep.subr.bf16.mxu1 %v7432_v55 }
 0x95c   : > { %5956 = vmatpush3.bf16.msra.mxu0 %v6447_v31 }
 0x95d   : > { %5957 = vmatprep.subr.bf16.mxu0 %v7432_v55 }
 0x95e   : > { %5946 = vmatpush3.bf16.msra.mxu1 %v8397_v17 }
 0x95f   : > { %5971 = vmatprep.subr.bf16.mxu1 %v7432_v55 }
 0x960   : > { %5958 = vmatpush3.bf16.msra.mxu0 %v6448_v40 }
 0x961   : > { %5948 = vmatmul.mubr.msk.bf16.vlgmr.msra.gmra.mrb[76].mxu1 %vm1639_vm0, %v6444_v13  ;;  %5959 = vmatprep.subr.bf16.mxu0 %v7432_v55  ;;  %v5309_v13 = vld [vmem:[%s8736_s28 + $0x7] ss:$0 sm:$0xff] }
 0x962   : > { %5987 = vmatprep.mubr.msk.bf16.mxu1 %vm7433_vm1, %v7432_v55 }
 0x964   : > { %5960 = vmatpush3.bf16.msra.mxu0 %v6449_v25 }
 0x965   : > { %5961 = vmatprep.subr.bf16.mxu0 %v7432_v55 }
 0x968   : > { %5962 = vmatpush3.bf16.msra.mxu0 %v6450_v63 }
 0x969   : > { %5963 = vmatprep.subr.bf16.mxu0 %v7432_v55 }
 0x96c   : > { %5964 = vmatpush3.bf16.msra.mxu0 %v6451_v30 }
 0x96d   : > { %5965 = vmatprep.subr.bf16.mxu0 %v7432_v55 }
 0x970   : > { %5966 = vmatpush3.bf16.msra.mxu0 %v6452_v59 }
 0x971   : > { %5991 = vmatprep.subr.bf16.mxu0 %v7432_v55 }
 0x9f4   : > { %v3548_v34 = vpop.f32.mrb[60].mxu1  ;;  %v3609_v56 = vpop.f32.mrb[44].mxu0 }
 0x9f5   : > { %v3562_v20 = vmul.f32 %v5281_v9, %v3548_v34  ;;  %v3624_v3 = vmul.f32 %v5285_v36, %v3609_v56  ;;  %v5853_v26 = vpop.f32.mrb[61].mxu1  ;;  %v5865_v32 = vpop.f32.mrb[45].mxu0 }
 0x9f6   : > { %v3551_v47 = vpop.f32.mrb[62].mxu1  ;;  %v3612_v60 = vpop.f32.mrb[46].mxu0 }
 0x9f7   : > { %v3626_v24 = vadd.f32 %v3624_v3, %v3562_v20  ;;  %v3563_v10 = vmul.f32 %v5281_v9, %v3551_v47  ;;  %v3625_v28 = vmul.f32 %v5285_v36, %v3612_v60  ;;  %v5854_v37 = vpop.f32.mrb[63].mxu1  ;;  %v5866_v44 = vpop.f32.mrb[47].mxu0  ;;  %v5313_v47 = vld [vmem:[%s8736_s28 + $0x8] ss:$0 sm:$0xff] }
 0x9f9   : > { %v3627_v29 = vadd.f32 %v3625_v28, %v3563_v10  ;;  %v5314_v28 = vld [vmem:[#allocation29] ss:$0 sm:$0xff] }
 0xa04   : > { %v3673_v27 = vpop.f32.mrb[64].mxu1  ;;  %v3737_v19 = vpop.f32.mrb[48].mxu0 }
 0xa05   : > { %v3688_v53 = vmul.f32 %v5289_v2, %v3673_v27  ;;  %v5877_v42 = vpop.f32.mrb[65].mxu1  ;;  %v3752_v48 = vmul.f32 %v5293_v22, %v3737_v19  ;;  %v5889_v38 = vpop.f32.mrb[49].mxu0 }
 0xa06   : > { %v3676_v18 = vpop.f32.mrb[66].mxu1  ;;  %v3740_v39 = vpop.f32.mrb[50].mxu0 }
 0xa07   : > { %v3690_v33 = vadd.f32 %v3688_v53, %v3626_v24  ;;  %v3689_v61 = vmul.f32 %v5289_v2, %v3676_v18  ;;  %v5878_v46 = vpop.f32.mrb[67].mxu1  ;;  %v3753_v7 = vmul.f32 %v5293_v22, %v3740_v39  ;;  %v5890_v5 = vpop.f32.mrb[51].mxu0  ;;  %v5315_v22 = vld [vmem:[#allocation31] ss:$0 sm:$0xff] }
 0xa09   : > { %v3691_v4 = vadd.f32 %v3689_v61, %v3627_v29  ;;  %v3754_v6 = vadd.f32 %v3752_v48, %v3690_v33 }
 0xa0b   : > { %v3755_v50 = vadd.f32 %v3753_v7, %v3691_v4 }
 0xa14   : > { %v3801_v11 = vpop.f32.mrb[68].mxu1  ;;  %v3865_v12 = vpop.f32.mrb[52].mxu0 }
 0xa15   : > { %v3816_v43 = vmul.f32 %v5297_v49, %v3801_v11  ;;  %v5901_v1 = vpop.f32.mrb[69].mxu1  ;;  %v3880_v45 = vmul.f32 %v5301_v41, %v3865_v12  ;;  %v5913_v0 = vpop.f32.mrb[53].mxu0 }
 0xa16   : > { %v3804_v57 = vpop.f32.mrb[70].mxu1  ;;  %v3868_v17 = vpop.f32.mrb[54].mxu0 }
 0xa17   : > { %v3818_v23 = vadd.f32 %v3816_v43, %v3754_v6  ;;  %v3817_v15 = vmul.f32 %v5297_v49, %v3804_v57  ;;  %v5902_v14 = vpop.f32.mrb[71].mxu1  ;;  %v3881_v21 = vmul.f32 %v5301_v41, %v3868_v17  ;;  %v5914_v16 = vpop.f32.mrb[55].mxu0  ;;  %v6453_v57 = vld [vmem:[#allocation32] sm:$0xff]   ;;  %v6454_v17 = vld [vmem:[#allocation32 + $0x8] sm:$0xff]  }
 0xa18   : > { %5972 = vmatpush3.bf16.msra.mxu1 %v6453_v57  ;;  %v6457_v14 = vld [vmem:[#allocation32 + $0x20] sm:$0xff]   ;;  %v6459_v16 = vld [vmem:[#allocation32 + $0x30] sm:$0xff]   ;;  %v6478_v57 = vld [vmem:[#allocation37 + $0x8] sm:$0xff]  }
 0xa19   : > { %v3819_v54 = vadd.f32 %v3817_v15, %v3755_v50  ;;  %v3882_v58 = vadd.f32 %v3880_v45, %v3818_v23  ;;  %5973 = vmatprep.subr.bf16.mxu1 %v7432_v55  ;;  %v6455_v23 = vld [vmem:[#allocation32 + $0x10] sm:$0xff]   ;;  %v6456_v15 = vld [vmem:[#allocation32 + $0x18] sm:$0xff]  }
 0xa1b   : > { %v3883_v51 = vadd.f32 %v3881_v21, %v3819_v54  ;;  %v6458_v21 = vld [vmem:[#allocation32 + $0x28] sm:$0xff]   ;;  %v6460_v54 = vld [vmem:[#allocation32 + $0x38] sm:$0xff]  }
 0xa1c   : > { %5974 = vmatpush3.bf16.msra.mxu1 %v6454_v17  ;;  %v6479_v17 = vld [vmem:[#allocation37 + $0x10] sm:$0xff]  }
 0xa1d   : > { %5975 = vmatprep.subr.bf16.mxu1 %v7432_v55 }
 0xa20   : > { %5976 = vmatpush3.bf16.msra.mxu1 %v6455_v23  ;;  %v6480_v23 = vld [vmem:[#allocation37 + $0x18] sm:$0xff]  }
 0xa21   : > { %5977 = vmatprep.subr.bf16.mxu1 %v7432_v55 }
 0xa24   : > { %v3929_v62 = vpop.f32.mrb[72].mxu1  ;;  %v3993_v8 = vpop.f32.mrb[56].mxu0  ;;  %5978 = vmatpush3.bf16.msra.mxu1 %v6456_v15  ;;  %v6481_v15 = vld [vmem:[#allocation37 + $0x20] sm:$0xff]  }
 0xa25   : > { %v3944_v31 = vmul.f32 %v5305_v52, %v3929_v62  ;;  %v5925_v40 = vpop.f32.mrb[73].mxu1  ;;  %v4008_v25 = vmul.f32 %v5309_v13, %v3993_v8  ;;  %v5937_v63 = vpop.f32.mrb[57].mxu0  ;;  %5979 = vmatprep.subr.bf16.mxu1 %v7432_v55 }
 0xa26   : > { %v3932_v30 = vpop.f32.mrb[74].mxu1  ;;  %v3996_v59 = vpop.f32.mrb[58].mxu0 }
 0xa27   : > { %v3946_v9 = vadd.f32 %v3944_v31, %v3882_v58  ;;  %v3945_v36 = vmul.f32 %v5305_v52, %v3932_v30  ;;  %v5926_v34 = vpop.f32.mrb[75].mxu1  ;;  %v4009_v56 = vmul.f32 %v5309_v13, %v3996_v59  ;;  %v5938_v20 = vpop.f32.mrb[59].mxu0  ;;  %v4134_v58 = vld [vmem:[%s8737_s19] sm:$0x1]  ;;  %s1357_s19 = scalar_lea.vmem [#allocation38], %s5111_s3 }
 0xa28   : > { %5980 = vmatpush3.bf16.msra.mxu1 %v6457_v14  ;;  %v6463_v34 = vld [vmem:[#allocation34 + $0x10] sm:$0xff]   ;;  %v6465_v20 = vld [vmem:[#allocation34 + $0x20] sm:$0xff]   ;;  %v6482_v14 = vld [vmem:[#allocation37 + $0x28] sm:$0xff]  }
 0xa29   : > { %v3947_v3 = vadd.f32 %v3945_v36, %v3883_v51  ;;  %v4010_v26 = vadd.f32 %v4008_v25, %v3946_v9  ;;  %5981 = vmatprep.subr.bf16.mxu1 %v7432_v55  ;;  %v6461_v9 = vld [vmem:[#allocation34] sm:$0xff]   ;;  %v6462_v36 = vld [vmem:[#allocation34 + $0x8] sm:$0xff]  }
 0xa2b   : > { %v4011_v32 = vadd.f32 %v4009_v56, %v3947_v3  ;;  %v6464_v56 = vld [vmem:[#allocation34 + $0x18] sm:$0xff]   ;;  %v6466_v3 = vld [vmem:[#allocation34 + $0x28] sm:$0xff]  }
 0xa2c   : > { %5982 = vmatpush3.bf16.msra.mxu1 %v6458_v21  ;;  %v6483_v21 = vld [vmem:[#allocation37 + $0x30] sm:$0xff]  }
 0xa2d   : > { %5983 = vmatprep.subr.bf16.mxu1 %v7432_v55 }
 0xa30   : > { %5984 = vmatpush3.bf16.msra.mxu1 %v6459_v16  ;;  %v6484_v16 = vld [vmem:[#allocation37 + $0x38] sm:$0xff]  }
 0xa31   : > { %5985 = vmatprep.subr.bf16.mxu1 %v7432_v55 }
 0xa34   : > { %v4057_v60 = vpop.f32.mrb[76].mxu1  ;;  %5986 = vmatpush3.bf16.msra.mxu1 %v6460_v54  ;;  %v5354_v54 = vld [vmem:[%s8741_s10] ss:$0 sm:$0xff] }
 0xa35   : > { %v4072_v24 = vmul.f32 %v5313_v47, %v4057_v60  ;;  %v5949_v10 = vpop.f32.mrb[77].mxu1  ;;  %6011 = vmatprep.subr.bf16.mxu1 %v7432_v55  ;;  %v6470_v60 = vld [vmem:[#allocation35 + $0x8] sm:$0xff]  }
 0xa36   : > { %v4060_v37 = vpop.f32.mrb[78].mxu1  ;;  %v6472_v10 = vld [vmem:[#allocation35 + $0x18] sm:$0xff]  }
 0xa37   : > { %v4074_v44 = vadd.f32 %v4072_v24, %v4010_v26  ;;  %v4073_v29 = vmul.f32 %v5313_v47, %v4060_v37  ;;  %v5950_v2 = vpop.f32.mrb[79].mxu1  ;;  %v6467_v26 = vld [vmem:[#allocation34 + $0x30] sm:$0xff]   ;;  %v6469_v47 = vld [vmem:[#allocation35] sm:$0xff]   ;;  %v6474_v37 = vld [vmem:[#allocation35 + $0x28] sm:$0xff]  }
 0xa38   : > { %v6471_v24 = vld [vmem:[#allocation35 + $0x10] sm:$0xff]  }
 0xa39   : > { %v4083_v27 = vmul.f32 %v5314_v28, %v4074_v44  ;;  %v4075_v19 = vadd.f32 %v4073_v29, %v4011_v32  ;;  %v6468_v32 = vld [vmem:[#allocation34 + $0x38] sm:$0xff]   ;;  %v4247_v44 = vld [vmem:[%s8738_s25] sm:$0x1]  ;;  %s4746_s25 = sshll.u32 %s1357_s19, 4  ;;  %s8577_s25 = int_to_ptr.vmem [resolvable:$true] %s4746_s25 }
 0xa3a   : > { %s7261_s10 = scalar_lea.vmem %s8577_s25, 128 }
 0xa3b   : > { %v4092_v53 = vadd.f32 %v5315_v22, %v4083_v27  ;;  %v4084_v42 = vmul.f32 %v5314_v28, %v4075_v19  ;;  %v6473_v28 = vld [vmem:[#allocation35 + $0x20] sm:$0xff]   ;;  %p7262_p5 = scmp.ne.s32.totalorder %s8577_s25, %s7261_s10 }
 0xa3d   : > { %v5316_v48 = vmul.f32 -1.442695, %v4092_v53  ;;  %v4093_v38 = vadd.f32 %v5315_v22, %v4084_v42  ;;  %p7263_p1 = pnand %p7262_p5, %p8745_p7 }
 0xa3f   : > { %6589 = vpow2.f32 %v5316_v48  ;;  %v5317_v18 = vmul.f32 -1.442695, %v4093_v38  ;;  %p7264_p9 = pneg %p7263_p1 }
 0xa41   : > { %6591 = vpow2.f32 %v5317_v18 }
 0xa49   : > { %v6590_v39 = vpop.eup %6589 }
 0xa4a   : > { %v4100_v33 = vadd.f32 1.0, %v6590_v39 }
 0xa4b   : > { %v6592_v61 = vpop.eup %6591 }
 0xa4c   : > { %6593 = vrcp.f32 %v4100_v33  ;;  %v4101_v46 = vadd.f32 1.0, %v6592_v61 }
 0xa4e   : > { %6595 = vrcp.f32 %v4101_v46  ;;  %v6475_v46 = vld [vmem:[#allocation35 + $0x30] sm:$0xff]  }
 0xa56   : > { %v6594_v7 = vpop.eup %6593 }
 0xa57   : > { %v8519_v4 = vmul.f32 %v6594_v7, %v4092_v53  ;;  %v6476_v7 = vld [vmem:[#allocation35 + $0x38] sm:$0xff]  }
 0xa58   : > { %v6596_v5 = vpop.eup %6595 }
 0xa59   : > { %v8521_v6 = vmul.f32 %v6596_v5, %v4093_v38  ;;  %v5344_v5 = vld [vmem:[%s8739_s11] ss:$0 sm:$0xff]  ;;  %s8575_s11 = scalar_lea.hbm %s8744_s1, %s5367_s14 }
 0xa5b   : > { %v4108_v50 = vadd.f32 %v8521_v6, %v8519_v4 }
 0xa5d   : > { %v4109_v49 = vrot.slane %v4108_v50, 4 }
 0xa5f   : > { %v4110_v41 = vadd.f32 %v4109_v49, %v4108_v50 }
 0xa61   : > { %v4111_v11 = vrot.slane %v4110_v41, 2 }
 0xa63   : > { %v4112_v12 = vadd.f32 %v4111_v11, %v4110_v41  ;;  %v5345_v11 = vld [vmem:[%s8740_s2] ss:$0 sm:$0xff]  ;;  %s4733_s2 = scalar_lea.sflag [#allocation4], %s8014_s17 }
 0xa65   : > { %v4113_v43 = vrot.slane %v4112_v12, 1 }
 0xa67   : > { %v4114_v1 = vadd.f32 %v4113_v43, %v4112_v12 }
 0xa69   : > { %v4116_v45 = vmul.f32 0.0625, %v4114_v1 }
 0xa6b   : > { %v4133_v0 = vpack.c.bf16 %v4116_v45, %v4116_v45 }
 0xa6d   : > { %5968 = vmatmul.mubr.bf16.vlgmr.msra.gmra.mrb[60].mxu0 %v4133_v0  ;;  %v6477_v0 = vld [vmem:[#allocation37] sm:$0xff]  }
 0xa6e   : > { %6007 = vmatprep.mubr.msk.bf16.mxu0 %vm7433_vm1, %v7432_v55  ;;  %5992 = vmatpush3.bf16.msra.mxu0 %v6461_v9 }
 0xa6f   : > { %5993 = vmatprep.subr.bf16.mxu0 %v7432_v55 }
 0xa72   : > { %5994 = vmatpush3.bf16.msra.mxu0 %v6462_v36 }
 0xa73   : > { %5995 = vmatprep.subr.bf16.mxu0 %v7432_v55 }
 0xa76   : > { %5996 = vmatpush3.bf16.msra.mxu0 %v6463_v34 }
 0xa77   : > { %5997 = vmatprep.subr.bf16.mxu0 %v7432_v55 }
 0xa7a   : > { %5998 = vmatpush3.bf16.msra.mxu0 %v6464_v56 }
 0xa7b   : > { %5999 = vmatprep.subr.bf16.mxu0 %v7432_v55 }
 0xa7e   : > { %6000 = vmatpush3.bf16.msra.mxu0 %v6465_v20 }
 0xa7f   : > { %6001 = vmatprep.subr.bf16.mxu0 %v7432_v55 }
 0xa82   : > { %6002 = vmatpush3.bf16.msra.mxu0 %v6466_v3 }
 0xa83   : > { %6003 = vmatprep.subr.bf16.mxu0 %v7432_v55 }
 0xa86   : > { %6004 = vmatpush3.bf16.msra.mxu0 %v6467_v26 }
 0xa87   : > { %6005 = vmatprep.subr.bf16.mxu0 %v7432_v55 }
 0xa8a   : > { %6006 = vmatpush3.bf16.msra.mxu0 %v6468_v32 }
 0xa8b   : > { %6031 = vmatprep.subr.bf16.mxu0 %v7432_v55 }
 0xb40   : > { %v4217_v51 = vpop.f32.mrb[60].mxu0 }
 0xb41   : > { %v4218_v52 = vadd.f32 %v4217_v51, %v4134_v58  ;;  %v5969_v13 = vpop.f32.mrb[61].mxu0  ;;  %v5355_v51 = vld [vmem:[%s8742_s29] ss:$0 sm:$0xff]  ;;  %s7265_s29 = sshll.u32 %s7434_s26, 4  ;;  %s7266_s29 = int_to_ptr.vmem [resolvable:$false] %s7265_s29 }
 0xb42   : > { %v4220_v62 = vpop.f32.mrb[62].mxu0  ;;  %p7268_p13 = scmp.lt.s32.totalorder %s8577_s25, %s7266_s29 }
 0xb43   : > { %v5326_v8 = vmul.f32 -1.442695, %v4218_v52  ;;  %v5970_v31 = vpop.f32.mrb[63].mxu0 }
 0xb45   : > { %6597 = vpow2.f32 %v5326_v8 }
 0xb4f   : > { %v6598_v40 = vpop.eup %6597 }
 0xb50   : > { %v4226_v25 = vadd.f32 1.0, %v6598_v40 }
 0xb52   : > { %6599 = vrcp.f32 %v4226_v25 }
 0xb5c   : > { %v6600_v63 = vpop.eup %6599 }
 0xb5d   : > { %v4229_v30 = vmul.f32 %v6600_v63, %v4218_v52 }
 0xb5f   : > { %v4246_v59 = vpack.c.bf16 %v4229_v30, %v4229_v30 }
 0xb61   : > { %5988 = vmatmul.mubr.bf16.vlgmr.msra.gmra.mrb[80].mxu1 %v4246_v59 }
 0xb62   : > { %6027 = vmatprep.mubr.msk.bf16.mxu1 %vm7433_vm1, %v7432_v55  ;;  %6012 = vmatpush3.bf16.msra.mxu1 %v6469_v47 }
 0xb63   : > { %6013 = vmatprep.subr.bf16.mxu1 %v7432_v55 }
 0xb66   : > { %6014 = vmatpush3.bf16.msra.mxu1 %v6470_v60 }
 0xb67   : > { %6015 = vmatprep.subr.bf16.mxu1 %v7432_v55 }
 0xb6a   : > { %6016 = vmatpush3.bf16.msra.mxu1 %v6471_v24 }
 0xb6b   : > { %6017 = vmatprep.subr.bf16.mxu1 %v7432_v55 }
 0xb6e   : > { %6018 = vmatpush3.bf16.msra.mxu1 %v6472_v10 }
 0xb6f   : > { %6019 = vmatprep.subr.bf16.mxu1 %v7432_v55 }
 0xb72   : > { %6020 = vmatpush3.bf16.msra.mxu1 %v6473_v28 }
 0xb73   : > { %6021 = vmatprep.subr.bf16.mxu1 %v7432_v55 }
 0xb76   : > { %6022 = vmatpush3.bf16.msra.mxu1 %v6474_v37 }
 0xb77   : > { %6023 = vmatprep.subr.bf16.mxu1 %v7432_v55 }
 0xb7a   : > { %6024 = vmatpush3.bf16.msra.mxu1 %v6475_v46 }
 0xb7b   : > { %6025 = vmatprep.subr.bf16.mxu1 %v7432_v55 }
 0xb7e   : > { %6026 = vmatpush3.bf16.msra.mxu1 %v6476_v7 }
 0xc34   : > { %v4330_v29 = vpop.f32.mrb[80].mxu1 }
 0xc35   : > { %v4331_v2 = vadd.f32 %v4330_v29, %v4247_v44  ;;  %v5989_v22 = vpop.f32.mrb[81].mxu1  ;;  %v4635_v29 = vld [vmem:[%s8743_s9] sm:$0x1]  ;;  %s7267_s9 = scalar_lea.vmem %s7266_s29, 256 }
 0xc36   : > { %v4333_v27 = vpop.f32.mrb[82].mxu1  ;;  %p7269_p6 = scmp.lt.s32.totalorder %s7267_s9, %s7261_s10 }
 0xc37   : > { %v5335_v19 = vmul.f32 -1.442695, %v4331_v2  ;;  %v5990_v53 = vpop.f32.mrb[83].mxu1 }
 0xc38   : > { %p7270_p0 = por %p7269_p6, %p7268_p13 }
 0xc39   : > { %6601 = vpow2.f32 %v5335_v19 }
 0xc3a   : > { %p7271_p2 = pnand %p7270_p0, %p7264_p9 }
 0xc43   : > { %v6602_v42 = vpop.eup %6601 }
 0xc44   : > { %v4339_v48 = vadd.f32 1.0, %v6602_v42 }
 0xc46   : > { %6603 = vrcp.f32 %v4339_v48 }
 0xc50   : > { %v6604_v38 = vpop.eup %6603 }
 0xc51   : > { %v4345_v18 = vrot.slane %v6604_v38, %v8359_v35 }
 0xc53   : > { %v4346_v39 = vmul.f32 %v4345_v18, %v8519_v4  ;;  %v4347_v33 = vmul.f32 %v4345_v18, %v8521_v6 }
 0xc55   : > { %v4364_v61 = vpack.c.bf16 %v4347_v33, %v4346_v39 }
 0xc57   : > { %6008 = vmatmul.mubr.bf16.vlgmr.msra.gmra.mrb[64].mxu0 %v4364_v61 }
 0xc58   : > { %6047 = vmatprep.mubr.msk.bf16.mxu0 %vm7433_vm1, %v7432_v55  ;;  %6032 = vmatpush3.bf16.msra.mxu0 %v6477_v0 }
 0xc59   : > { %6033 = vmatprep.subr.bf16.mxu0 %v7432_v55 }
 0xc5c   : > { %6034 = vmatpush3.bf16.msra.mxu0 %v6478_v57 }
 0xc5d   : > { %6035 = vmatprep.subr.bf16.mxu0 %v7432_v55 }
 0xc60   : > { %6036 = vmatpush3.bf16.msra.mxu0 %v6479_v17 }
 0xc61   : > { %6037 = vmatprep.subr.bf16.mxu0 %v7432_v55 }
 0xc64   : > { %6038 = vmatpush3.bf16.msra.mxu0 %v6480_v23 }
 0xc65   : > { %6039 = vmatprep.subr.bf16.mxu0 %v7432_v55 }
 0xc68   : > { %6040 = vmatpush3.bf16.msra.mxu0 %v6481_v15 }
 0xc69   : > { %6041 = vmatprep.subr.bf16.mxu0 %v7432_v55 }
 0xc6c   : > { %6042 = vmatpush3.bf16.msra.mxu0 %v6482_v14 }
 0xc6d   : > { %6043 = vmatprep.subr.bf16.mxu0 %v7432_v55 }
 0xc70   : > { %6044 = vmatpush3.bf16.msra.mxu0 %v6483_v21 }
 0xc71   : > { %6045 = vmatprep.subr.bf16.mxu0 %v7432_v55 }
 0xc74   : > { %6046 = vmatpush3.bf16.msra.mxu0 %v6484_v16 }
 0xd2a   : > { %v4447_v50 = vpop.f32.mrb[64].mxu0 }
 0xd2b   : > { %v4461_v49 = vmul.f32 %v5344_v5, %v4447_v50  ;;  %v6009_v41 = vpop.f32.mrb[65].mxu0 }
 0xd2c   : > { %v4450_v12 = vpop.f32.mrb[66].mxu0 }
 0xd2d   : > { %v4462_v4 = vmul.f32 %v5344_v5, %v4450_v12  ;;  %v6010_v43 = vpop.f32.mrb[67].mxu0  ;;  %v4470_v6 = vadd.f32 %v5345_v11, %v4461_v49 }
 0xd2f   : > { %v4471_v1 = vadd.f32 %v5345_v11, %v4462_v4 }
 0xd31   : > { %v4488_v45 = vpack.c.bf16 %v4471_v1, %v4470_v6 }
 0xd33   : > { %6028 = vmatmul.mubr.bf16.vlgmr.msra.gmra.mrb[84].mxu1 %v4488_v45 }
 0xe06   : > { %v4571_v58 = vpop.f32.mrb[84].mxu1 }
 0xe07   : > { %v4585_v52 = vmul.f32 %v5354_v54, %v4571_v58  ;;  %v6029_v13 = vpop.f32.mrb[85].mxu1 }
 0xe08   : > { %v4574_v62 = vpop.f32.mrb[86].mxu1 }
 0xe09   : > { %v4594_v8 = vadd.f32 %v5355_v51, %v4585_v52  ;;  %v4586_v31 = vmul.f32 %v5354_v54, %v4574_v62  ;;  %v6030_v40 = vpop.f32.mrb[87].mxu1 }
 0xe0b   : > { %v5356_v25 = vmul.f32 -1.442695, %v4594_v8  ;;  %v4595_v63 = vadd.f32 %v5355_v51, %v4586_v31 }
 0xe0d   : > { %6605 = vpow2.f32 %v5356_v25  ;;  %v5357_v30 = vmul.f32 -1.442695, %v4595_v63 }
 0xe0f   : > { %6607 = vpow2.f32 %v5357_v30 }
 0xe17   : > { %v6606_v59 = vpop.eup %6605 }
 0xe18   : > { %v4602_v9 = vadd.f32 1.0, %v6606_v59 }
 0xe19   : > { %v6608_v36 = vpop.eup %6607 }
 0xe1a   : > { %6609 = vrcp.f32 %v4602_v9  ;;  %v4603_v55 = vadd.f32 1.0, %v6608_v36 }
 0xe1c   : > { %6611 = vrcp.f32 %v4603_v55 }
 0xe24   : > { %v6610_v34 = vpop.eup %6609 }
 0xe25   : > { %v4608_v20 = vmul.f32 %v6610_v34, %v4594_v8 }
 0xe26   : > { %v6612_v56 = vpop.eup %6611 }
 0xe27   : > { %v4609_v3 = vmul.f32 %v6612_v56, %v4595_v63 }
 0xe29   : > { %v4610_v26 = vadd.f32 %v4609_v3, %v4608_v20 }
 0xe2b   : > { %v4611_v32 = vrot.slane %v4610_v26, 4 }
 0xe2d   : > { %v4612_v47 = vadd.f32 %v4611_v32, %v4610_v26 }
 0xe2f   : > { %v4613_v60 = vrot.slane %v4612_v47, 2 }
 0xe31   : > { %v4614_v24 = vadd.f32 %v4613_v60, %v4612_v47 }
 0xe33   : > { %v4615_v10 = vrot.slane %v4614_v24, 1 }
 0xe35   : > { %v4616_v28 = vadd.f32 %v4615_v10, %v4614_v24 }
 0xe37   : > { %v4617_v37 = vmul.f32 0.0625, %v4616_v28 }
 0xe39   : > { %v4634_v44 = vpack.c.bf16 %v4617_v37, %v4617_v37 }
 0xe3b   : > { %6048 = vmatmul.mubr.bf16.vlgmr.msra.gmra.mrb[68].mxu0 %v4634_v44 }
 0xf0e   : > { %v4718_v2 = vpop.f32.mrb[68].mxu0 }
 0xf0f   : > { %v4719_v22 = vadd.f32 %v4718_v2, %v4635_v29  ;;  %v6049_v27 = vpop.f32.mrb[69].mxu0 }
 0xf10   : > { %v4721_v19 = vpop.f32.mrb[70].mxu0 }
 0xf11   : > { %6613 = vtanh.f32 %v4719_v22  ;;  %v6050_v53 = vpop.f32.mrb[71].mxu0 }
 0xf1b   : > { %v6614_v42 = vpop.eup %6613 }
 0xf1c   : > { %v4725_v48 = vadd.f32 1.0, %v6614_v42 }
 0xf1e   : > { %v4726_v38 = vmul.f32 150.0, %v4725_v48 }
 0xf20   : > { %v4730_v18 = vrot.slane %v4726_v38, %v8359_v35 }
 0xf22   : > { %4731 = vst [vmem:[%s1357_s19] sm:$0xff] %v4730_v18 }
 0xf23   : > { %7274 = shalt.err (!%p7271_p2)
}
 0xf24   : > { %s7275_s17 = scalar_lea.hbm %s8575_s11, 128  ;;  %s7279_s3 = scalar_lea.hbm %s8744_s1, 256 }
 0xf25   : > { %p7276_p8 = scmp.ne.s32.totalorder %s8575_s11, %s7275_s17  ;;  %p7280_p3 = scmp.lt.u32.totalorder %s8575_s11, %s8744_s1 }
 0xf26   : > { %p7281_p11 = scmp.lt.u32.totalorder %s7279_s3, %s7275_s17  ;;  %p7283_p5 = scmp.lt.u32.totalorder %s7275_s17, %s8575_s11 }
 0xf27   : > { %p7277_p4 = pnand %p7276_p8, %p8745_p7 }
 0xf28   : > { %p7282_p12 = por %p7281_p11, %p7280_p3 }
 0xf29   : > { %p7278_p10 = pneg %p7277_p4 }
 0xf2a   : > { %p7284_p1 = por %p7283_p5, %p7282_p12 }
 0xf2c   : > { %p7285_p9 = pnand %p7284_p1, %p7278_p10 }
 0xf2e   : > { %7288 = shalt.err (!%p7285_p9)
}
 0xf2f   : > { %6141 = dma.vmem_to_hbm [thread:$0]  (%p8745_p7), %s8577_s25, 128, %s8575_s11, %s4733_s2  }
 0xf30 PF: > { %s4758_s14 = sand.u32 1, %s7359_s15   ;;  %p8746_p13 = scmp.ne.s32.totalorder %s8708_s4, 0 }
 0xf31   : > { %p8747_p6 = scmp.ge.s32.totalorder %s7371_s18, 2  ;;  %s4759_s19 = scalar_lea.sflag [#allocation4], %s4758_s14 }
 0xf33   : > { %p6215_p0 = pnand %p8747_p6, %p8746_p13 }
 0xf35   : > { %7354 = dma.done.wait (!%p6215_p0), %s4759_s19, 128  }
 0xf36   : > { %7356 = vsyncadd (!%p6215_p0), %s4759_s19, 4294967168  ;;  %p93_p2 = scmp.ge.s32.totalorder %s7938_s7, 4   ;;  %s8748_s15 = smov %s7363_s16 }
 0xf37   : > { %s8749_s16 = smov %s7367_s0  ;;  %s8750_s0 = smov %s7949_s6 }
 0xf38   : > { %s8751_s18 = smov %s7938_s7  ;;  %95 = sbr.rel (!%p93_p2) target bundleno = 89 (0x59), region = 355 }
 0xf3f   :  { %4764 = vsyncpa [#allocation3], 1 }
 0xf40   :  { %4766 = vsyncpa [#allocation3 + $0x1], 1 }
 0xf41   :  { %4767 = vsyncpa [#allocation6], 1 }
 0xf42   :  { %4768 = vsyncpa [#allocation9], 1 }
 0xf43   :  { %4769 = vsyncpa [#allocation12], 1 }
 0xf44   :  { %4770 = vsyncpa [#allocation15], 1 }
 0xf45   :  { %4771 = vsyncpa [#allocation18], 1 }
 0xf46   :  { %4772 = vsyncpa [#allocation21], 1 }
 0xf47   :  { %4773 = vsyncpa [#allocation24], 1 }
 0xf48   :  { %4774 = vsyncpa [#allocation27], 1 }
 0xf49   :  { %4775 = vsyncpa [#allocation30], 1 }
 0xf4a   :  { %4776 = vsyncpa [#allocation33], 1 }
 0xf4b   :  { %4777 = vsyncpa [#allocation36], 1 }
 0xf4c   :  { %4778 = vsyncpa [#allocation4], 1 }
 0xf4d   :  { %4780 = vsyncpa [#allocation4 + $0x1], 1 }

</bundles_post_ra>
